<compile_context>
chip_gen: v7x
topology: tpu7x:2x2x1
jax: 0.10.0
libtpu: 0.0.40
codegen_flags: <defaults>
</compile_context>

<pallas_src>
import functools

import jax
import jax.numpy as jnp
from jax import lax
from jax.experimental import pallas as pl
from jax.experimental.pallas import tpu as pltpu

EMB_DIM = 300
HIDDEN = 36
NUM_TAGS = 9
GP = 64                  # per-gate / per-direction-hidden padded lane width
D4 = 4 * GP              # gate columns per direction (i|f|g|o, each GP wide)
GW = 2 * D4              # total gate width: [fwd block | bwd block]
HW = 2 * GP              # packed hidden width: [fwd lanes 0:GP | bwd GP:2GP]
OUT_LANES = 128          # lane-dense output slab; real tags in [0, NUM_TAGS)


# ----------------------------------------------------------------------------
# Single fused kernel: embedding gather -> gate precompute -> bidirectional
# recurrence -> fc1 + log_softmax.
# ----------------------------------------------------------------------------
def _bilstm_tagger_kernel(words_ref, emb_tbl_ref, wih_ref, b_ref, whh_hbm,
                          wfc_hbm, bfc_ref, out_ref,
                          hout_ref, whh_vmem, wfc_vmem, dma_sem,
                          *, T, B, vocab):
    N = T * B

    # Kick off HBM->VMEM copies of the weights needed later; they overlap the
    # embedding matmul and the hoisted input projection below.
    whh_cp = pltpu.make_async_copy(whh_hbm, whh_vmem, dma_sem.at[0])
    wfc_cp = pltpu.make_async_copy(wfc_hbm, wfc_vmem, dma_sem.at[1])
    whh_cp.start()
    wfc_cp.start()

    # ---- Embedding lookup fused in-kernel -----------------------------------
    # Gather expressed as a one-hot matmul (vocab is tiny here).  Each row
    # selects a single table entry; downstream consumption rounds activations
    # to bf16 anyway, so default MXU precision is lossless for this model.
    # TODO(synk): for a large pretrained vocab, keep the gather outside the
    # kernel (or use a per-row DMA gather) instead of a one-hot matmul.
    onehot = (lax.broadcasted_iota(jnp.int32, (N, vocab), 1)
              == words_ref[...]).astype(jnp.float32)
    emb2d = jnp.dot(onehot, emb_tbl_ref[...],
                    preferred_element_type=jnp.float32)       # (N, EMB_DIM)

    # ---- Prologue: hoisted input projection (both dirs, all four gates) -----
    # gx[t*B + b, 0:D4]  = forward-direction gates of x[t] (+ combined bias)
    # gx[t*B + b, D4:GW] = backward-direction gates of x[t]
    # Kept as a value (a handful of vregs) -- no VMEM scratch round trip.
    gx = (jnp.dot(emb2d.astype(jnp.bfloat16), wih_ref[...],
                  preferred_element_type=jnp.float32) + b_ref[...])

    def gate_math(gates, c_d):
        # PyTorch gate order [i | f | g | o], each padded to GP lanes.  Padded
        # lanes stay exactly 0 through the recurrence (zero weights/bias =>
        # c_pad' = 0.5 * c_pad, h_pad = 0.5 * tanh(0) = 0).
        i = jax.nn.sigmoid(gates[:, 0 * GP:1 * GP])
        f = jax.nn.sigmoid(gates[:, 1 * GP:2 * GP])
        g = jnp.tanh(gates[:, 2 * GP:3 * GP])
        o = jax.nn.sigmoid(gates[:, 3 * GP:4 * GP])
        c_new = f * c_d + i * g
        h_new = o * jnp.tanh(c_new)
        return h_new, c_new

    # The recurrent weights are needed from here on.
    whh_cp.wait()

    # ---- Serial bidirectional recurrence (fully unrolled; T is static) ------
    h = jnp.zeros((B, HW), jnp.float32)   # [fwd | bwd] hidden in one 128-lane chunk
    c = jnp.zeros((B, HW), jnp.float32)
    for t in range(T):
        tb = T - 1 - t                    # backward-direction time index
        # One fused recurrent matmul for both directions (block-diagonal whh).
        hg = jnp.dot(h.astype(jnp.bfloat16), whh_vmem[...],
                     preferred_element_type=jnp.float32)       # (B, GW)
        gates_f = gx[t * B:(t + 1) * B, 0:D4] + hg[:, 0:D4]
        gates_b = gx[tb * B:(tb + 1) * B, D4:GW] + hg[:, D4:GW]
        h_f, c_f = gate_math(gates_f, c[:, 0:GP])
        h_b, c_b = gate_math(gates_b, c[:, GP:HW])
        # Forward output belongs to position t, backward output to T-1-t.
        # Each (row range, lane half) pair is written exactly once.
        hout_ref[t * B:(t + 1) * B, 0:GP] = h_f
        hout_ref[tb * B:(tb + 1) * B, GP:HW] = h_b
        h = jnp.concatenate([h_f, h_b], axis=-1)
        c = jnp.concatenate([c_f, c_b], axis=-1)

    # ---- Epilogue: fc1 + log_softmax over the (masked) tag dimension --------
    wfc_cp.wait()
    vec = (jnp.dot(hout_ref[...].astype(jnp.bfloat16), wfc_vmem[...],
                   preferred_element_type=jnp.float32) + bfc_ref[...])
    col = lax.broadcasted_iota(jnp.int32, vec.shape, 1)
    mask = col < NUM_TAGS
    m = jnp.max(jnp.where(mask, vec, -1e30), axis=-1, keepdims=True)
    e = jnp.where(mask, jnp.exp(vec - m), 0.0)
    lse = m + jnp.log(jnp.sum(e, axis=-1, keepdims=True))
    # Lane-dense (T*B, 128) store; real tags live in columns [0, NUM_TAGS).
    out_ref[...] = vec - lse


def bilstm_tagger(words2d, emb_tbl, wih, b, whh, wfc, bfc, *, T, B, vocab):
    """words2d: (T*B, 1) int32 -> (T*B, OUT_LANES) padded log-probs."""
    N = T * B
    vmem = pl.BlockSpec(memory_space=pltpu.MemorySpace.VMEM)
    hbm = pl.BlockSpec(memory_space=pl.ANY)       # raw HBM ref, manual DMA
    cost = pl.CostEstimate(
        flops=(2 * N * vocab * EMB_DIM            # one-hot embedding gather
               + 2 * N * EMB_DIM * GW             # hoisted input projection
               + 2 * T * B * HW * GW              # recurrence (h @ whh)
               + 2 * N * HW * OUT_LANES),         # fc1
        transcendentals=N * (5 * 2 * HIDDEN + OUT_LANES),
        bytes_accessed=(4 * N + 4 * vocab * EMB_DIM + 2 * EMB_DIM * GW
                        + 4 * GW + 2 * HW * GW + 2 * HW * OUT_LANES
                        + 4 * OUT_LANES + 4 * N * OUT_LANES),
    )
    return pl.pallas_call(
        functools.partial(_bilstm_tagger_kernel, T=T, B=B, vocab=vocab),
        out_shape=jax.ShapeDtypeStruct((N, OUT_LANES), jnp.float32),
        in_specs=[vmem, vmem, vmem, vmem, hbm, hbm, vmem],
        out_specs=vmem,
        scratch_shapes=[
            pltpu.VMEM((N, HW), jnp.float32),            # hout: fwd||bwd hidden
            pltpu.VMEM((HW, GW), jnp.bfloat16),          # whh landing buffer
            pltpu.VMEM((HW, OUT_LANES), jnp.bfloat16),   # wfc landing buffer
            pltpu.SemaphoreType.DMA((2,)),
        ],
        cost_estimate=cost,
    )(words2d, emb_tbl, wih, b, whh, wfc, bfc)


# ----------------------------------------------------------------------------
# Parameter packing (host-side, once): PyTorch layout -> lane-padded,
# direction-fused, bf16 layout consumed by the kernel.
# ----------------------------------------------------------------------------
def pack_params(params):
    H, E = HIDDEN, EMB_DIM

    def pad_ih(w):                       # (4H, E) -> (E, D4)
        out = jnp.zeros((E, D4), jnp.float32)
        wt = w.T                         # (E, 4H)
        for k in range(4):
            out = out.at[:, k * GP:k * GP + H].set(wt[:, k * H:(k + 1) * H])
        return out

    def pad_hh(w):                       # (4H, H) -> (GP, D4)
        out = jnp.zeros((GP, D4), jnp.float32)
        wt = w.T                         # (H, 4H)
        for k in range(4):
            out = out.at[:H, k * GP:k * GP + H].set(wt[:, k * H:(k + 1) * H])
        return out

    def pad_bias(b_ih, b_hh):            # (4H,) -> (1, D4)
        bb = b_ih + b_hh
        out = jnp.zeros((1, D4), jnp.float32)
        for k in range(4):
            out = out.at[0, k * GP:k * GP + H].set(bb[k * H:(k + 1) * H])
        return out

    # Input projection: [fwd gate block | bwd gate block] side by side (bf16).
    wih = jnp.concatenate(
        [pad_ih(params["weight_ih_f"]), pad_ih(params["weight_ih_b"])],
        axis=1).astype(jnp.bfloat16)

    # Recurrent projection: block-diagonal over directions (bf16).  The packed
    # hidden carry is [fwd lanes 0:GP | bwd lanes GP:2GP].
    whh = jnp.zeros((HW, GW), jnp.float32)
    whh = whh.at[0:GP, 0:D4].set(pad_hh(params["weight_hh_f"]))
    whh = whh.at[GP:HW, D4:GW].set(pad_hh(params["weight_hh_b"]))
    whh = whh.astype(jnp.bfloat16)

    # Combined LSTM bias stays f32 (added to the f32 gate accumulator).
    b = jnp.concatenate(
        [pad_bias(params["bias_ih_f"], params["bias_hh_f"]),
         pad_bias(params["bias_ih_b"], params["bias_hh_b"])], axis=1)

    # fc1: (NUM_TAGS, 2H) -> (HW, OUT_LANES); rows match hout's [fwd|bwd] halves.
    wt = params["w_fc"].T                # (2H, NUM_TAGS)
    wfc = jnp.zeros((HW, OUT_LANES), jnp.float32)
    wfc = wfc.at[0:H, 0:NUM_TAGS].set(wt[0:H])
    wfc = wfc.at[GP:GP + H, 0:NUM_TAGS].set(wt[H:2 * H])
    wfc = wfc.astype(jnp.bfloat16)
    bfc = jnp.zeros((1, OUT_LANES), jnp.float32).at[0, 0:NUM_TAGS].set(
        params["b_fc"])
    return wih, b, whh, wfc, bfc


# ----------------------------------------------------------------------------
# Full module forward
# ----------------------------------------------------------------------------
@jax.jit
def lstm_model_forward(input_words, embedding_table, packed):
    wih, b, whh, wfc, bfc = packed
    T, B = input_words.shape
    vocab = embedding_table.shape[0]
    words2d = input_words.reshape(T * B, 1).astype(jnp.int32)
    logp_pad = bilstm_tagger(words2d, embedding_table, wih, b, whh, wfc, bfc,
                             T=T, B=B, vocab=vocab)
    return logp_pad[:, :NUM_TAGS]


def init_params(key):
    """Parameters in PyTorch nn.LSTM / nn.Linear layout."""
    H, E = HIDDEN, EMB_DIM
    ks = jax.random.split(key, 10)
    s_lstm = 1.0 / jnp.sqrt(jnp.float32(H))
    s_fc = 1.0 / jnp.sqrt(jnp.float32(2 * H))

    def u(k, shape, s):
        return jax.random.uniform(k, shape, jnp.float32, -s, s)

    return {
        "weight_ih_f": u(ks[0], (4 * H, E), s_lstm),
        "weight_hh_f": u(ks[1], (4 * H, H), s_lstm),
        "bias_ih_f": u(ks[2], (4 * H,), s_lstm),
        "bias_hh_f": u(ks[3], (4 * H,), s_lstm),
        "weight_ih_b": u(ks[4], (4 * H, E), s_lstm),
        "weight_hh_b": u(ks[5], (4 * H, H), s_lstm),
        "bias_ih_b": u(ks[6], (4 * H,), s_lstm),
        "bias_hh_b": u(ks[7], (4 * H,), s_lstm),
        "w_fc": u(ks[8], (NUM_TAGS, 2 * H), s_fc),
        "b_fc": u(ks[9], (NUM_TAGS,), s_fc),
    }


# Pure-JAX reference (mirrors the PyTorch module) for correctness checking.
@jax.jit
def reference_forward(input_words, embedding_table, params):
    T, B = input_words.shape
    H = HIDDEN
    emb = embedding_table[input_words]                 # (T, B, E)

    def run_dir(suffix, xs):
        wih = params[f"weight_ih_{suffix}"]
        whh = params[f"weight_hh_{suffix}"]
        bias = params[f"bias_ih_{suffix}"] + params[f"bias_hh_{suffix}"]

        def step(carry, x):
            h, c = carry
            gates = x @ wih.T + h @ whh.T + bias
            i = jax.nn.sigmoid(gates[:, 0 * H:1 * H])
            f = jax.nn.sigmoid(gates[:, 1 * H:2 * H])
            g = jnp.tanh(gates[:, 2 * H:3 * H])
            o = jax.nn.sigmoid(gates[:, 3 * H:4 * H])
            c = f * c + i * g
            h = o * jnp.tanh(c)
            return (h, c), h

        init = (jnp.zeros((B, H), jnp.float32), jnp.zeros((B, H), jnp.float32))
        _, hs = lax.scan(step, init, xs)
        return hs                                      # (T, B, H)

    h_f = run_dir("f", emb)
    h_b = run_dir("b", emb[::-1])[::-1]
    out = jnp.concatenate([h_f, h_b], axis=-1).reshape(T * B, 2 * H)
    vec = out @ params["w_fc"].T + params["b_fc"]
    return jax.nn.log_softmax(vec, axis=-1)


if __name__ == "__main__":
    key = jax.random.PRNGKey(0)
    k_emb, k_words, k_params = jax.random.split(key, 3)

    VOCAB = 50
    T, B = 8, 2  # seq_len, batch  (batch_first=False => (T, B) indices)

    embedding_table = jax.random.normal(k_emb, (VOCAB, EMB_DIM), jnp.float32)
    input_words = jax.random.randint(k_words, (T, B), 0, VOCAB, jnp.int32)
    params = init_params(k_params)
    packed = pack_params(params)

    res = lstm_model_forward(input_words, embedding_table, packed)
    jax.block_until_ready(res)

    assert res.shape == (T * B, NUM_TAGS)
    assert res.dtype == jnp.float32
    # log_softmax rows should sum (in prob space) to ~1
    assert jnp.allclose(jnp.sum(jnp.exp(res), axis=1), 1.0, atol=1e-4)
    # Match the pure-JAX reference (tolerance covers bf16 weights / MXU
    # default-precision passes, which the old f32 kernel also incurred).
    ref = reference_forward(input_words, embedding_table, params)
    assert jnp.allclose(res, ref, atol=5e-2), float(jnp.max(jnp.abs(res - ref)))

    print("KERNEL_OK")
</pallas_src>

<mosaic_0001>
module attributes {stable_mosaic.version = 11 : i64} {
  func.func @_bilstm_tagger_kernel(%arg0: memref<16x1xi32, #tpu.memory_space<vmem>>, %arg1: memref<50x300xf32, #tpu.memory_space<vmem>>, %arg2: memref<300x512xbf16, #tpu.memory_space<vmem>>, %arg3: memref<1x512xf32, #tpu.memory_space<vmem>>, %arg4: memref<128x512xbf16, #tpu.memory_space<any>>, %arg5: memref<128x128xbf16, #tpu.memory_space<any>>, %arg6: memref<1x128xf32, #tpu.memory_space<vmem>>, %arg7: memref<16x128xf32, #tpu.memory_space<vmem>>, %arg8: memref<16x128xf32, #tpu.memory_space<vmem>>, %arg9: memref<128x512xbf16, #tpu.memory_space<vmem>>, %arg10: memref<128x128xbf16, #tpu.memory_space<vmem>>, %arg11: memref<2x!tpu.dma_semaphore, #tpu.memory_space<semaphore_mem>>) attributes {dimension_semantics = [], scalar_prefetch = 0 : i64, scratch_operands = 4 : i64, tpu.core_type = #tpu.core_type<tc>} {
    %c0_i32 = arith.constant 0 : i32
    %0 = tpu.memref_slice %arg11[%c0_i32] : memref<2x!tpu.dma_semaphore, #tpu.memory_space<semaphore_mem>> -> memref<1x!tpu.dma_semaphore, #tpu.memory_space<semaphore_mem>>
    %1 = tpu.memref_squeeze %0 : memref<1x!tpu.dma_semaphore, #tpu.memory_space<semaphore_mem>> -> memref<!tpu.dma_semaphore, #tpu.memory_space<semaphore_mem>>
    tpu.enqueue_dma source(%arg4 : memref<128x512xbf16, #tpu.memory_space<any>>) target(%arg9 : memref<128x512xbf16, #tpu.memory_space<vmem>>) target_semaphore(%1 : memref<!tpu.dma_semaphore, #tpu.memory_space<semaphore_mem>>)
    %c1_i32 = arith.constant 1 : i32
    %2 = tpu.memref_slice %arg11[%c1_i32] : memref<2x!tpu.dma_semaphore, #tpu.memory_space<semaphore_mem>> -> memref<1x!tpu.dma_semaphore, #tpu.memory_space<semaphore_mem>>
    %3 = tpu.memref_squeeze %2 : memref<1x!tpu.dma_semaphore, #tpu.memory_space<semaphore_mem>> -> memref<!tpu.dma_semaphore, #tpu.memory_space<semaphore_mem>>
    tpu.enqueue_dma source(%arg5 : memref<128x128xbf16, #tpu.memory_space<any>>) target(%arg10 : memref<128x128xbf16, #tpu.memory_space<vmem>>) target_semaphore(%3 : memref<!tpu.dma_semaphore, #tpu.memory_space<semaphore_mem>>)
    %4 = tpu.iota {dimensions = array<i32: 1>} : vector<16x50xi32>
    %c0 = arith.constant 0 : index
    %c0_0 = arith.constant 0 : index
    %5 = vector.load %arg0[%c0, %c0_0] : memref<16x1xi32, #tpu.memory_space<vmem>>, vector<16x1xi32>
    %6 = vector.broadcast %5 : vector<16x1xi32> to vector<16x50xi32>
    %7 = arith.cmpi eq, %4, %6 : vector<16x50xi32>
    %8 = arith.extui %7 : vector<16x50xi1> to vector<16x50xi32>
    %9 = arith.sitofp %8 : vector<16x50xi32> to vector<16x50xf32>
    %c0_1 = arith.constant 0 : index
    %c0_2 = arith.constant 0 : index
    %10 = vector.load %arg1[%c0_1, %c0_2] : memref<50x300xf32, #tpu.memory_space<vmem>>, vector<50x300xf32>
    %cst = arith.constant dense<0.000000e+00> : vector<16x300xf32>
    %11 = tpu.matmul %9, %10, %cst {dimension_numbers = #tpu.dot_dimension_numbers<[1], [0], [0], [1], [0, 0, 1, 1], [], []>} : vector<16x50xf32>, vector<50x300xf32>, vector<16x300xf32> -> vector<16x300xf32>
    %12 = arith.truncf %11 : vector<16x300xf32> to vector<16x300xbf16>
    %c0_3 = arith.constant 0 : index
    %c0_4 = arith.constant 0 : index
    %13 = vector.load %arg2[%c0_3, %c0_4] : memref<300x512xbf16, #tpu.memory_space<vmem>>, vector<300x512xbf16>
    %cst_5 = arith.constant dense<0.000000e+00> : vector<16x512xf32>
    %14 = tpu.matmul %12, %13, %cst_5 {dimension_numbers = #tpu.dot_dimension_numbers<[1], [0], [0], [1], [0, 0, 1, 1], [], []>} : vector<16x300xbf16>, vector<300x512xbf16>, vector<16x512xf32> -> vector<16x512xf32>
    %c0_6 = arith.constant 0 : index
    %c0_7 = arith.constant 0 : index
    %15 = vector.load %arg3[%c0_6, %c0_7] : memref<1x512xf32, #tpu.memory_space<vmem>>, vector<1x512xf32>
    %16 = vector.broadcast %15 : vector<1x512xf32> to vector<16x512xf32>
    %17 = arith.addf %14, %16 : vector<16x512xf32>
    %c0_i32_8 = arith.constant 0 : i32
    %18 = tpu.memref_slice %arg11[%c0_i32_8] : memref<2x!tpu.dma_semaphore, #tpu.memory_space<semaphore_mem>> -> memref<1x!tpu.dma_semaphore, #tpu.memory_space<semaphore_mem>>
    %19 = tpu.memref_squeeze %18 : memref<1x!tpu.dma_semaphore, #tpu.memory_space<semaphore_mem>> -> memref<!tpu.dma_semaphore, #tpu.memory_space<semaphore_mem>>
    tpu.wait_dma2 semaphore(%19 : memref<!tpu.dma_semaphore, #tpu.memory_space<semaphore_mem>>) src(%arg4 : memref<128x512xbf16, #tpu.memory_space<any>>) dst(%arg9 : memref<128x512xbf16, #tpu.memory_space<vmem>>)
    %cst_9 = arith.constant 0.000000e+00 : f32
    %20 = vector.broadcast %cst_9 : f32 to vector<2x128xf32>
    %cst_10 = arith.constant 0.000000e+00 : f32
    %21 = vector.broadcast %cst_10 : f32 to vector<2x128xf32>
    %22 = arith.truncf %20 : vector<2x128xf32> to vector<2x128xbf16>
    %c0_11 = arith.constant 0 : index
    %c0_12 = arith.constant 0 : index
    %23 = vector.load %arg9[%c0_11, %c0_12] : memref<128x512xbf16, #tpu.memory_space<vmem>>, vector<128x512xbf16>
    %cst_13 = arith.constant dense<0.000000e+00> : vector<2x512xf32>
    %24 = tpu.matmul %22, %23, %cst_13 {dimension_numbers = #tpu.dot_dimension_numbers<[1], [0], [0], [1], [0, 0, 1, 1], [], []>} : vector<2x128xbf16>, vector<128x512xbf16>, vector<2x512xf32> -> vector<2x512xf32>
    %25 = vector.extract_strided_slice %17 {offsets = [0, 0], sizes = [2, 256], strides = [1, 1]} : vector<16x512xf32> to vector<2x256xf32>
    %26 = vector.extract_strided_slice %24 {offsets = [0, 0], sizes = [2, 256], strides = [1, 1]} : vector<2x512xf32> to vector<2x256xf32>
    %27 = arith.addf %25, %26 : vector<2x256xf32>
    %28 = vector.extract_strided_slice %17 {offsets = [14, 256], sizes = [2, 256], strides = [1, 1]} : vector<16x512xf32> to vector<2x256xf32>
    %29 = vector.extract_strided_slice %24 {offsets = [0, 256], sizes = [2, 256], strides = [1, 1]} : vector<2x512xf32> to vector<2x256xf32>
    %30 = arith.addf %28, %29 : vector<2x256xf32>
    %31 = vector.extract_strided_slice %21 {offsets = [0, 0], sizes = [2, 64], strides = [1, 1]} : vector<2x128xf32> to vector<2x64xf32>
    %32 = vector.extract_strided_slice %27 {offsets = [0, 0], sizes = [2, 64], strides = [1, 1]} : vector<2x256xf32> to vector<2x64xf32>
    %33 = arith.negf %32 : vector<2x64xf32>
    %34 = math.exp %33 : vector<2x64xf32>
    %cst_14 = arith.constant 1.000000e+00 : f32
    %35 = vector.broadcast %cst_14 : f32 to vector<2x64xf32>
    %36 = arith.addf %35, %34 : vector<2x64xf32>
    %37 = arith.divf %35, %36 : vector<2x64xf32>
    %38 = vector.extract_strided_slice %27 {offsets = [0, 64], sizes = [2, 64], strides = [1, 1]} : vector<2x256xf32> to vector<2x64xf32>
    %39 = arith.negf %38 : vector<2x64xf32>
    %40 = math.exp %39 : vector<2x64xf32>
    %cst_15 = arith.constant 1.000000e+00 : f32
    %41 = vector.broadcast %cst_15 : f32 to vector<2x64xf32>
    %42 = arith.addf %41, %40 : vector<2x64xf32>
    %43 = arith.divf %41, %42 : vector<2x64xf32>
    %44 = vector.extract_strided_slice %27 {offsets = [0, 128], sizes = [2, 64], strides = [1, 1]} : vector<2x256xf32> to vector<2x64xf32>
    %45 = math.tanh %44 : vector<2x64xf32>
    %46 = vector.extract_strided_slice %27 {offsets = [0, 192], sizes = [2, 64], strides = [1, 1]} : vector<2x256xf32> to vector<2x64xf32>
    %47 = arith.negf %46 : vector<2x64xf32>
    %48 = math.exp %47 : vector<2x64xf32>
    %cst_16 = arith.constant 1.000000e+00 : f32
    %49 = vector.broadcast %cst_16 : f32 to vector<2x64xf32>
    %50 = arith.addf %49, %48 : vector<2x64xf32>
    %51 = arith.divf %49, %50 : vector<2x64xf32>
    %52 = arith.mulf %43, %31 : vector<2x64xf32>
    %53 = arith.mulf %37, %45 : vector<2x64xf32>
    %54 = arith.addf %52, %53 : vector<2x64xf32>
    %55 = math.tanh %54 : vector<2x64xf32>
    %56 = arith.mulf %51, %55 : vector<2x64xf32>
    %57 = vector.extract_strided_slice %21 {offsets = [0, 64], sizes = [2, 64], strides = [1, 1]} : vector<2x128xf32> to vector<2x64xf32>
    %58 = vector.extract_strided_slice %30 {offsets = [0, 0], sizes = [2, 64], strides = [1, 1]} : vector<2x256xf32> to vector<2x64xf32>
    %59 = arith.negf %58 : vector<2x64xf32>
    %60 = math.exp %59 : vector<2x64xf32>
    %cst_17 = arith.constant 1.000000e+00 : f32
    %61 = vector.broadcast %cst_17 : f32 to vector<2x64xf32>
    %62 = arith.addf %61, %60 : vector<2x64xf32>
    %63 = arith.divf %61, %62 : vector<2x64xf32>
    %64 = vector.extract_strided_slice %30 {offsets = [0, 64], sizes = [2, 64], strides = [1, 1]} : vector<2x256xf32> to vector<2x64xf32>
    %65 = arith.negf %64 : vector<2x64xf32>
    %66 = math.exp %65 : vector<2x64xf32>
    %cst_18 = arith.constant 1.000000e+00 : f32
    %67 = vector.broadcast %cst_18 : f32 to vector<2x64xf32>
    %68 = arith.addf %67, %66 : vector<2x64xf32>
    %69 = arith.divf %67, %68 : vector<2x64xf32>
    %70 = vector.extract_strided_slice %30 {offsets = [0, 128], sizes = [2, 64], strides = [1, 1]} : vector<2x256xf32> to vector<2x64xf32>
    %71 = math.tanh %70 : vector<2x64xf32>
    %72 = vector.extract_strided_slice %30 {offsets = [0, 192], sizes = [2, 64], strides = [1, 1]} : vector<2x256xf32> to vector<2x64xf32>
    %73 = arith.negf %72 : vector<2x64xf32>
    %74 = math.exp %73 : vector<2x64xf32>
    %cst_19 = arith.constant 1.000000e+00 : f32
    %75 = vector.broadcast %cst_19 : f32 to vector<2x64xf32>
    %76 = arith.addf %75, %74 : vector<2x64xf32>
    %77 = arith.divf %75, %76 : vector<2x64xf32>
    %78 = arith.mulf %69, %57 : vector<2x64xf32>
    %79 = arith.mulf %63, %71 : vector<2x64xf32>
    %80 = arith.addf %78, %79 : vector<2x64xf32>
    %81 = math.tanh %80 : vector<2x64xf32>
    %82 = arith.mulf %77, %81 : vector<2x64xf32>
    %c0_20 = arith.constant 0 : index
    %c0_21 = arith.constant 0 : index
    %83 = vector.load %arg8[%c0_20, %c0_21] : memref<16x128xf32, #tpu.memory_space<vmem>>, vector<2x64xf32>
    tpu.vector_store %arg8[%c0_20, %c0_21], %56 {strides = array<i32>} : memref<16x128xf32, #tpu.memory_space<vmem>>, vector<2x64xf32>,
    %c14 = arith.constant 14 : index
    %c64 = arith.constant 64 : index
    %84 = vector.load %arg8[%c14, %c64] : memref<16x128xf32, #tpu.memory_space<vmem>>, vector<2x64xf32>
    tpu.vector_store %arg8[%c14, %c64], %82 {strides = array<i32>} : memref<16x128xf32, #tpu.memory_space<vmem>>, vector<2x64xf32>,
    %85 = tpu.concatenate %56, %82 in 1 : vector<2x64xf32>, vector<2x64xf32> -> vector<2x128xf32>
    %86 = tpu.concatenate %54, %80 in 1 : vector<2x64xf32>, vector<2x64xf32> -> vector<2x128xf32>
    %87 = arith.truncf %85 : vector<2x128xf32> to vector<2x128xbf16>
    %c0_22 = arith.constant 0 : index
    %c0_23 = arith.constant 0 : index
    %88 = vector.load %arg9[%c0_22, %c0_23] : memref<128x512xbf16, #tpu.memory_space<vmem>>, vector<128x512xbf16>
    %cst_24 = arith.constant dense<0.000000e+00> : vector<2x512xf32>
    %89 = tpu.matmul %87, %88, %cst_24 {dimension_numbers = #tpu.dot_dimension_numbers<[1], [0], [0], [1], [0, 0, 1, 1], [], []>} : vector<2x128xbf16>, vector<128x512xbf16>, vector<2x512xf32> -> vector<2x512xf32>
    %90 = vector.extract_strided_slice %17 {offsets = [2, 0], sizes = [2, 256], strides = [1, 1]} : vector<16x512xf32> to vector<2x256xf32>
    %91 = vector.extract_strided_slice %89 {offsets = [0, 0], sizes = [2, 256], strides = [1, 1]} : vector<2x512xf32> to vector<2x256xf32>
    %92 = arith.addf %90, %91 : vector<2x256xf32>
    %93 = vector.extract_strided_slice %17 {offsets = [12, 256], sizes = [2, 256], strides = [1, 1]} : vector<16x512xf32> to vector<2x256xf32>
    %94 = vector.extract_strided_slice %89 {offsets = [0, 256], sizes = [2, 256], strides = [1, 1]} : vector<2x512xf32> to vector<2x256xf32>
    %95 = arith.addf %93, %94 : vector<2x256xf32>
    %96 = vector.extract_strided_slice %86 {offsets = [0, 0], sizes = [2, 64], strides = [1, 1]} : vector<2x128xf32> to vector<2x64xf32>
    %97 = vector.extract_strided_slice %92 {offsets = [0, 0], sizes = [2, 64], strides = [1, 1]} : vector<2x256xf32> to vector<2x64xf32>
    %98 = arith.negf %97 : vector<2x64xf32>
    %99 = math.exp %98 : vector<2x64xf32>
    %cst_25 = arith.constant 1.000000e+00 : f32
    %100 = vector.broadcast %cst_25 : f32 to vector<2x64xf32>
    %101 = arith.addf %100, %99 : vector<2x64xf32>
    %102 = arith.divf %100, %101 : vector<2x64xf32>
    %103 = vector.extract_strided_slice %92 {offsets = [0, 64], sizes = [2, 64], strides = [1, 1]} : vector<2x256xf32> to vector<2x64xf32>
    %104 = arith.negf %103 : vector<2x64xf32>
    %105 = math.exp %104 : vector<2x64xf32>
    %cst_26 = arith.constant 1.000000e+00 : f32
    %106 = vector.broadcast %cst_26 : f32 to vector<2x64xf32>
    %107 = arith.addf %106, %105 : vector<2x64xf32>
    %108 = arith.divf %106, %107 : vector<2x64xf32>
    %109 = vector.extract_strided_slice %92 {offsets = [0, 128], sizes = [2, 64], strides = [1, 1]} : vector<2x256xf32> to vector<2x64xf32>
    %110 = math.tanh %109 : vector<2x64xf32>
    %111 = vector.extract_strided_slice %92 {offsets = [0, 192], sizes = [2, 64], strides = [1, 1]} : vector<2x256xf32> to vector<2x64xf32>
    %112 = arith.negf %111 : vector<2x64xf32>
    %113 = math.exp %112 : vector<2x64xf32>
    %cst_27 = arith.constant 1.000000e+00 : f32
    %114 = vector.broadcast %cst_27 : f32 to vector<2x64xf32>
    %115 = arith.addf %114, %113 : vector<2x64xf32>
    %116 = arith.divf %114, %115 : vector<2x64xf32>
    %117 = arith.mulf %108, %96 : vector<2x64xf32>
    %118 = arith.mulf %102, %110 : vector<2x64xf32>
    %119 = arith.addf %117, %118 : vector<2x64xf32>
    %120 = math.tanh %119 : vector<2x64xf32>
    %121 = arith.mulf %116, %120 : vector<2x64xf32>
    %122 = vector.extract_strided_slice %86 {offsets = [0, 64], sizes = [2, 64], strides = [1, 1]} : vector<2x128xf32> to vector<2x64xf32>
    %123 = vector.extract_strided_slice %95 {offsets = [0, 0], sizes = [2, 64], strides = [1, 1]} : vector<2x256xf32> to vector<2x64xf32>
    %124 = arith.negf %123 : vector<2x64xf32>
    %125 = math.exp %124 : vector<2x64xf32>
    %cst_28 = arith.constant 1.000000e+00 : f32
    %126 = vector.broadcast %cst_28 : f32 to vector<2x64xf32>
    %127 = arith.addf %126, %125 : vector<2x64xf32>
    %128 = arith.divf %126, %127 : vector<2x64xf32>
    %129 = vector.extract_strided_slice %95 {offsets = [0, 64], sizes = [2, 64], strides = [1, 1]} : vector<2x256xf32> to vector<2x64xf32>
    %130 = arith.negf %129 : vector<2x64xf32>
    %131 = math.exp %130 : vector<2x64xf32>
    %cst_29 = arith.constant 1.000000e+00 : f32
    %132 = vector.broadcast %cst_29 : f32 to vector<2x64xf32>
    %133 = arith.addf %132, %131 : vector<2x64xf32>
    %134 = arith.divf %132, %133 : vector<2x64xf32>
    %135 = vector.extract_strided_slice %95 {offsets = [0, 128], sizes = [2, 64], strides = [1, 1]} : vector<2x256xf32> to vector<2x64xf32>
    %136 = math.tanh %135 : vector<2x64xf32>
    %137 = vector.extract_strided_slice %95 {offsets = [0, 192], sizes = [2, 64], strides = [1, 1]} : vector<2x256xf32> to vector<2x64xf32>
    %138 = arith.negf %137 : vector<2x64xf32>
    %139 = math.exp %138 : vector<2x64xf32>
    %cst_30 = arith.constant 1.000000e+00 : f32
    %140 = vector.broadcast %cst_30 : f32 to vector<2x64xf32>
    %141 = arith.addf %140, %139 : vector<2x64xf32>
    %142 = arith.divf %140, %141 : vector<2x64xf32>
    %143 = arith.mulf %134, %122 : vector<2x64xf32>
    %144 = arith.mulf %128, %136 : vector<2x64xf32>
    %145 = arith.addf %143, %144 : vector<2x64xf32>
    %146 = math.tanh %145 : vector<2x64xf32>
    %147 = arith.mulf %142, %146 : vector<2x64xf32>
    %c2 = arith.constant 2 : index
    %c0_31 = arith.constant 0 : index
    %148 = vector.load %arg8[%c2, %c0_31] : memref<16x128xf32, #tpu.memory_space<vmem>>, vector<2x64xf32>
    tpu.vector_store %arg8[%c2, %c0_31], %121 {strides = array<i32>} : memref<16x128xf32, #tpu.memory_space<vmem>>, vector<2x64xf32>,
    %c12 = arith.constant 12 : index
    %c64_32 = arith.constant 64 : index
    %149 = vector.load %arg8[%c12, %c64_32] : memref<16x128xf32, #tpu.memory_space<vmem>>, vector<2x64xf32>
    tpu.vector_store %arg8[%c12, %c64_32], %147 {strides = array<i32>} : memref<16x128xf32, #tpu.memory_space<vmem>>, vector<2x64xf32>,
    %150 = tpu.concatenate %121, %147 in 1 : vector<2x64xf32>, vector<2x64xf32> -> vector<2x128xf32>
    %151 = tpu.concatenate %119, %145 in 1 : vector<2x64xf32>, vector<2x64xf32> -> vector<2x128xf32>
    %152 = arith.truncf %150 : vector<2x128xf32> to vector<2x128xbf16>
    %c0_33 = arith.constant 0 : index
    %c0_34 = arith.constant 0 : index
    %153 = vector.load %arg9[%c0_33, %c0_34] : memref<128x512xbf16, #tpu.memory_space<vmem>>, vector<128x512xbf16>
    %cst_35 = arith.constant dense<0.000000e+00> : vector<2x512xf32>
    %154 = tpu.matmul %152, %153, %cst_35 {dimension_numbers = #tpu.dot_dimension_numbers<[1], [0], [0], [1], [0, 0, 1, 1], [], []>} : vector<2x128xbf16>, vector<128x512xbf16>, vector<2x512xf32> -> vector<2x512xf32>
    %155 = vector.extract_strided_slice %17 {offsets = [4, 0], sizes = [2, 256], strides = [1, 1]} : vector<16x512xf32> to vector<2x256xf32>
    %156 = vector.extract_strided_slice %154 {offsets = [0, 0], sizes = [2, 256], strides = [1, 1]} : vector<2x512xf32> to vector<2x256xf32>
    %157 = arith.addf %155, %156 : vector<2x256xf32>
    %158 = vector.extract_strided_slice %17 {offsets = [10, 256], sizes = [2, 256], strides = [1, 1]} : vector<16x512xf32> to vector<2x256xf32>
    %159 = vector.extract_strided_slice %154 {offsets = [0, 256], sizes = [2, 256], strides = [1, 1]} : vector<2x512xf32> to vector<2x256xf32>
    %160 = arith.addf %158, %159 : vector<2x256xf32>
    %161 = vector.extract_strided_slice %151 {offsets = [0, 0], sizes = [2, 64], strides = [1, 1]} : vector<2x128xf32> to vector<2x64xf32>
    %162 = vector.extract_strided_slice %157 {offsets = [0, 0], sizes = [2, 64], strides = [1, 1]} : vector<2x256xf32> to vector<2x64xf32>
    %163 = arith.negf %162 : vector<2x64xf32>
    %164 = math.exp %163 : vector<2x64xf32>
    %cst_36 = arith.constant 1.000000e+00 : f32
    %165 = vector.broadcast %cst_36 : f32 to vector<2x64xf32>
    %166 = arith.addf %165, %164 : vector<2x64xf32>
    %167 = arith.divf %165, %166 : vector<2x64xf32>
    %168 = vector.extract_strided_slice %157 {offsets = [0, 64], sizes = [2, 64], strides = [1, 1]} : vector<2x256xf32> to vector<2x64xf32>
    %169 = arith.negf %168 : vector<2x64xf32>
    %170 = math.exp %169 : vector<2x64xf32>
    %cst_37 = arith.constant 1.000000e+00 : f32
    %171 = vector.broadcast %cst_37 : f32 to vector<2x64xf32>
    %172 = arith.addf %171, %170 : vector<2x64xf32>
    %173 = arith.divf %171, %172 : vector<2x64xf32>
    %174 = vector.extract_strided_slice %157 {offsets = [0, 128], sizes = [2, 64], strides = [1, 1]} : vector<2x256xf32> to vector<2x64xf32>
    %175 = math.tanh %174 : vector<2x64xf32>
    %176 = vector.extract_strided_slice %157 {offsets = [0, 192], sizes = [2, 64], strides = [1, 1]} : vector<2x256xf32> to vector<2x64xf32>
    %177 = arith.negf %176 : vector<2x64xf32>
    %178 = math.exp %177 : vector<2x64xf32>
    %cst_38 = arith.constant 1.000000e+00 : f32
    %179 = vector.broadcast %cst_38 : f32 to vector<2x64xf32>
    %180 = arith.addf %179, %178 : vector<2x64xf32>
    %181 = arith.divf %179, %180 : vector<2x64xf32>
    %182 = arith.mulf %173, %161 : vector<2x64xf32>
    %183 = arith.mulf %167, %175 : vector<2x64xf32>
    %184 = arith.addf %182, %183 : vector<2x64xf32>
    %185 = math.tanh %184 : vector<2x64xf32>
    %186 = arith.mulf %181, %185 : vector<2x64xf32>
    %187 = vector.extract_strided_slice %151 {offsets = [0, 64], sizes = [2, 64], strides = [1, 1]} : vector<2x128xf32> to vector<2x64xf32>
    %188 = vector.extract_strided_slice %160 {offsets = [0, 0], sizes = [2, 64], strides = [1, 1]} : vector<2x256xf32> to vector<2x64xf32>
    %189 = arith.negf %188 : vector<2x64xf32>
    %190 = math.exp %189 : vector<2x64xf32>
    %cst_39 = arith.constant 1.000000e+00 : f32
    %191 = vector.broadcast %cst_39 : f32 to vector<2x64xf32>
    %192 = arith.addf %191, %190 : vector<2x64xf32>
    %193 = arith.divf %191, %192 : vector<2x64xf32>
    %194 = vector.extract_strided_slice %160 {offsets = [0, 64], sizes = [2, 64], strides = [1, 1]} : vector<2x256xf32> to vector<2x64xf32>
    %195 = arith.negf %194 : vector<2x64xf32>
    %196 = math.exp %195 : vector<2x64xf32>
    %cst_40 = arith.constant 1.000000e+00 : f32
    %197 = vector.broadcast %cst_40 : f32 to vector<2x64xf32>
    %198 = arith.addf %197, %196 : vector<2x64xf32>
    %199 = arith.divf %197, %198 : vector<2x64xf32>
    %200 = vector.extract_strided_slice %160 {offsets = [0, 128], sizes = [2, 64], strides = [1, 1]} : vector<2x256xf32> to vector<2x64xf32>
    %201 = math.tanh %200 : vector<2x64xf32>
    %202 = vector.extract_strided_slice %160 {offsets = [0, 192], sizes = [2, 64], strides = [1, 1]} : vector<2x256xf32> to vector<2x64xf32>
    %203 = arith.negf %202 : vector<2x64xf32>
    %204 = math.exp %203 : vector<2x64xf32>
    %cst_41 = arith.constant 1.000000e+00 : f32
    %205 = vector.broadcast %cst_41 : f32 to vector<2x64xf32>
    %206 = arith.addf %205, %204 : vector<2x64xf32>
    %207 = arith.divf %205, %206 : vector<2x64xf32>
    %208 = arith.mulf %199, %187 : vector<2x64xf32>
    %209 = arith.mulf %193, %201 : vector<2x64xf32>
    %210 = arith.addf %208, %209 : vector<2x64xf32>
    %211 = math.tanh %210 : vector<2x64xf32>
    %212 = arith.mulf %207, %211 : vector<2x64xf32>
    %c4 = arith.constant 4 : index
    %c0_42 = arith.constant 0 : index
    %213 = vector.load %arg8[%c4, %c0_42] : memref<16x128xf32, #tpu.memory_space<vmem>>, vector<2x64xf32>
    tpu.vector_store %arg8[%c4, %c0_42], %186 {strides = array<i32>} : memref<16x128xf32, #tpu.memory_space<vmem>>, vector<2x64xf32>,
    %c10 = arith.constant 10 : index
    %c64_43 = arith.constant 64 : index
    %214 = vector.load %arg8[%c10, %c64_43] : memref<16x128xf32, #tpu.memory_space<vmem>>, vector<2x64xf32>
    tpu.vector_store %arg8[%c10, %c64_43], %212 {strides = array<i32>} : memref<16x128xf32, #tpu.memory_space<vmem>>, vector<2x64xf32>,
    %215 = tpu.concatenate %186, %212 in 1 : vector<2x64xf32>, vector<2x64xf32> -> vector<2x128xf32>
    %216 = tpu.concatenate %184, %210 in 1 : vector<2x64xf32>, vector<2x64xf32> -> vector<2x128xf32>
    %217 = arith.truncf %215 : vector<2x128xf32> to vector<2x128xbf16>
    %c0_44 = arith.constant 0 : index
    %c0_45 = arith.constant 0 : index
    %218 = vector.load %arg9[%c0_44, %c0_45] : memref<128x512xbf16, #tpu.memory_space<vmem>>, vector<128x512xbf16>
    %cst_46 = arith.constant dense<0.000000e+00> : vector<2x512xf32>
    %219 = tpu.matmul %217, %218, %cst_46 {dimension_numbers = #tpu.dot_dimension_numbers<[1], [0], [0], [1], [0, 0, 1, 1], [], []>} : vector<2x128xbf16>, vector<128x512xbf16>, vector<2x512xf32> -> vector<2x512xf32>
    %220 = vector.extract_strided_slice %17 {offsets = [6, 0], sizes = [2, 256], strides = [1, 1]} : vector<16x512xf32> to vector<2x256xf32>
    %221 = vector.extract_strided_slice %219 {offsets = [0, 0], sizes = [2, 256], strides = [1, 1]} : vector<2x512xf32> to vector<2x256xf32>
    %222 = arith.addf %220, %221 : vector<2x256xf32>
    %223 = vector.extract_strided_slice %17 {offsets = [8, 256], sizes = [2, 256], strides = [1, 1]} : vector<16x512xf32> to vector<2x256xf32>
    %224 = vector.extract_strided_slice %219 {offsets = [0, 256], sizes = [2, 256], strides = [1, 1]} : vector<2x512xf32> to vector<2x256xf32>
    %225 = arith.addf %223, %224 : vector<2x256xf32>
    %226 = vector.extract_strided_slice %216 {offsets = [0, 0], sizes = [2, 64], strides = [1, 1]} : vector<2x128xf32> to vector<2x64xf32>
    %227 = vector.extract_strided_slice %222 {offsets = [0, 0], sizes = [2, 64], strides = [1, 1]} : vector<2x256xf32> to vector<2x64xf32>
    %228 = arith.negf %227 : vector<2x64xf32>
    %229 = math.exp %228 : vector<2x64xf32>
    %cst_47 = arith.constant 1.000000e+00 : f32
    %230 = vector.broadcast %cst_47 : f32 to vector<2x64xf32>
    %231 = arith.addf %230, %229 : vector<2x64xf32>
    %232 = arith.divf %230, %231 : vector<2x64xf32>
    %233 = vector.extract_strided_slice %222 {offsets = [0, 64], sizes = [2, 64], strides = [1, 1]} : vector<2x256xf32> to vector<2x64xf32>
    %234 = arith.negf %233 : vector<2x64xf32>
    %235 = math.exp %234 : vector<2x64xf32>
    %cst_48 = arith.constant 1.000000e+00 : f32
    %236 = vector.broadcast %cst_48 : f32 to vector<2x64xf32>
    %237 = arith.addf %236, %235 : vector<2x64xf32>
    %238 = arith.divf %236, %237 : vector<2x64xf32>
    %239 = vector.extract_strided_slice %222 {offsets = [0, 128], sizes = [2, 64], strides = [1, 1]} : vector<2x256xf32> to vector<2x64xf32>
    %240 = math.tanh %239 : vector<2x64xf32>
    %241 = vector.extract_strided_slice %222 {offsets = [0, 192], sizes = [2, 64], strides = [1, 1]} : vector<2x256xf32> to vector<2x64xf32>
    %242 = arith.negf %241 : vector<2x64xf32>
    %243 = math.exp %242 : vector<2x64xf32>
    %cst_49 = arith.constant 1.000000e+00 : f32
    %244 = vector.broadcast %cst_49 : f32 to vector<2x64xf32>
    %245 = arith.addf %244, %243 : vector<2x64xf32>
    %246 = arith.divf %244, %245 : vector<2x64xf32>
    %247 = arith.mulf %238, %226 : vector<2x64xf32>
    %248 = arith.mulf %232, %240 : vector<2x64xf32>
    %249 = arith.addf %247, %248 : vector<2x64xf32>
    %250 = math.tanh %249 : vector<2x64xf32>
    %251 = arith.mulf %246, %250 : vector<2x64xf32>
    %252 = vector.extract_strided_slice %216 {offsets = [0, 64], sizes = [2, 64], strides = [1, 1]} : vector<2x128xf32> to vector<2x64xf32>
    %253 = vector.extract_strided_slice %225 {offsets = [0, 0], sizes = [2, 64], strides = [1, 1]} : vector<2x256xf32> to vector<2x64xf32>
    %254 = arith.negf %253 : vector<2x64xf32>
    %255 = math.exp %254 : vector<2x64xf32>
    %cst_50 = arith.constant 1.000000e+00 : f32
    %256 = vector.broadcast %cst_50 : f32 to vector<2x64xf32>
    %257 = arith.addf %256, %255 : vector<2x64xf32>
    %258 = arith.divf %256, %257 : vector<2x64xf32>
    %259 = vector.extract_strided_slice %225 {offsets = [0, 64], sizes = [2, 64], strides = [1, 1]} : vector<2x256xf32> to vector<2x64xf32>
    %260 = arith.negf %259 : vector<2x64xf32>
    %261 = math.exp %260 : vector<2x64xf32>
    %cst_51 = arith.constant 1.000000e+00 : f32
    %262 = vector.broadcast %cst_51 : f32 to vector<2x64xf32>
    %263 = arith.addf %262, %261 : vector<2x64xf32>
    %264 = arith.divf %262, %263 : vector<2x64xf32>
    %265 = vector.extract_strided_slice %225 {offsets = [0, 128], sizes = [2, 64], strides = [1, 1]} : vector<2x256xf32> to vector<2x64xf32>
    %266 = math.tanh %265 : vector<2x64xf32>
    %267 = vector.extract_strided_slice %225 {offsets = [0, 192], sizes = [2, 64], strides = [1, 1]} : vector<2x256xf32> to vector<2x64xf32>
    %268 = arith.negf %267 : vector<2x64xf32>
    %269 = math.exp %268 : vector<2x64xf32>
    %cst_52 = arith.constant 1.000000e+00 : f32
    %270 = vector.broadcast %cst_52 : f32 to vector<2x64xf32>
    %271 = arith.addf %270, %269 : vector<2x64xf32>
    %272 = arith.divf %270, %271 : vector<2x64xf32>
    %273 = arith.mulf %264, %252 : vector<2x64xf32>
    %274 = arith.mulf %258, %266 : vector<2x64xf32>
    %275 = arith.addf %273, %274 : vector<2x64xf32>
    %276 = math.tanh %275 : vector<2x64xf32>
    %277 = arith.mulf %272, %276 : vector<2x64xf32>
    %c6 = arith.constant 6 : index
    %c0_53 = arith.constant 0 : index
    %278 = vector.load %arg8[%c6, %c0_53] : memref<16x128xf32, #tpu.memory_space<vmem>>, vector<2x64xf32>
    tpu.vector_store %arg8[%c6, %c0_53], %251 {strides = array<i32>} : memref<16x128xf32, #tpu.memory_space<vmem>>, vector<2x64xf32>,
    %c8 = arith.constant 8 : index
    %c64_54 = arith.constant 64 : index
    %279 = vector.load %arg8[%c8, %c64_54] : memref<16x128xf32, #tpu.memory_space<vmem>>, vector<2x64xf32>
    tpu.vector_store %arg8[%c8, %c64_54], %277 {strides = array<i32>} : memref<16x128xf32, #tpu.memory_space<vmem>>, vector<2x64xf32>,
    %280 = tpu.concatenate %251, %277 in 1 : vector<2x64xf32>, vector<2x64xf32> -> vector<2x128xf32>
    %281 = tpu.concatenate %249, %275 in 1 : vector<2x64xf32>, vector<2x64xf32> -> vector<2x128xf32>
    %282 = arith.truncf %280 : vector<2x128xf32> to vector<2x128xbf16>
    %c0_55 = arith.constant 0 : index
    %c0_56 = arith.constant 0 : index
    %283 = vector.load %arg9[%c0_55, %c0_56] : memref<128x512xbf16, #tpu.memory_space<vmem>>, vector<128x512xbf16>
    %cst_57 = arith.constant dense<0.000000e+00> : vector<2x512xf32>
    %284 = tpu.matmul %282, %283, %cst_57 {dimension_numbers = #tpu.dot_dimension_numbers<[1], [0], [0], [1], [0, 0, 1, 1], [], []>} : vector<2x128xbf16>, vector<128x512xbf16>, vector<2x512xf32> -> vector<2x512xf32>
    %285 = vector.extract_strided_slice %17 {offsets = [8, 0], sizes = [2, 256], strides = [1, 1]} : vector<16x512xf32> to vector<2x256xf32>
    %286 = vector.extract_strided_slice %284 {offsets = [0, 0], sizes = [2, 256], strides = [1, 1]} : vector<2x512xf32> to vector<2x256xf32>
    %287 = arith.addf %285, %286 : vector<2x256xf32>
    %288 = vector.extract_strided_slice %17 {offsets = [6, 256], sizes = [2, 256], strides = [1, 1]} : vector<16x512xf32> to vector<2x256xf32>
    %289 = vector.extract_strided_slice %284 {offsets = [0, 256], sizes = [2, 256], strides = [1, 1]} : vector<2x512xf32> to vector<2x256xf32>
    %290 = arith.addf %288, %289 : vector<2x256xf32>
    %291 = vector.extract_strided_slice %281 {offsets = [0, 0], sizes = [2, 64], strides = [1, 1]} : vector<2x128xf32> to vector<2x64xf32>
    %292 = vector.extract_strided_slice %287 {offsets = [0, 0], sizes = [2, 64], strides = [1, 1]} : vector<2x256xf32> to vector<2x64xf32>
    %293 = arith.negf %292 : vector<2x64xf32>
    %294 = math.exp %293 : vector<2x64xf32>
    %cst_58 = arith.constant 1.000000e+00 : f32
    %295 = vector.broadcast %cst_58 : f32 to vector<2x64xf32>
    %296 = arith.addf %295, %294 : vector<2x64xf32>
    %297 = arith.divf %295, %296 : vector<2x64xf32>
    %298 = vector.extract_strided_slice %287 {offsets = [0, 64], sizes = [2, 64], strides = [1, 1]} : vector<2x256xf32> to vector<2x64xf32>
    %299 = arith.negf %298 : vector<2x64xf32>
    %300 = math.exp %299 : vector<2x64xf32>
    %cst_59 = arith.constant 1.000000e+00 : f32
    %301 = vector.broadcast %cst_59 : f32 to vector<2x64xf32>
    %302 = arith.addf %301, %300 : vector<2x64xf32>
    %303 = arith.divf %301, %302 : vector<2x64xf32>
    %304 = vector.extract_strided_slice %287 {offsets = [0, 128], sizes = [2, 64], strides = [1, 1]} : vector<2x256xf32> to vector<2x64xf32>
    %305 = math.tanh %304 : vector<2x64xf32>
    %306 = vector.extract_strided_slice %287 {offsets = [0, 192], sizes = [2, 64], strides = [1, 1]} : vector<2x256xf32> to vector<2x64xf32>
    %307 = arith.negf %306 : vector<2x64xf32>
    %308 = math.exp %307 : vector<2x64xf32>
    %cst_60 = arith.constant 1.000000e+00 : f32
    %309 = vector.broadcast %cst_60 : f32 to vector<2x64xf32>
    %310 = arith.addf %309, %308 : vector<2x64xf32>
    %311 = arith.divf %309, %310 : vector<2x64xf32>
    %312 = arith.mulf %303, %291 : vector<2x64xf32>
    %313 = arith.mulf %297, %305 : vector<2x64xf32>
    %314 = arith.addf %312, %313 : vector<2x64xf32>
    %315 = math.tanh %314 : vector<2x64xf32>
    %316 = arith.mulf %311, %315 : vector<2x64xf32>
    %317 = vector.extract_strided_slice %281 {offsets = [0, 64], sizes = [2, 64], strides = [1, 1]} : vector<2x128xf32> to vector<2x64xf32>
    %318 = vector.extract_strided_slice %290 {offsets = [0, 0], sizes = [2, 64], strides = [1, 1]} : vector<2x256xf32> to vector<2x64xf32>
    %319 = arith.negf %318 : vector<2x64xf32>
    %320 = math.exp %319 : vector<2x64xf32>
    %cst_61 = arith.constant 1.000000e+00 : f32
    %321 = vector.broadcast %cst_61 : f32 to vector<2x64xf32>
    %322 = arith.addf %321, %320 : vector<2x64xf32>
    %323 = arith.divf %321, %322 : vector<2x64xf32>
    %324 = vector.extract_strided_slice %290 {offsets = [0, 64], sizes = [2, 64], strides = [1, 1]} : vector<2x256xf32> to vector<2x64xf32>
    %325 = arith.negf %324 : vector<2x64xf32>
    %326 = math.exp %325 : vector<2x64xf32>
    %cst_62 = arith.constant 1.000000e+00 : f32
    %327 = vector.broadcast %cst_62 : f32 to vector<2x64xf32>
    %328 = arith.addf %327, %326 : vector<2x64xf32>
    %329 = arith.divf %327, %328 : vector<2x64xf32>
    %330 = vector.extract_strided_slice %290 {offsets = [0, 128], sizes = [2, 64], strides = [1, 1]} : vector<2x256xf32> to vector<2x64xf32>
    %331 = math.tanh %330 : vector<2x64xf32>
    %332 = vector.extract_strided_slice %290 {offsets = [0, 192], sizes = [2, 64], strides = [1, 1]} : vector<2x256xf32> to vector<2x64xf32>
    %333 = arith.negf %332 : vector<2x64xf32>
    %334 = math.exp %333 : vector<2x64xf32>
    %cst_63 = arith.constant 1.000000e+00 : f32
    %335 = vector.broadcast %cst_63 : f32 to vector<2x64xf32>
    %336 = arith.addf %335, %334 : vector<2x64xf32>
    %337 = arith.divf %335, %336 : vector<2x64xf32>
    %338 = arith.mulf %329, %317 : vector<2x64xf32>
    %339 = arith.mulf %323, %331 : vector<2x64xf32>
    %340 = arith.addf %338, %339 : vector<2x64xf32>
    %341 = math.tanh %340 : vector<2x64xf32>
    %342 = arith.mulf %337, %341 : vector<2x64xf32>
    %c8_64 = arith.constant 8 : index
    %c0_65 = arith.constant 0 : index
    %343 = vector.load %arg8[%c8_64, %c0_65] : memref<16x128xf32, #tpu.memory_space<vmem>>, vector<2x64xf32>
    tpu.vector_store %arg8[%c8_64, %c0_65], %316 {strides = array<i32>} : memref<16x128xf32, #tpu.memory_space<vmem>>, vector<2x64xf32>,
    %c6_66 = arith.constant 6 : index
    %c64_67 = arith.constant 64 : index
    %344 = vector.load %arg8[%c6_66, %c64_67] : memref<16x128xf32, #tpu.memory_space<vmem>>, vector<2x64xf32>
    tpu.vector_store %arg8[%c6_66, %c64_67], %342 {strides = array<i32>} : memref<16x128xf32, #tpu.memory_space<vmem>>, vector<2x64xf32>,
    %345 = tpu.concatenate %316, %342 in 1 : vector<2x64xf32>, vector<2x64xf32> -> vector<2x128xf32>
    %346 = tpu.concatenate %314, %340 in 1 : vector<2x64xf32>, vector<2x64xf32> -> vector<2x128xf32>
    %347 = arith.truncf %345 : vector<2x128xf32> to vector<2x128xbf16>
    %c0_68 = arith.constant 0 : index
    %c0_69 = arith.constant 0 : index
    %348 = vector.load %arg9[%c0_68, %c0_69] : memref<128x512xbf16, #tpu.memory_space<vmem>>, vector<128x512xbf16>
    %cst_70 = arith.constant dense<0.000000e+00> : vector<2x512xf32>
    %349 = tpu.matmul %347, %348, %cst_70 {dimension_numbers = #tpu.dot_dimension_numbers<[1], [0], [0], [1], [0, 0, 1, 1], [], []>} : vector<2x128xbf16>, vector<128x512xbf16>, vector<2x512xf32> -> vector<2x512xf32>
    %350 = vector.extract_strided_slice %17 {offsets = [10, 0], sizes = [2, 256], strides = [1, 1]} : vector<16x512xf32> to vector<2x256xf32>
    %351 = vector.extract_strided_slice %349 {offsets = [0, 0], sizes = [2, 256], strides = [1, 1]} : vector<2x512xf32> to vector<2x256xf32>
    %352 = arith.addf %350, %351 : vector<2x256xf32>
    %353 = vector.extract_strided_slice %17 {offsets = [4, 256], sizes = [2, 256], strides = [1, 1]} : vector<16x512xf32> to vector<2x256xf32>
    %354 = vector.extract_strided_slice %349 {offsets = [0, 256], sizes = [2, 256], strides = [1, 1]} : vector<2x512xf32> to vector<2x256xf32>
    %355 = arith.addf %353, %354 : vector<2x256xf32>
    %356 = vector.extract_strided_slice %346 {offsets = [0, 0], sizes = [2, 64], strides = [1, 1]} : vector<2x128xf32> to vector<2x64xf32>
    %357 = vector.extract_strided_slice %352 {offsets = [0, 0], sizes = [2, 64], strides = [1, 1]} : vector<2x256xf32> to vector<2x64xf32>
    %358 = arith.negf %357 : vector<2x64xf32>
    %359 = math.exp %358 : vector<2x64xf32>
    %cst_71 = arith.constant 1.000000e+00 : f32
    %360 = vector.broadcast %cst_71 : f32 to vector<2x64xf32>
    %361 = arith.addf %360, %359 : vector<2x64xf32>
    %362 = arith.divf %360, %361 : vector<2x64xf32>
    %363 = vector.extract_strided_slice %352 {offsets = [0, 64], sizes = [2, 64], strides = [1, 1]} : vector<2x256xf32> to vector<2x64xf32>
    %364 = arith.negf %363 : vector<2x64xf32>
    %365 = math.exp %364 : vector<2x64xf32>
    %cst_72 = arith.constant 1.000000e+00 : f32
    %366 = vector.broadcast %cst_72 : f32 to vector<2x64xf32>
    %367 = arith.addf %366, %365 : vector<2x64xf32>
    %368 = arith.divf %366, %367 : vector<2x64xf32>
    %369 = vector.extract_strided_slice %352 {offsets = [0, 128], sizes = [2, 64], strides = [1, 1]} : vector<2x256xf32> to vector<2x64xf32>
    %370 = math.tanh %369 : vector<2x64xf32>
    %371 = vector.extract_strided_slice %352 {offsets = [0, 192], sizes = [2, 64], strides = [1, 1]} : vector<2x256xf32> to vector<2x64xf32>
    %372 = arith.negf %371 : vector<2x64xf32>
    %373 = math.exp %372 : vector<2x64xf32>
    %cst_73 = arith.constant 1.000000e+00 : f32
    %374 = vector.broadcast %cst_73 : f32 to vector<2x64xf32>
    %375 = arith.addf %374, %373 : vector<2x64xf32>
    %376 = arith.divf %374, %375 : vector<2x64xf32>
    %377 = arith.mulf %368, %356 : vector<2x64xf32>
    %378 = arith.mulf %362, %370 : vector<2x64xf32>
    %379 = arith.addf %377, %378 : vector<2x64xf32>
    %380 = math.tanh %379 : vector<2x64xf32>
    %381 = arith.mulf %376, %380 : vector<2x64xf32>
    %382 = vector.extract_strided_slice %346 {offsets = [0, 64], sizes = [2, 64], strides = [1, 1]} : vector<2x128xf32> to vector<2x64xf32>
    %383 = vector.extract_strided_slice %355 {offsets = [0, 0], sizes = [2, 64], strides = [1, 1]} : vector<2x256xf32> to vector<2x64xf32>
    %384 = arith.negf %383 : vector<2x64xf32>
    %385 = math.exp %384 : vector<2x64xf32>
    %cst_74 = arith.constant 1.000000e+00 : f32
    %386 = vector.broadcast %cst_74 : f32 to vector<2x64xf32>
    %387 = arith.addf %386, %385 : vector<2x64xf32>
    %388 = arith.divf %386, %387 : vector<2x64xf32>
    %389 = vector.extract_strided_slice %355 {offsets = [0, 64], sizes = [2, 64], strides = [1, 1]} : vector<2x256xf32> to vector<2x64xf32>
    %390 = arith.negf %389 : vector<2x64xf32>
    %391 = math.exp %390 : vector<2x64xf32>
    %cst_75 = arith.constant 1.000000e+00 : f32
    %392 = vector.broadcast %cst_75 : f32 to vector<2x64xf32>
    %393 = arith.addf %392, %391 : vector<2x64xf32>
    %394 = arith.divf %392, %393 : vector<2x64xf32>
    %395 = vector.extract_strided_slice %355 {offsets = [0, 128], sizes = [2, 64], strides = [1, 1]} : vector<2x256xf32> to vector<2x64xf32>
    %396 = math.tanh %395 : vector<2x64xf32>
    %397 = vector.extract_strided_slice %355 {offsets = [0, 192], sizes = [2, 64], strides = [1, 1]} : vector<2x256xf32> to vector<2x64xf32>
    %398 = arith.negf %397 : vector<2x64xf32>
    %399 = math.exp %398 : vector<2x64xf32>
    %cst_76 = arith.constant 1.000000e+00 : f32
    %400 = vector.broadcast %cst_76 : f32 to vector<2x64xf32>
    %401 = arith.addf %400, %399 : vector<2x64xf32>
    %402 = arith.divf %400, %401 : vector<2x64xf32>
    %403 = arith.mulf %394, %382 : vector<2x64xf32>
    %404 = arith.mulf %388, %396 : vector<2x64xf32>
    %405 = arith.addf %403, %404 : vector<2x64xf32>
    %406 = math.tanh %405 : vector<2x64xf32>
    %407 = arith.mulf %402, %406 : vector<2x64xf32>
    %c10_77 = arith.constant 10 : index
    %c0_78 = arith.constant 0 : index
    %408 = vector.load %arg8[%c10_77, %c0_78] : memref<16x128xf32, #tpu.memory_space<vmem>>, vector<2x64xf32>
    tpu.vector_store %arg8[%c10_77, %c0_78], %381 {strides = array<i32>} : memref<16x128xf32, #tpu.memory_space<vmem>>, vector<2x64xf32>,
    %c4_79 = arith.constant 4 : index
    %c64_80 = arith.constant 64 : index
    %409 = vector.load %arg8[%c4_79, %c64_80] : memref<16x128xf32, #tpu.memory_space<vmem>>, vector<2x64xf32>
    tpu.vector_store %arg8[%c4_79, %c64_80], %407 {strides = array<i32>} : memref<16x128xf32, #tpu.memory_space<vmem>>, vector<2x64xf32>,
    %410 = tpu.concatenate %381, %407 in 1 : vector<2x64xf32>, vector<2x64xf32> -> vector<2x128xf32>
    %411 = tpu.concatenate %379, %405 in 1 : vector<2x64xf32>, vector<2x64xf32> -> vector<2x128xf32>
    %412 = arith.truncf %410 : vector<2x128xf32> to vector<2x128xbf16>
    %c0_81 = arith.constant 0 : index
    %c0_82 = arith.constant 0 : index
    %413 = vector.load %arg9[%c0_81, %c0_82] : memref<128x512xbf16, #tpu.memory_space<vmem>>, vector<128x512xbf16>
    %cst_83 = arith.constant dense<0.000000e+00> : vector<2x512xf32>
    %414 = tpu.matmul %412, %413, %cst_83 {dimension_numbers = #tpu.dot_dimension_numbers<[1], [0], [0], [1], [0, 0, 1, 1], [], []>} : vector<2x128xbf16>, vector<128x512xbf16>, vector<2x512xf32> -> vector<2x512xf32>
    %415 = vector.extract_strided_slice %17 {offsets = [12, 0], sizes = [2, 256], strides = [1, 1]} : vector<16x512xf32> to vector<2x256xf32>
    %416 = vector.extract_strided_slice %414 {offsets = [0, 0], sizes = [2, 256], strides = [1, 1]} : vector<2x512xf32> to vector<2x256xf32>
    %417 = arith.addf %415, %416 : vector<2x256xf32>
    %418 = vector.extract_strided_slice %17 {offsets = [2, 256], sizes = [2, 256], strides = [1, 1]} : vector<16x512xf32> to vector<2x256xf32>
    %419 = vector.extract_strided_slice %414 {offsets = [0, 256], sizes = [2, 256], strides = [1, 1]} : vector<2x512xf32> to vector<2x256xf32>
    %420 = arith.addf %418, %419 : vector<2x256xf32>
    %421 = vector.extract_strided_slice %411 {offsets = [0, 0], sizes = [2, 64], strides = [1, 1]} : vector<2x128xf32> to vector<2x64xf32>
    %422 = vector.extract_strided_slice %417 {offsets = [0, 0], sizes = [2, 64], strides = [1, 1]} : vector<2x256xf32> to vector<2x64xf32>
    %423 = arith.negf %422 : vector<2x64xf32>
    %424 = math.exp %423 : vector<2x64xf32>
    %cst_84 = arith.constant 1.000000e+00 : f32
    %425 = vector.broadcast %cst_84 : f32 to vector<2x64xf32>
    %426 = arith.addf %425, %424 : vector<2x64xf32>
    %427 = arith.divf %425, %426 : vector<2x64xf32>
    %428 = vector.extract_strided_slice %417 {offsets = [0, 64], sizes = [2, 64], strides = [1, 1]} : vector<2x256xf32> to vector<2x64xf32>
    %429 = arith.negf %428 : vector<2x64xf32>
    %430 = math.exp %429 : vector<2x64xf32>
    %cst_85 = arith.constant 1.000000e+00 : f32
    %431 = vector.broadcast %cst_85 : f32 to vector<2x64xf32>
    %432 = arith.addf %431, %430 : vector<2x64xf32>
    %433 = arith.divf %431, %432 : vector<2x64xf32>
    %434 = vector.extract_strided_slice %417 {offsets = [0, 128], sizes = [2, 64], strides = [1, 1]} : vector<2x256xf32> to vector<2x64xf32>
    %435 = math.tanh %434 : vector<2x64xf32>
    %436 = vector.extract_strided_slice %417 {offsets = [0, 192], sizes = [2, 64], strides = [1, 1]} : vector<2x256xf32> to vector<2x64xf32>
    %437 = arith.negf %436 : vector<2x64xf32>
    %438 = math.exp %437 : vector<2x64xf32>
    %cst_86 = arith.constant 1.000000e+00 : f32
    %439 = vector.broadcast %cst_86 : f32 to vector<2x64xf32>
    %440 = arith.addf %439, %438 : vector<2x64xf32>
    %441 = arith.divf %439, %440 : vector<2x64xf32>
    %442 = arith.mulf %433, %421 : vector<2x64xf32>
    %443 = arith.mulf %427, %435 : vector<2x64xf32>
    %444 = arith.addf %442, %443 : vector<2x64xf32>
    %445 = math.tanh %444 : vector<2x64xf32>
    %446 = arith.mulf %441, %445 : vector<2x64xf32>
    %447 = vector.extract_strided_slice %411 {offsets = [0, 64], sizes = [2, 64], strides = [1, 1]} : vector<2x128xf32> to vector<2x64xf32>
    %448 = vector.extract_strided_slice %420 {offsets = [0, 0], sizes = [2, 64], strides = [1, 1]} : vector<2x256xf32> to vector<2x64xf32>
    %449 = arith.negf %448 : vector<2x64xf32>
    %450 = math.exp %449 : vector<2x64xf32>
    %cst_87 = arith.constant 1.000000e+00 : f32
    %451 = vector.broadcast %cst_87 : f32 to vector<2x64xf32>
    %452 = arith.addf %451, %450 : vector<2x64xf32>
    %453 = arith.divf %451, %452 : vector<2x64xf32>
    %454 = vector.extract_strided_slice %420 {offsets = [0, 64], sizes = [2, 64], strides = [1, 1]} : vector<2x256xf32> to vector<2x64xf32>
    %455 = arith.negf %454 : vector<2x64xf32>
    %456 = math.exp %455 : vector<2x64xf32>
    %cst_88 = arith.constant 1.000000e+00 : f32
    %457 = vector.broadcast %cst_88 : f32 to vector<2x64xf32>
    %458 = arith.addf %457, %456 : vector<2x64xf32>
    %459 = arith.divf %457, %458 : vector<2x64xf32>
    %460 = vector.extract_strided_slice %420 {offsets = [0, 128], sizes = [2, 64], strides = [1, 1]} : vector<2x256xf32> to vector<2x64xf32>
    %461 = math.tanh %460 : vector<2x64xf32>
    %462 = vector.extract_strided_slice %420 {offsets = [0, 192], sizes = [2, 64], strides = [1, 1]} : vector<2x256xf32> to vector<2x64xf32>
    %463 = arith.negf %462 : vector<2x64xf32>
    %464 = math.exp %463 : vector<2x64xf32>
    %cst_89 = arith.constant 1.000000e+00 : f32
    %465 = vector.broadcast %cst_89 : f32 to vector<2x64xf32>
    %466 = arith.addf %465, %464 : vector<2x64xf32>
    %467 = arith.divf %465, %466 : vector<2x64xf32>
    %468 = arith.mulf %459, %447 : vector<2x64xf32>
    %469 = arith.mulf %453, %461 : vector<2x64xf32>
    %470 = arith.addf %468, %469 : vector<2x64xf32>
    %471 = math.tanh %470 : vector<2x64xf32>
    %472 = arith.mulf %467, %471 : vector<2x64xf32>
    %c12_90 = arith.constant 12 : index
    %c0_91 = arith.constant 0 : index
    %473 = vector.load %arg8[%c12_90, %c0_91] : memref<16x128xf32, #tpu.memory_space<vmem>>, vector<2x64xf32>
    tpu.vector_store %arg8[%c12_90, %c0_91], %446 {strides = array<i32>} : memref<16x128xf32, #tpu.memory_space<vmem>>, vector<2x64xf32>,
    %c2_92 = arith.constant 2 : index
    %c64_93 = arith.constant 64 : index
    %474 = vector.load %arg8[%c2_92, %c64_93] : memref<16x128xf32, #tpu.memory_space<vmem>>, vector<2x64xf32>
    tpu.vector_store %arg8[%c2_92, %c64_93], %472 {strides = array<i32>} : memref<16x128xf32, #tpu.memory_space<vmem>>, vector<2x64xf32>,
    %475 = tpu.concatenate %446, %472 in 1 : vector<2x64xf32>, vector<2x64xf32> -> vector<2x128xf32>
    %476 = tpu.concatenate %444, %470 in 1 : vector<2x64xf32>, vector<2x64xf32> -> vector<2x128xf32>
    %477 = arith.truncf %475 : vector<2x128xf32> to vector<2x128xbf16>
    %c0_94 = arith.constant 0 : index
    %c0_95 = arith.constant 0 : index
    %478 = vector.load %arg9[%c0_94, %c0_95] : memref<128x512xbf16, #tpu.memory_space<vmem>>, vector<128x512xbf16>
    %cst_96 = arith.constant dense<0.000000e+00> : vector<2x512xf32>
    %479 = tpu.matmul %477, %478, %cst_96 {dimension_numbers = #tpu.dot_dimension_numbers<[1], [0], [0], [1], [0, 0, 1, 1], [], []>} : vector<2x128xbf16>, vector<128x512xbf16>, vector<2x512xf32> -> vector<2x512xf32>
    %480 = vector.extract_strided_slice %17 {offsets = [14, 0], sizes = [2, 256], strides = [1, 1]} : vector<16x512xf32> to vector<2x256xf32>
    %481 = vector.extract_strided_slice %479 {offsets = [0, 0], sizes = [2, 256], strides = [1, 1]} : vector<2x512xf32> to vector<2x256xf32>
    %482 = arith.addf %480, %481 : vector<2x256xf32>
    %483 = vector.extract_strided_slice %17 {offsets = [0, 256], sizes = [2, 256], strides = [1, 1]} : vector<16x512xf32> to vector<2x256xf32>
    %484 = vector.extract_strided_slice %479 {offsets = [0, 256], sizes = [2, 256], strides = [1, 1]} : vector<2x512xf32> to vector<2x256xf32>
    %485 = arith.addf %483, %484 : vector<2x256xf32>
    %486 = vector.extract_strided_slice %476 {offsets = [0, 0], sizes = [2, 64], strides = [1, 1]} : vector<2x128xf32> to vector<2x64xf32>
    %487 = vector.extract_strided_slice %482 {offsets = [0, 0], sizes = [2, 64], strides = [1, 1]} : vector<2x256xf32> to vector<2x64xf32>
    %488 = arith.negf %487 : vector<2x64xf32>
    %489 = math.exp %488 : vector<2x64xf32>
    %cst_97 = arith.constant 1.000000e+00 : f32
    %490 = vector.broadcast %cst_97 : f32 to vector<2x64xf32>
    %491 = arith.addf %490, %489 : vector<2x64xf32>
    %492 = arith.divf %490, %491 : vector<2x64xf32>
    %493 = vector.extract_strided_slice %482 {offsets = [0, 64], sizes = [2, 64], strides = [1, 1]} : vector<2x256xf32> to vector<2x64xf32>
    %494 = arith.negf %493 : vector<2x64xf32>
    %495 = math.exp %494 : vector<2x64xf32>
    %cst_98 = arith.constant 1.000000e+00 : f32
    %496 = vector.broadcast %cst_98 : f32 to vector<2x64xf32>
    %497 = arith.addf %496, %495 : vector<2x64xf32>
    %498 = arith.divf %496, %497 : vector<2x64xf32>
    %499 = vector.extract_strided_slice %482 {offsets = [0, 128], sizes = [2, 64], strides = [1, 1]} : vector<2x256xf32> to vector<2x64xf32>
    %500 = math.tanh %499 : vector<2x64xf32>
    %501 = vector.extract_strided_slice %482 {offsets = [0, 192], sizes = [2, 64], strides = [1, 1]} : vector<2x256xf32> to vector<2x64xf32>
    %502 = arith.negf %501 : vector<2x64xf32>
    %503 = math.exp %502 : vector<2x64xf32>
    %cst_99 = arith.constant 1.000000e+00 : f32
    %504 = vector.broadcast %cst_99 : f32 to vector<2x64xf32>
    %505 = arith.addf %504, %503 : vector<2x64xf32>
    %506 = arith.divf %504, %505 : vector<2x64xf32>
    %507 = arith.mulf %498, %486 : vector<2x64xf32>
    %508 = arith.mulf %492, %500 : vector<2x64xf32>
    %509 = arith.addf %507, %508 : vector<2x64xf32>
    %510 = math.tanh %509 : vector<2x64xf32>
    %511 = arith.mulf %506, %510 : vector<2x64xf32>
    %512 = vector.extract_strided_slice %476 {offsets = [0, 64], sizes = [2, 64], strides = [1, 1]} : vector<2x128xf32> to vector<2x64xf32>
    %513 = vector.extract_strided_slice %485 {offsets = [0, 0], sizes = [2, 64], strides = [1, 1]} : vector<2x256xf32> to vector<2x64xf32>
    %514 = arith.negf %513 : vector<2x64xf32>
    %515 = math.exp %514 : vector<2x64xf32>
    %cst_100 = arith.constant 1.000000e+00 : f32
    %516 = vector.broadcast %cst_100 : f32 to vector<2x64xf32>
    %517 = arith.addf %516, %515 : vector<2x64xf32>
    %518 = arith.divf %516, %517 : vector<2x64xf32>
    %519 = vector.extract_strided_slice %485 {offsets = [0, 64], sizes = [2, 64], strides = [1, 1]} : vector<2x256xf32> to vector<2x64xf32>
    %520 = arith.negf %519 : vector<2x64xf32>
    %521 = math.exp %520 : vector<2x64xf32>
    %cst_101 = arith.constant 1.000000e+00 : f32
    %522 = vector.broadcast %cst_101 : f32 to vector<2x64xf32>
    %523 = arith.addf %522, %521 : vector<2x64xf32>
    %524 = arith.divf %522, %523 : vector<2x64xf32>
    %525 = vector.extract_strided_slice %485 {offsets = [0, 128], sizes = [2, 64], strides = [1, 1]} : vector<2x256xf32> to vector<2x64xf32>
    %526 = math.tanh %525 : vector<2x64xf32>
    %527 = vector.extract_strided_slice %485 {offsets = [0, 192], sizes = [2, 64], strides = [1, 1]} : vector<2x256xf32> to vector<2x64xf32>
    %528 = arith.negf %527 : vector<2x64xf32>
    %529 = math.exp %528 : vector<2x64xf32>
    %cst_102 = arith.constant 1.000000e+00 : f32
    %530 = vector.broadcast %cst_102 : f32 to vector<2x64xf32>
    %531 = arith.addf %530, %529 : vector<2x64xf32>
    %532 = arith.divf %530, %531 : vector<2x64xf32>
    %533 = arith.mulf %524, %512 : vector<2x64xf32>
    %534 = arith.mulf %518, %526 : vector<2x64xf32>
    %535 = arith.addf %533, %534 : vector<2x64xf32>
    %536 = math.tanh %535 : vector<2x64xf32>
    %537 = arith.mulf %532, %536 : vector<2x64xf32>
    %c14_103 = arith.constant 14 : index
    %c0_104 = arith.constant 0 : index
    %538 = vector.load %arg8[%c14_103, %c0_104] : memref<16x128xf32, #tpu.memory_space<vmem>>, vector<2x64xf32>
    tpu.vector_store %arg8[%c14_103, %c0_104], %511 {strides = array<i32>} : memref<16x128xf32, #tpu.memory_space<vmem>>, vector<2x64xf32>,
    %c0_105 = arith.constant 0 : index
    %c64_106 = arith.constant 64 : index
    %539 = vector.load %arg8[%c0_105, %c64_106] : memref<16x128xf32, #tpu.memory_space<vmem>>, vector<2x64xf32>
    tpu.vector_store %arg8[%c0_105, %c64_106], %537 {strides = array<i32>} : memref<16x128xf32, #tpu.memory_space<vmem>>, vector<2x64xf32>,
    %c1_i32_107 = arith.constant 1 : i32
    %540 = tpu.memref_slice %arg11[%c1_i32_107] : memref<2x!tpu.dma_semaphore, #tpu.memory_space<semaphore_mem>> -> memref<1x!tpu.dma_semaphore, #tpu.memory_space<semaphore_mem>>
    %541 = tpu.memref_squeeze %540 : memref<1x!tpu.dma_semaphore, #tpu.memory_space<semaphore_mem>> -> memref<!tpu.dma_semaphore, #tpu.memory_space<semaphore_mem>>
    tpu.wait_dma2 semaphore(%541 : memref<!tpu.dma_semaphore, #tpu.memory_space<semaphore_mem>>) src(%arg5 : memref<128x128xbf16, #tpu.memory_space<any>>) dst(%arg10 : memref<128x128xbf16, #tpu.memory_space<vmem>>)
    %c0_108 = arith.constant 0 : index
    %c0_109 = arith.constant 0 : index
    %542 = vector.load %arg8[%c0_108, %c0_109] : memref<16x128xf32, #tpu.memory_space<vmem>>, vector<16x128xf32>
    %543 = arith.truncf %542 : vector<16x128xf32> to vector<16x128xbf16>
    %c0_110 = arith.constant 0 : index
    %c0_111 = arith.constant 0 : index
    %544 = vector.load %arg10[%c0_110, %c0_111] : memref<128x128xbf16, #tpu.memory_space<vmem>>, vector<128x128xbf16>
    %cst_112 = arith.constant dense<0.000000e+00> : vector<16x128xf32>
    %545 = tpu.matmul %543, %544, %cst_112 {dimension_numbers = #tpu.dot_dimension_numbers<[1], [0], [0], [1], [0, 0, 1, 1], [], []>} : vector<16x128xbf16>, vector<128x128xbf16>, vector<16x128xf32> -> vector<16x128xf32>
    %c0_113 = arith.constant 0 : index
    %c0_114 = arith.constant 0 : index
    %546 = vector.load %arg6[%c0_113, %c0_114] : memref<1x128xf32, #tpu.memory_space<vmem>>, vector<1x128xf32>
    %547 = vector.broadcast %546 : vector<1x128xf32> to vector<16x128xf32>
    %548 = arith.addf %545, %547 : vector<16x128xf32>
    %549 = tpu.iota {dimensions = array<i32: 1>} : vector<16x128xi32>
    %c9_i32 = arith.constant 9 : i32
    %550 = vector.broadcast %c9_i32 : i32 to vector<16x128xi32>
    %551 = arith.cmpi slt, %549, %550 : vector<16x128xi32>
    %cst_115 = arith.constant -1.000000e+30 : f32
    %552 = vector.broadcast %cst_115 : f32 to vector<16x128xf32>
    %553 = arith.select %551, %548, %552 : vector<16x128xi1>, vector<16x128xf32>
    %cst_116 = arith.constant dense<0xFF800000> : vector<16xf32>
    %554 = vector.multi_reduction <maximumf>, %553, %cst_116 [1] : vector<16x128xf32> to vector<16xf32>
    %555 = vector.shape_cast %554 : vector<16xf32> to vector<16x1xf32>
    %556 = vector.broadcast %555 : vector<16x1xf32> to vector<16x128xf32>
    %557 = arith.subf %548, %556 : vector<16x128xf32>
    %558 = math.exp %557 : vector<16x128xf32>
    %cst_117 = arith.constant 0.000000e+00 : f32
    %559 = vector.broadcast %cst_117 : f32 to vector<16x128xf32>
    %560 = arith.select %551, %558, %559 : vector<16x128xi1>, vector<16x128xf32>
    %cst_118 = arith.constant dense<0.000000e+00> : vector<16xf32>
    %561 = vector.multi_reduction <add>, %560, %cst_118 [1] : vector<16x128xf32> to vector<16xf32>
    %562 = vector.shape_cast %561 : vector<16xf32> to vector<16x1xf32>
    %563 = math.log %562 : vector<16x1xf32>
    %564 = arith.addf %555, %563 : vector<16x1xf32>
    %565 = vector.broadcast %564 : vector<16x1xf32> to vector<16x128xf32>
    %566 = arith.subf %548, %565 : vector<16x128xf32>
    %c0_119 = arith.constant 0 : index
    %c0_120 = arith.constant 0 : index
    %567 = vector.load %arg7[%c0_119, %c0_120] : memref<16x128xf32, #tpu.memory_space<vmem>>, vector<16x128xf32>
    tpu.vector_store %arg7[%c0_119, %c0_120], %566 {strides = array<i32>} : memref<16x128xf32, #tpu.memory_space<vmem>>, vector<16x128xf32>,
    return
  }
}

</mosaic_0001>

<bundles_post_ra>
// kernel: lstm_model_forward.1
= control target key start
LH: loop header
LB: loop body
LE: loop exit
PB: predicated region body
PF: predicated region fallthrough
CT: control target
= control target key end

     0   :  { %12 = vsyncpa [#allocation7], 0  ;;  %s4042_s0 = inlined_call_operand.vmem [shape: s32[16,1], index: 0, kind: input, shape index: {}]   ;;  %s4043_s1 = inlined_call_operand.hbm [shape: f32[50,300], index: 1, kind: input, shape index: {}]   ;;  %s4044_s2 = inlined_call_operand.hbm [shape: bf16[300,512], index: 2, kind: input, shape index: {}]   ;;  %s4045_s3 = inlined_call_operand.vmem [shape: f32[1,512], index: 3, kind: input, shape index: {}]   ;;  %s4046_s4 = inlined_call_operand.hbm [shape: bf16[128,512], index: 4, kind: input, shape index: {}]   ;;  %s4047_s5 = inlined_call_operand.hbm [shape: bf16[128,128], index: 5, kind: input, shape index: {}]   ;;  %s4048_s6 = inlined_call_operand.vmem [shape: f32[1,128], index: 6, kind: input, shape index: {}]   ;;  %s4049_s7 = inlined_call_operand.hbm [shape: f32[16,128], index: 7, kind: output, shape index: {}]  }
   0x1   :  { %13 = vsyncpa [#allocation10], 0 }
   0x2   :  { %14 = vsyncpa [#allocation8], 0  ;;  %s3325_s24 = smov [#allocation6]   ;;  %s3227_s28 = scalar_lea.hbm %s4043_s1, 2688 }
   0x3   :  { %s22_s25 = sshll.u32 %s3325_s24, 4  ;;  %p3228_p0 = scmp.ne.s32.totalorder %s4043_s1, %s3227_s28  ;;  %s23_s25 = int_to_ptr.vmem [resolvable:$true] %s22_s25 }
   0x4   :  { %p3231_p1 = scmp.lt.u32.totalorder %s3227_s28, %s4043_s1 }
   0x6   :  { %p3233_p2 = pnand %p3231_p1, %p3228_p0 }
   0x8   :  { %3236 = shalt.err (!%p3233_p2)
}
   0x9   :  { %s3237_s10 = scalar_lea.vmem %s23_s25, 2688  ;;  %p3242_p4 = scmp.lt.s32.totalorder %s23_s25, %s23_s25 }
   0xa   :  { %p3238_p3 = scmp.ne.s32.totalorder %s23_s25, %s3237_s10  ;;  %p3243_p5 = scmp.lt.s32.totalorder %s3237_s10, %s3237_s10 }
   0xc   :  { %p3244_p6 = por %p3243_p5, %p3242_p4 }
   0xe   :  { %p3245_p7 = pnand %p3244_p6, %p3238_p3 }
  0x10   :  { %3248 = shalt.err (!%p3245_p7)
}
  0x11   :  { %s3326_s11 = smov 384   ;;  %s3327_s12 = smov 24  }
  0x12   :  { %28 = dma.hbm_to_vmem [thread:$0]  %s4043_s1, 2688, %s23_s25, [#allocation7], %s3326_s11, %s3326_s11, %s3327_s12  }
  0x13   :  { %s3328_s15 = smov [#allocation9]   ;;  %s3249_s19 = scalar_lea.hbm %s4044_s2, 9728 }
  0x14   :  { %s34_s16 = sshll.u32 %s3328_s15, 4  ;;  %p3250_p8 = scmp.ne.s32.totalorder %s4044_s2, %s3249_s19  ;;  %s35_s16 = int_to_ptr.vmem [resolvable:$true] %s34_s16 }
  0x15   :  { %p3253_p9 = scmp.lt.u32.totalorder %s3249_s19, %s4044_s2 }
  0x17   :  { %p3255_p10 = pnand %p3253_p9, %p3250_p8 }
  0x19   :  { %3258 = shalt.err (!%p3255_p10)
}
  0x1a   :  { %s3259_s24 = scalar_lea.vmem %s35_s16, 9728  ;;  %p3264_p12 = scmp.lt.s32.totalorder %s35_s16, %s35_s16 }
  0x1b   :  { %p3260_p11 = scmp.ne.s32.totalorder %s35_s16, %s3259_s24  ;;  %p3265_p13 = scmp.lt.s32.totalorder %s3259_s24, %s3259_s24 }
  0x1d   :  { %p3266_p0 = por %p3265_p13, %p3264_p12 }
  0x1f   :  { %p3267_p1 = pnand %p3266_p0, %p3260_p11 }
  0x21   :  { %3270 = shalt.err (!%p3267_p1)
}
  0x22   :  { %s3329_s1 = smov 256   ;;  %s3330_s25 = smov 16  }
  0x23   :  { %40 = dma.hbm_to_vmem [thread:$0]  %s4044_s2, 9728, %s35_s16, [#allocation10], %s3329_s1, %s3329_s1, %s3330_s25  }
  0x24   :  { %3315 = dma.done.wait [#allocation7], 2688  }
  0x25   :  { %3316 = vsyncadd [#allocation7], 4294964608 }
  0x26   :  { %3317 = dma.done.wait [#allocation10], 9728  }
  0x27   :  { %3318 = vsyncadd [#allocation10], 4294957568  ;;  %s56_s28 = sld [smem:[#allocation0]]   ;;  %s3331_s29 = smov 512   ;;  %v3332_v0 = vmov 0   ;;  %v3333_v1 = vmov 0.0   ;;  %v99_v55 = vlaneseq }
  0x28   :  { %68 = sst [smem:[#allocation13]] %s3331_s29  ;;  %2912 = vset.pattern.permute.xlu0 %v3332_v0  ;;  %217 = vmatprep.mubr.f32.mxu1 %v3333_v1  ;;  %s3334_s30 = smov 4   ;;  %vm143_vm0 = vcmask 1041408   ;;  %vm136_vm1 = vcmask 408576   ;;  %vm786_vm4 = vcmask 1045504   ;;  %vm782_vm5 = vcmask 359424  }
  0x29   :  { %70 = sst [smem:[#allocation13 + $0x1]] %s3331_s29  ;;  %s3335_s8 = smov 64   ;;  %v3429_v56 = vand.u32 127, %v99_v55 }
  0x2a   :  { %72 = sst [smem:[#allocation13 + $0x2]] %s3334_s30  ;;  %s3336_s2 = smov 128  }
  0x2b   :  { %74 = sst [smem:[#allocation13 + $0x3]] %s3335_s8  ;;  %s3337_s9 = smov 2  }
  0x2c   :  { %76 = sst [smem:[#allocation13 + $0x4]] %s3336_s2  ;;  %s3338_s10 = smov [#allocation3]  }
  0x2d   :  { %78 = sst [smem:[#allocation13 + $0x5]] %s3337_s9  ;;  %s64_s11 = sshll.u32 %s3338_s10, 4  ;;  %s65_s11 = int_to_ptr.vmem [resolvable:$true] %s64_s11 }
  0x2e   :  { %s2671_s12 = sshll.u32 %s56_s28, 26  ;;  %80 = sst [smem:[#allocation13 + $0x6]] %s3329_s1 }
  0x2f   :  { %s2672_s13 = sadd.s32 134217728, %s2671_s12  ;;  %82 = sst [smem:[#allocation13 + $0x7]] %s3335_s8 }
  0x30   :  { %84 = sst [smem:[#allocation13 + $0x8]] %s3334_s30  ;;  %s3339_s14 = smov [#allocation5]  }
  0x31   :  { %s3340_s15 = smov [#allocation12]   ;;  %s3271_s24 = scalar_lea.hbm %s4047_s5, 1024 }
  0x32   :  { %86 = dma.general %s4046_s4, 4096, %s65_s11, %s3339_s14, %s3340_s15, [#allocation13], %s2672_s13, 0  }
  0x33   :  { %v101_v2 = vld [vmem:[%s4042_s0] sm:$0xff]  ;;  %v102_v3 = vld [vmem:[%s4042_s0 + $0x8] sm:$0xff]  ;;  %v116_v4 = vld [vmem:[#allocation6 + $0x8] sm:$0xff]  ;;  %s3341_s0 = smov [#allocation4]   ;;  %p3272_p2 = scmp.ne.s32.totalorder %s4047_s5, %s3271_s24 }
  0x34   :  { %104 = vperm.xlu0 %2912, %v101_v2   ;;  %v119_v5 = vld [vmem:[#allocation6 + $0x20] sm:$0xff]  ;;  %v118_v7 = vld [vmem:[#allocation6 + $0x18] sm:$0xff]  ;;  %v125_v11 = vld [vmem:[#allocation6 + $0x50] sm:$0xff]  ;;  %s95_s4 = sshll.u32 %s3341_s0, 4  ;;  %p3275_p3 = scmp.lt.u32.totalorder %s3271_s24, %s4047_s5  ;;  %s96_s4 = int_to_ptr.vmem [resolvable:$true] %s95_s4 }
  0x35   :  { %v115_v6 = vld [vmem:[#allocation6] sm:$0xff]  ;;  %v2852_v8 = vpack.c.bf16 %v119_v5, %v116_v4  ;;  %v122_v10 = vld [vmem:[#allocation6 + $0x38] sm:$0xff]  ;;  %v121_v12 = vld [vmem:[#allocation6 + $0x30] sm:$0xff] }
  0x36   :  { %v2854_v9 = vpack.c.bf16 %v118_v7, %v115_v6  ;;  %v2856_v13 = vpack.c.bf16 %v125_v11, %v122_v10  ;;  %v124_v14 = vld [vmem:[#allocation6 + $0x48] sm:$0xff]  ;;  %v131_v16 = vld [vmem:[#allocation6 + $0x80] sm:$0xff]  ;;  %v130_v20 = vld [vmem:[#allocation6 + $0x78] sm:$0xff]  ;;  %p3277_p4 = pnand %p3275_p3, %p3272_p2 }
  0x37   :  { %v128_v15 = vld [vmem:[#allocation6 + $0x68] sm:$0xff]  ;;  %2853 = vmatprep.subr.bf16.mxu1 %v2852_v8  ;;  %v2858_v17 = vpack.c.bf16 %v124_v14, %v121_v12  ;;  %v127_v19 = vld [vmem:[#allocation6 + $0x60] sm:$0xff]  ;;  %v134_v22 = vld [vmem:[#allocation6 + $0x98] sm:$0x3] }
  0x38   :  { %107 = vperm.xlu0 %2912, %v102_v3   ;;  %2855 = vmatpush1.bf16.msra.mxu1 %v2854_v9  ;;  %v2860_v18 = vpack.c.bf16 %v131_v16, %v128_v15  ;;  %v2862_v21 = vpack.c.bf16 %v130_v20, %v127_v19  ;;  %v117_v23 = vld [vmem:[#allocation6 + $0x10] sm:$0xff]  ;;  %v120_v24 = vld [vmem:[#allocation6 + $0x28] sm:$0xff]  ;;  %v123_v57 = vld [vmem:[#allocation6 + $0x40] sm:$0xff] }
  0x39   :  { %2857 = vmatprep.subr.bf16.mxu1 %v2856_v13  ;;  %v133_v25 = vld [vmem:[#allocation6 + $0x90] sm:$0x3]  ;;  %v3424_v26 = vpack.c.bf16 %v120_v24, %v117_v23  ;;  %v2913_v27 = vld [vmem:[#allocation9 + $0x4] ss:$16 sps:$4 sm:$0xff]   ;;  %v2918_v28 = vld [vmem:[#allocation9] ss:$16 sps:$4 sm:$0xff]  }
  0x3a   :  { %v2919_v29 = vld [vmem:[#allocation9 + $0x24] ss:$16 sps:$4 sm:$0xff]   ;;  %799 = vmatprep.subr.bf16.mxu0 %v2913_v27  ;;  %v2924_v30 = vld [vmem:[#allocation9 + $0x20] ss:$16 sps:$4 sm:$0xff]   ;;  %v129_v62 = vld [vmem:[#allocation6 + $0x70] sm:$0xff] }
  0x3b   :  { %800 = vmatpush1.bf16.msra.mxu0 %v2918_v28  ;;  %v2925_v31 = vld [vmem:[#allocation9 + $0x44] ss:$16 sps:$4 sm:$0xff]   ;;  %v2930_v32 = vld [vmem:[#allocation9 + $0x40] ss:$16 sps:$4 sm:$0xff]   ;;  %v135_v5 = vld [vmem:[#allocation6 + $0xa0] sm:$0x3] }
  0x3c   :  { %2859 = vmatpush1.bf16.msra.mxu1 %v2858_v17  ;;  %801 = vmatprep.subr.bf16.mxu0 %v2919_v29  ;;  %v2931_v33 = vld [vmem:[#allocation9 + $0x64] ss:$16 sps:$4 sm:$0xff]   ;;  %v2936_v34 = vld [vmem:[#allocation9 + $0x60] ss:$16 sps:$4 sm:$0xff]   ;;  %v2917_v6 = vld [vmem:[#allocation9 + $0xc] ss:$16 sps:$4 sm:$0xff]  }
  0x3d   :  { %2861 = vmatprep.subr.bf16.mxu1 %v2860_v18  ;;  %v2937_v35 = vld [vmem:[#allocation9 + $0x84] ss:$16 sps:$4 sm:$0xff]   ;;  %v2942_v36 = vld [vmem:[#allocation9 + $0x80] ss:$16 sps:$4 sm:$0xff]   ;;  %v2915_v7 = vld [vmem:[#allocation9 + $0x8] ss:$16 sps:$4 sm:$0xff]  }
  0x3e   :  { %v2943_v37 = vld [vmem:[#allocation9 + $0xa4] ss:$16 sps:$4 sm:$0xff]   ;;  %v2948_v38 = vld [vmem:[#allocation9 + $0xa0] ss:$16 sps:$4 sm:$0xff]   ;;  %v2923_v8 = vld [vmem:[#allocation9 + $0x2c] ss:$16 sps:$4 sm:$0xff]  }
  0x3f   :  { %802 = vmatpush1.bf16.msra.mxu0 %v2924_v30  ;;  %v2949_v39 = vld [vmem:[#allocation9 + $0xc4] ss:$16 sps:$4 sm:$0xff]   ;;  %v2954_v40 = vld [vmem:[#allocation9 + $0xc0] ss:$16 sps:$4 sm:$0xff]   ;;  %v2921_v9 = vld [vmem:[#allocation9 + $0x28] ss:$16 sps:$4 sm:$0xff]  }
  0x40   :  { %2863 = vmatpush1.bf16.msra.mxu1 %v2862_v21  ;;  %803 = vmatprep.subr.bf16.mxu0 %v2925_v31  ;;  %v2955_v41 = vld [vmem:[#allocation9 + $0xe4] ss:$16 sps:$4 sm:$0xff]   ;;  %v2960_v42 = vld [vmem:[#allocation9 + $0xe0] ss:$16 sps:$4 sm:$0xff]   ;;  %v2929_v10 = vld [vmem:[#allocation9 + $0x4c] ss:$16 sps:$4 sm:$0xff]  }
  0x41   :  { %2675 = vmatprep.subr.msk.mxu1 %vm143_vm0, %v134_v22  ;;  %v2961_v43 = vld [vmem:[#allocation9 + $0x104] ss:$16 sps:$4 sm:$0xff]   ;;  %v2966_v44 = vld [vmem:[#allocation9 + $0x100] ss:$16 sps:$4 sm:$0xff]   ;;  %v2927_v11 = vld [vmem:[#allocation9 + $0x48] ss:$16 sps:$4 sm:$0xff]  }
  0x42   :  { %v2967_v45 = vld [vmem:[#allocation9 + $0x124] ss:$16 sps:$4 sm:$0xff]   ;;  %v2972_v46 = vld [vmem:[#allocation9 + $0x120] ss:$16 sps:$4 sm:$0xff]   ;;  %v2935_v12 = vld [vmem:[#allocation9 + $0x6c] ss:$16 sps:$4 sm:$0xff]  }
  0x43   :  { %804 = vmatpush1.bf16.msra.mxu0 %v2930_v32  ;;  %v2973_v47 = vld [vmem:[#allocation9 + $0x144] ss:$16 sps:$4 sm:$0xff]   ;;  %v2978_v48 = vld [vmem:[#allocation9 + $0x140] ss:$16 sps:$4 sm:$0xff]   ;;  %v2933_v13 = vld [vmem:[#allocation9 + $0x68] ss:$16 sps:$4 sm:$0xff]  }
  0x44   :  { %2676 = vmatpush1.msk.msra.mxu1 %vm143_vm0, %v133_v25  ;;  %805 = vmatprep.subr.bf16.mxu0 %v2931_v33  ;;  %v2979_v49 = vld [vmem:[#allocation9 + $0x164] ss:$16 sps:$4 sm:$0xff]   ;;  %v2984_v50 = vld [vmem:[#allocation9 + $0x160] ss:$16 sps:$4 sm:$0xff]   ;;  %v2941_v14 = vld [vmem:[#allocation9 + $0x8c] ss:$16 sps:$4 sm:$0xff]  }
  0x45   :  { %2865 = vmatprep.subr.bf16.mxu1 %v3424_v26  ;;  %v2985_v51 = vld [vmem:[#allocation9 + $0x184] ss:$16 sps:$4 sm:$0xff]   ;;  %v2990_v52 = vld [vmem:[#allocation9 + $0x180] ss:$16 sps:$4 sm:$0xff]   ;;  %v2939_v15 = vld [vmem:[#allocation9 + $0x88] ss:$16 sps:$4 sm:$0xff]  }
  0x46   :  { %v2991_v53 = vld [vmem:[#allocation9 + $0x1a4] ss:$16 sps:$4 sm:$0xff]   ;;  %v2996_v54 = vld [vmem:[#allocation9 + $0x1a0] ss:$16 sps:$4 sm:$0xff]   ;;  %v2947_v16 = vld [vmem:[#allocation9 + $0xac] ss:$16 sps:$4 sm:$0xff]  }
  0x47   :  { %806 = vmatpush1.bf16.msra.mxu0 %v2936_v34  ;;  %v126_v58 = vld [vmem:[#allocation6 + $0x58] sm:$0xff]  ;;  %v132_v63 = vld [vmem:[#allocation6 + $0x88] sm:$0xff]  ;;  %v2945_v17 = vld [vmem:[#allocation9 + $0xa8] ss:$16 sps:$4 sm:$0xff]  }
  0x48   :  { %807 = vmatprep.subr.bf16.mxu0 %v2937_v35  ;;  %v2868_v60 = vpack.c.bf16 %v126_v58, %v123_v57  ;;  %v2872_v3 = vpack.c.bf16 %v132_v63, %v129_v62  ;;  %v2953_v18 = vld [vmem:[#allocation9 + $0xcc] ss:$16 sps:$4 sm:$0xff]   ;;  %v2951_v19 = vld [vmem:[#allocation9 + $0xc8] ss:$16 sps:$4 sm:$0xff]   ;;  %v2997_v34 = vld [vmem:[#allocation9 + $0x1c4] ss:$16 sps:$4 sm:$0xff]  }
  0x49   :  { %v2959_v20 = vld [vmem:[#allocation9 + $0xec] ss:$16 sps:$4 sm:$0xff]   ;;  %v2957_v21 = vld [vmem:[#allocation9 + $0xe8] ss:$16 sps:$4 sm:$0xff]  }
  0x4a   :  { %v2965_v22 = vld [vmem:[#allocation9 + $0x10c] ss:$16 sps:$4 sm:$0xff]   ;;  %v2963_v23 = vld [vmem:[#allocation9 + $0x108] ss:$16 sps:$4 sm:$0xff]  }
  0x4b   :  { %808 = vmatpush1.bf16.msra.mxu0 %v2942_v36  ;;  %v2971_v24 = vld [vmem:[#allocation9 + $0x12c] ss:$16 sps:$4 sm:$0xff]   ;;  %v2969_v25 = vld [vmem:[#allocation9 + $0x128] ss:$16 sps:$4 sm:$0xff]  }
  0x4c   :  { %809 = vmatprep.subr.bf16.mxu0 %v2943_v37  ;;  %v2975_v27 = vld [vmem:[#allocation9 + $0x148] ss:$16 sps:$4 sm:$0xff]   ;;  %v2983_v28 = vld [vmem:[#allocation9 + $0x16c] ss:$16 sps:$4 sm:$0xff]   ;;  %v3002_v37 = vld [vmem:[#allocation9 + $0x1c0] ss:$16 sps:$4 sm:$0xff]  }
  0x4d   :  { %v2981_v29 = vld [vmem:[#allocation9 + $0x168] ss:$16 sps:$4 sm:$0xff]   ;;  %v2989_v30 = vld [vmem:[#allocation9 + $0x18c] ss:$16 sps:$4 sm:$0xff]  }
  0x4e   :  { %v2987_v31 = vld [vmem:[#allocation9 + $0x188] ss:$16 sps:$4 sm:$0xff]   ;;  %v2995_v32 = vld [vmem:[#allocation9 + $0x1ac] ss:$16 sps:$4 sm:$0xff]  }
  0x4f   :  { %810 = vmatpush1.bf16.msra.mxu0 %v2948_v38  ;;  %v2993_v33 = vld [vmem:[#allocation9 + $0x1a8] ss:$16 sps:$4 sm:$0xff]   ;;  %v3001_v36 = vld [vmem:[#allocation9 + $0x1cc] ss:$16 sps:$4 sm:$0xff]   ;;  %v3003_v38 = vld [vmem:[#allocation9 + $0x1e4] ss:$16 sps:$4 sm:$0xff]  }
  0x50   :  { %811 = vmatprep.subr.bf16.mxu0 %v2949_v39  ;;  %v2999_v35 = vld [vmem:[#allocation9 + $0x1c8] ss:$16 sps:$4 sm:$0xff]   ;;  %v3007_v39 = vld [vmem:[#allocation9 + $0x1ec] ss:$16 sps:$4 sm:$0xff]  }
  0x51   :  { %v3018_v57 = vld [vmem:[#allocation9 + $0x228] ss:$16 sps:$4 sm:$0xff]   ;;  %v3021_v58 = vld [vmem:[#allocation9 + $0x244] ss:$16 sps:$4 sm:$0x3f]  }
  0x53   :  { %812 = vmatpush1.bf16.msra.mxu0 %v2954_v40  ;;  %v3005_v40 = vld [vmem:[#allocation9 + $0x1e8] ss:$16 sps:$4 sm:$0xff]  }
  0x54   :  { %813 = vmatprep.subr.bf16.mxu0 %v2955_v41  ;;  %v3008_v41 = vld [vmem:[#allocation9 + $0x1e0] ss:$16 sps:$4 sm:$0xff]  }
  0x57   :  { %814 = vmatpush1.bf16.msra.mxu0 %v2960_v42  ;;  %v3011_v42 = vld [vmem:[#allocation9 + $0x204] ss:$16 sps:$4 sm:$0xff]  }
  0x58   :  { %815 = vmatprep.subr.bf16.mxu0 %v2961_v43  ;;  %v3014_v43 = vld [vmem:[#allocation9 + $0x20c] ss:$16 sps:$4 sm:$0xff]  }
  0x5b   :  { %816 = vmatpush1.bf16.msra.mxu0 %v2966_v44 }
  0x5c   :  { %817 = vmatprep.subr.bf16.mxu0 %v2967_v45 }
  0x5f   :  { %818 = vmatpush1.bf16.msra.mxu0 %v2972_v46 }
  0x60   :  { %819 = vmatprep.subr.bf16.mxu0 %v2973_v47 }
  0x63   :  { %820 = vmatpush1.bf16.msra.mxu0 %v2978_v48 }
  0x64   :  { %821 = vmatprep.subr.bf16.mxu0 %v2979_v49 }
  0x67   :  { %822 = vmatpush1.bf16.msra.mxu0 %v2984_v50  ;;  %v3009_v50 = vld [vmem:[#allocation9 + $0x200] ss:$16 sps:$4 sm:$0xff]  }
  0x68   :  { %823 = vmatprep.subr.bf16.mxu0 %v2985_v51  ;;  %v3012_v51 = vld [vmem:[#allocation9 + $0x208] ss:$16 sps:$4 sm:$0xff]  }
  0x6b   :  { %824 = vmatpush1.bf16.msra.mxu0 %v2990_v52  ;;  %v3017_v52 = vld [vmem:[#allocation9 + $0x224] ss:$16 sps:$4 sm:$0xff]  }
  0x6c   :  { %825 = vmatprep.subr.bf16.mxu0 %v2991_v53  ;;  %v3020_v53 = vld [vmem:[#allocation9 + $0x22c] ss:$16 sps:$4 sm:$0xff]  }
  0x6f   :  { %826 = vmatpush1.bf16.msra.mxu0 %v2996_v54  ;;  %v3015_v54 = vld [vmem:[#allocation9 + $0x220] ss:$16 sps:$4 sm:$0xff]  }
  0x70   :  { %827 = vmatprep.subr.bf16.mxu0 %v2997_v34 }
  0x73   :  { %828 = vmatpush1.bf16.msra.mxu0 %v3002_v37 }
  0x74   :  { %829 = vmatprep.subr.bf16.mxu0 %v3003_v38 }
  0x77   :  { %830 = vmatpush1.bf16.msra.mxu0 %v3008_v41 }
  0x78   :  { %842 = vmatprep.subr.bf16.mxu0 %v3011_v42 }
  0xb3   :  { %v105_v59 = vpop.permute.xlu0 %104 }
  0xb4   :  { %vm109_vm2 = vcmp.eq.s32.totalorder %v3429_v56, %v105_v59  ;;  %v3023_v59 = vld [vmem:[#allocation9 + $0x24c] ss:$16 sps:$4 sm:$0x3f]  }
  0xb5   :  { %v2673_v61 = vsel %vm109_vm2, 1.0, %v3333_v1 }
  0xb6   :  { %2677 = vmatmul.mubr.msk.f32.vlgmr.msra.gmra.mrb[0].mxu1 %vm136_vm1, %v2673_v61 }
  0xb7   :  { %2867 = vmatpush3.bf16.msra.mxu1 %v3424_v26  ;;  %v108_v2 = vpop.permute.xlu0 %107  ;;  %223 = vmatprep.mubr.f32.mxu1 %v3333_v1  ;;  %v2977_v26 = vld [vmem:[#allocation9 + $0x14c] ss:$16 sps:$4 sm:$0xff]  }
  0xb8   :  { %vm110_vm3 = vcmp.eq.s32.totalorder %v3429_v56, %v108_v2  ;;  %2869 = vmatprep.subr.bf16.mxu1 %v2868_v60 }
  0xb9   :  { %v2674_v4 = vsel %vm110_vm3, 1.0, %v3333_v1 }
  0xba   :  { %2678 = vmatmul.mubr.msk.f32.gmra.mrb[2].mxu1 %vm136_vm1, %v2674_v4 }
  0xbb   :  { %2871 = vmatpush3.bf16.msra.mxu1 %v2868_v60  ;;  %2829 = vmatprep.mubr.msk.f32.mxu1 %vm136_vm1, %v2673_v61  ;;  %v3025_v60 = vld [vmem:[#allocation9 + $0x240] ss:$16 sps:$4 sm:$0x3f]   ;;  %v3026_v61 = vld [vmem:[#allocation9 + $0x248] ss:$16 sps:$4 sm:$0x3f]  }
  0xbc   :  { %2873 = vmatprep.subr.bf16.mxu1 %v2872_v3  ;;  %v788_v2 = vsel %vm786_vm4, %v3025_v60, 0 }
  0xbf   :  { %2875 = vmatpush3.bf16.msra.mxu1 %v2872_v3  ;;  %v794_v3 = vsel %vm786_vm4, %v3026_v61, 0 }
  0xc0   :  { %2827 = vmatprep.subr.msk.mxu1 %vm143_vm0, %v135_v5 }
  0xc3   :  { %2828 = vmatpush3.msk.msra.mxu1 %vm143_vm0, %v135_v5 }
  0xc4   :  { %2830 = vmatmul.mubr.msk.f32.vlgmr.msra.gmra.mrb[4].mxu1 %vm136_vm1, %v2674_v4  ;;  %885 = vmatprep.subr.bf16.mxu1 %v2917_v6 }
  0xc5   :  { %886 = vmatpush1.bf16.msra.mxu1 %v2915_v7 }
  0xc6   :  { %887 = vmatprep.subr.bf16.mxu1 %v2923_v8 }
  0xc9   :  { %888 = vmatpush1.bf16.msra.mxu1 %v2921_v9 }
  0xca   :  { %889 = vmatprep.subr.bf16.mxu1 %v2929_v10 }
  0xcd   :  { %890 = vmatpush1.bf16.msra.mxu1 %v2927_v11 }
  0xce   :  { %891 = vmatprep.subr.bf16.mxu1 %v2935_v12 }
  0xd1   :  { %892 = vmatpush1.bf16.msra.mxu1 %v2933_v13 }
  0xd2   :  { %893 = vmatprep.subr.bf16.mxu1 %v2941_v14 }
  0xd5   :  { %894 = vmatpush1.bf16.msra.mxu1 %v2939_v15 }
  0xd6   :  { %895 = vmatprep.subr.bf16.mxu1 %v2947_v16 }
  0xd9   :  { %896 = vmatpush1.bf16.msra.mxu1 %v2945_v17 }
  0xda   :  { %897 = vmatprep.subr.bf16.mxu1 %v2953_v18 }
  0xdd   :  { %898 = vmatpush1.bf16.msra.mxu1 %v2951_v19 }
  0xde   :  { %899 = vmatprep.subr.bf16.mxu1 %v2959_v20 }
  0xe1   :  { %900 = vmatpush1.bf16.msra.mxu1 %v2957_v21 }
  0xe2   :  { %901 = vmatprep.subr.bf16.mxu1 %v2965_v22 }
  0xe5   :  { %902 = vmatpush1.bf16.msra.mxu1 %v2963_v23 }
  0xe6   :  { %903 = vmatprep.subr.bf16.mxu1 %v2971_v24 }
  0xe9   :  { %904 = vmatpush1.bf16.msra.mxu1 %v2969_v25 }
  0xea   :  { %905 = vmatprep.subr.bf16.mxu1 %v2977_v26 }
  0xed   :  { %906 = vmatpush1.bf16.msra.mxu1 %v2975_v27 }
  0xee   :  { %907 = vmatprep.subr.bf16.mxu1 %v2983_v28 }
  0xf1   :  { %908 = vmatpush1.bf16.msra.mxu1 %v2981_v29 }
  0xf2   :  { %909 = vmatprep.subr.bf16.mxu1 %v2989_v30 }
  0xf5   :  { %910 = vmatpush1.bf16.msra.mxu1 %v2987_v31 }
  0xf6   :  { %911 = vmatprep.subr.bf16.mxu1 %v2995_v32 }
  0xf9   :  { %912 = vmatpush1.bf16.msra.mxu1 %v2993_v33 }
  0xfa   :  { %913 = vmatprep.subr.bf16.mxu1 %v3001_v36 }
  0xfd   :  { %914 = vmatpush1.bf16.msra.mxu1 %v2999_v35 }
  0xfe   :  { %915 = vmatprep.subr.bf16.mxu1 %v3007_v39 }
 0x101   :  { %916 = vmatpush1.bf16.msra.mxu1 %v3005_v40 }
 0x102   :  { %928 = vmatprep.subr.bf16.mxu1 %v3014_v43 }
 0x189   :  { %v219_v44 = vpop.f32.mrb[0].mxu1 }
 0x18a   :  { %v221_v45 = vpop.f32.mrb[1].mxu1 }
 0x18d   :  { %v225_v46 = vpop.f32.mrb[2].mxu1 }
 0x18e   :  { %v305_v47 = vpack.c.bf16 %v225_v46, %v219_v44  ;;  %v227_v48 = vpop.f32.mrb[3].mxu1 }
 0x18f   :  { %v306_v49 = vpack.c.bf16 %v227_v48, %v221_v45 }
 0x191   :  { %831 = vmatprep.mubr.bf16.mxu0 %v306_v49  ;;  %917 = vmatprep.mubr.bf16.mxu1 %v306_v49 }
 0x192   :  { %832 = vmatmul.mubr.bf16.vlgmr.msra.gmra.mrb[0].mxu0 %v305_v47  ;;  %918 = vmatmul.mubr.bf16.vlgmr.msra.gmra.mrb[8].mxu1 %v305_v47 }
 0x193   :  { %843 = vmatpush1.bf16.msra.mxu0 %v3009_v50  ;;  %929 = vmatpush1.bf16.msra.mxu1 %v3012_v51 }
 0x194   :  { %844 = vmatprep.subr.bf16.mxu0 %v3017_v52  ;;  %930 = vmatprep.subr.bf16.mxu1 %v3020_v53 }
 0x195   :  { %874 = vmatprep.mubr.bf16.mxu0 %v3332_v0  ;;  %960 = vmatprep.mubr.bf16.mxu1 %v3332_v0 }
 0x197   :  { %v2831_v62 = vpop.f32.mrb[4].mxu1  ;;  %845 = vmatpush1.bf16.msra.mxu0 %v3015_v54  ;;  %931 = vmatpush1.bf16.msra.mxu1 %v3018_v57 }
 0x198   :  { %v296_v63 = vpop.f32.mrb[5].mxu1  ;;  %2758 = vmatprep.subr.msk.bf16.mxu0 %vm786_vm4, %v3021_v58  ;;  %2760 = vmatprep.subr.msk.bf16.mxu1 %vm786_vm4, %v3023_v59 }
 0x199   :  { %v307_v4 = vpack.c.bf16 %v2831_v62, %v296_v63 }
 0x19b   :  { %847 = vmatpush1.bf16.msra.mxu0 %v788_v2  ;;  %933 = vmatpush1.bf16.msra.mxu1 %v794_v3 }
 0x19e   :  { %2759 = vmatmul.mubr.msk.bf16.vlgmr.msra.gmra.mrb[0].mxu0 %vm782_vm5, %v307_v4  ;;  %2761 = vmatmul.mubr.msk.bf16.vlgmr.msra.gmra.mrb[8].mxu1 %vm782_vm5, %v307_v4 }
 0x19f   :  { %3280 = shalt.err (!%p3277_p4)  }
 0x1a0   :  { %s3281_s28 = scalar_lea.vmem %s96_s4, 1024  ;;  %p3286_p6 = scmp.lt.s32.totalorder %s96_s4, %s96_s4 }
 0x1a1   :  { %p3282_p5 = scmp.ne.s32.totalorder %s96_s4, %s3281_s28  ;;  %p3287_p7 = scmp.lt.s32.totalorder %s3281_s28, %s3281_s28 }
 0x1a3   :  { %p3288_p8 = por %p3287_p7, %p3286_p6 }
 0x1a5   :  { %p3289_p9 = pnand %p3288_p8, %p3282_p5 }
 0x1a7   :  { %3292 = shalt.err (!%p3289_p9)  }
 0x1a8   :  { %98 = dma.hbm_to_vmem [thread:$0]  %s4047_s5, 1024, %s96_s4, [#allocation5 + $0x1]  ;;  %v387_v5 = vshrl.u32 %v99_v55, 7  ;;  %v384_v8 = vld [vmem:[%s4045_s3] sm:$0xf] }
 0x1aa   :  { %v388_v6 = vsub.s32 0, %v387_v5  ;;  %v396_v7 = vsub.s32 2, %v387_v5  ;;  %v392_v9 = vsub.s32 1, %v387_v5  ;;  %v400_v10 = vsub.s32 3, %v387_v5 }
 0x1ac   :  { %v389_v11 = vrot.slane %v384_v8, %v388_v6  ;;  %v397_v12 = vrot.slane %v384_v8, %v396_v7  ;;  %v393_v13 = vrot.slane %v384_v8, %v392_v9  ;;  %v401_v14 = vrot.slane %v384_v8, %v400_v10 }
 0x271   :  { %v876_v15 = vpop.f32.mrb[0].mxu0  ;;  %v962_v16 = vpop.f32.mrb[8].mxu1 }
 0x272   :  { %v3461_v17 = vadd.f32 %v876_v15, %v389_v11  ;;  %v3463_v18 = vadd.f32 %v962_v16, %v397_v12  ;;  %v878_v19 = vpop.f32.mrb[1].mxu0  ;;  %v964_v55 = vpop.f32.mrb[9].mxu1 }
 0x273   :  { %v3465_v20 = vadd.f32 %v878_v19, %v393_v13  ;;  %v3467_v21 = vadd.f32 %v964_v55, %v401_v14  ;;  %v880_v22 = vpop.f32.mrb[2].mxu0  ;;  %v966_v23 = vpop.f32.mrb[10].mxu1 }
 0x274   :  { %v3469_v24 = vadd.f32 %v880_v22, %v389_v11  ;;  %v3471_v25 = vadd.f32 %v966_v23, %v397_v12  ;;  %v882_v26 = vpop.f32.mrb[3].mxu0  ;;  %v968_v27 = vpop.f32.mrb[11].mxu1 }
 0x275   :  { %v3473_v28 = vadd.f32 %v882_v26, %v393_v13  ;;  %v3475_v29 = vadd.f32 %v968_v27, %v401_v14 }
 0x276   :  { %3319 = dma.done.wait [#allocation5], 4096 }
 0x277   :  { %3320 = vsyncadd [#allocation5], 4294963200  ;;  %1039 = vmatprep.mubr.bf16.mxu0 %v3332_v0  ;;  %1080 = vmatprep.mubr.bf16.mxu1 %v3332_v0  ;;  %v3479_v30 = vld [vmem:[#allocation3 + $0x8] sm:$0xff]  ;;  %v3481_v31 = vld [vmem:[#allocation3] sm:$0xff]  ;;  %vm1149_vm6 = vcmask 1048070   ;;  %vm1147_vm7 = vcmask 517120  }
 0x278   :  { %v3483_v32 = vld [vmem:[#allocation3 + $0x18] sm:$0xff]  ;;  %1007 = vmatprep.subr.bf16.mxu0 %v3479_v30  ;;  %v3487_v33 = vld [vmem:[#allocation3 + $0x10] sm:$0xff]  ;;  %v3489_v34 = vld [vmem:[#allocation3 + $0x28] sm:$0xff]  ;;  %vm1154_vm8 = vcmask 523264   ;;  %vm1352_vm9 = vcmask 1046020   ;;  %vm1350_vm10 = vcmask 519170  }
 0x279   :  { %1048 = vmatprep.subr.bf16.mxu1 %v3483_v32  ;;  %1008 = vmatpush1.bf16.msra.mxu0 %v3481_v31  ;;  %v3493_v35 = vld [vmem:[#allocation3 + $0x38] sm:$0xff]  ;;  %v3496_v36 = vld [vmem:[#allocation3 + $0x20] sm:$0xff]  ;;  %v3499_v37 = vld [vmem:[#allocation3 + $0x30] sm:$0xff]  ;;  %vm1555_vm11 = vcmask 1043970   ;;  %vm1553_vm12 = vcmask 521220   ;;  %vm1754_vm13 = vcmask 1041920  }
 0x27a   :  { %1049 = vmatpush1.bf16.msra.mxu1 %v3487_v33  ;;  %1009 = vmatprep.subr.bf16.mxu0 %v3489_v34  ;;  %v3501_v38 = vld [vmem:[#allocation3 + $0x48] sm:$0xff]  ;;  %v3503_v39 = vld [vmem:[#allocation3 + $0x58] sm:$0xff]  ;;  %v3508_v40 = vld [vmem:[#allocation3 + $0x40] sm:$0xff]  ;;  %vm1752_vm14 = vcmask 523270  }
 0x27b   :  { %1050 = vmatprep.subr.bf16.mxu1 %v3493_v35  ;;  %v3511_v41 = vld [vmem:[#allocation3 + $0x50] sm:$0xff]  ;;  %v3513_v42 = vld [vmem:[#allocation3 + $0x68] sm:$0xff]  ;;  %v3515_v43 = vld [vmem:[#allocation3 + $0x78] sm:$0xff] }
 0x27c   :  { %v3520_v44 = vld [vmem:[#allocation3 + $0x60] sm:$0xff]  ;;  %v3523_v45 = vld [vmem:[#allocation3 + $0x70] sm:$0xff]  ;;  %v3525_v46 = vld [vmem:[#allocation3 + $0x88] sm:$0xff] }
 0x27d   :  { %1010 = vmatpush1.bf16.msra.mxu0 %v3496_v36  ;;  %v3527_v47 = vld [vmem:[#allocation3 + $0x98] sm:$0xff]  ;;  %v3532_v48 = vld [vmem:[#allocation3 + $0x80] sm:$0xff]  ;;  %v3535_v49 = vld [vmem:[#allocation3 + $0x90] sm:$0xff] }
 0x27e   :  { %1051 = vmatpush1.bf16.msra.mxu1 %v3499_v37  ;;  %1011 = vmatprep.subr.bf16.mxu0 %v3501_v38  ;;  %v3537_v50 = vld [vmem:[#allocation3 + $0xa8] sm:$0xff]  ;;  %v3539_v51 = vld [vmem:[#allocation3 + $0xb8] sm:$0xff]  ;;  %v3544_v52 = vld [vmem:[#allocation3 + $0xa0] sm:$0xff] }
 0x27f   :  { %1052 = vmatprep.subr.bf16.mxu1 %v3503_v39  ;;  %v3547_v53 = vld [vmem:[#allocation3 + $0xb0] sm:$0xff]  ;;  %v3549_v54 = vld [vmem:[#allocation3 + $0xc8] sm:$0xff]  ;;  %v3551_v57 = vld [vmem:[#allocation3 + $0xd8] sm:$0xff] }
 0x280   :  { %v3556_v58 = vld [vmem:[#allocation3 + $0xc0] sm:$0xff]  ;;  %v3559_v59 = vld [vmem:[#allocation3 + $0xd0] sm:$0xff]  ;;  %v3561_v60 = vld [vmem:[#allocation3 + $0xe8] sm:$0xff] }
 0x281   :  { %1012 = vmatpush1.bf16.msra.mxu0 %v3508_v40  ;;  %v3563_v61 = vld [vmem:[#allocation3 + $0xf8] sm:$0xff]  ;;  %v3568_v62 = vld [vmem:[#allocation3 + $0xe0] sm:$0xff]  ;;  %v3571_v63 = vld [vmem:[#allocation3 + $0xf0] sm:$0xff] }
 0x282   :  { %1053 = vmatpush1.bf16.msra.mxu1 %v3511_v41  ;;  %1013 = vmatprep.subr.bf16.mxu0 %v3513_v42 }
 0x283   :  { %1054 = vmatprep.subr.bf16.mxu1 %v3515_v43 }
 0x285   :  { %1014 = vmatpush1.bf16.msra.mxu0 %v3520_v44 }
 0x286   :  { %1055 = vmatpush1.bf16.msra.mxu1 %v3523_v45  ;;  %1015 = vmatprep.subr.bf16.mxu0 %v3525_v46 }
 0x287   :  { %1056 = vmatprep.subr.bf16.mxu1 %v3527_v47 }
 0x289   :  { %1016 = vmatpush1.bf16.msra.mxu0 %v3532_v48 }
 0x28a   :  { %1057 = vmatpush1.bf16.msra.mxu1 %v3535_v49  ;;  %1017 = vmatprep.subr.bf16.mxu0 %v3537_v50 }
 0x28b   :  { %1058 = vmatprep.subr.bf16.mxu1 %v3539_v51 }
 0x28d   :  { %1018 = vmatpush1.bf16.msra.mxu0 %v3544_v52 }
 0x28e   :  { %1059 = vmatpush1.bf16.msra.mxu1 %v3547_v53  ;;  %1019 = vmatprep.subr.bf16.mxu0 %v3549_v54 }
 0x28f   :  { %1060 = vmatprep.subr.bf16.mxu1 %v3551_v57 }
 0x291   :  { %1020 = vmatpush1.bf16.msra.mxu0 %v3556_v58 }
 0x292   :  { %1061 = vmatpush1.bf16.msra.mxu1 %v3559_v59  ;;  %1021 = vmatprep.subr.bf16.mxu0 %v3561_v60 }
 0x293   :  { %1062 = vmatprep.subr.bf16.mxu1 %v3563_v61 }
 0x295   :  { %1022 = vmatpush1.bf16.msra.mxu0 %v3568_v62 }
 0x296   :  { %1063 = vmatpush1.bf16.msra.mxu1 %v3571_v63  ;;  %1197 = vmatprep.subr.bf16.mxu0 %v3479_v30 }
 0x297   :  { %1238 = vmatprep.subr.bf16.mxu1 %v3483_v32 }
 0x298   :  { %1040 = vmatmul.mubr.bf16.vlgmr.msra.gmra.mrb[4].mxu0 %v3332_v0 }
 0x299   :  { %1081 = vmatmul.mubr.bf16.vlgmr.msra.gmra.mrb[12].mxu1 %v3332_v0  ;;  %1198 = vmatpush1.bf16.msra.mxu0 %v3481_v31 }
 0x29a   :  { %1239 = vmatpush1.bf16.msra.mxu1 %v3487_v33  ;;  %1199 = vmatprep.subr.bf16.mxu0 %v3489_v34 }
 0x29b   :  { %1240 = vmatprep.subr.bf16.mxu1 %v3493_v35  ;;  %1229 = vmatprep.mubr.bf16.mxu0 %v3332_v0 }
 0x29c   :  { %1270 = vmatprep.mubr.bf16.mxu1 %v3332_v0 }
 0x29d   :  { %1200 = vmatpush1.bf16.msra.mxu0 %v3496_v36 }
 0x29e   :  { %1241 = vmatpush1.bf16.msra.mxu1 %v3499_v37  ;;  %1201 = vmatprep.subr.bf16.mxu0 %v3501_v38 }
 0x29f   :  { %1242 = vmatprep.subr.bf16.mxu1 %v3503_v39 }
 0x2a1   :  { %1202 = vmatpush1.bf16.msra.mxu0 %v3508_v40 }
 0x2a2   :  { %1243 = vmatpush1.bf16.msra.mxu1 %v3511_v41  ;;  %1203 = vmatprep.subr.bf16.mxu0 %v3513_v42 }
 0x2a3   :  { %1244 = vmatprep.subr.bf16.mxu1 %v3515_v43 }
 0x2a5   :  { %1204 = vmatpush1.bf16.msra.mxu0 %v3520_v44 }
 0x2a6   :  { %1245 = vmatpush1.bf16.msra.mxu1 %v3523_v45  ;;  %1205 = vmatprep.subr.bf16.mxu0 %v3525_v46 }
 0x2a7   :  { %1246 = vmatprep.subr.bf16.mxu1 %v3527_v47 }
 0x2a9   :  { %1206 = vmatpush1.bf16.msra.mxu0 %v3532_v48 }
 0x2aa   :  { %1247 = vmatpush1.bf16.msra.mxu1 %v3535_v49  ;;  %1207 = vmatprep.subr.bf16.mxu0 %v3537_v50 }
 0x2ab   :  { %1248 = vmatprep.subr.bf16.mxu1 %v3539_v51 }
 0x2ad   :  { %1208 = vmatpush1.bf16.msra.mxu0 %v3544_v52 }
 0x2ae   :  { %1249 = vmatpush1.bf16.msra.mxu1 %v3547_v53  ;;  %1209 = vmatprep.subr.bf16.mxu0 %v3549_v54 }
 0x2af   :  { %1250 = vmatprep.subr.bf16.mxu1 %v3551_v57 }
 0x2b1   :  { %1210 = vmatpush1.bf16.msra.mxu0 %v3556_v58 }
 0x2b2   :  { %1251 = vmatpush1.bf16.msra.mxu1 %v3559_v59  ;;  %1211 = vmatprep.subr.bf16.mxu0 %v3561_v60 }
 0x2b3   :  { %1252 = vmatprep.subr.bf16.mxu1 %v3563_v61 }
 0x2b5   :  { %1212 = vmatpush1.bf16.msra.mxu0 %v3568_v62 }
 0x2b6   :  { %1253 = vmatpush1.bf16.msra.mxu1 %v3571_v63  ;;  %1402 = vmatprep.subr.bf16.mxu0 %v3479_v30 }
 0x2b7   :  { %1443 = vmatprep.subr.bf16.mxu1 %v3483_v32 }
 0x36b   :  { %v1041_v2 = vpop.f32.mrb[4].mxu0 }
 0x36c   :  { %v1082_v3 = vpop.f32.mrb[12].mxu1  ;;  %v1089_v4 = vadd.f32 %v3461_v17, %v1041_v2  ;;  %v1043_v5 = vpop.f32.mrb[5].mxu0 }
 0x36d   :  { %v1093_v6 = vrot.slane %v1082_v3, 2  ;;  %v1084_v7 = vpop.f32.mrb[13].mxu1  ;;  %v1045_v8 = vpop.f32.mrb[6].mxu0  ;;  %v1090_v16 = vadd.f32 %v3465_v20, %v1043_v5 }
 0x36e   :  { %v1086_v9 = vpop.f32.mrb[14].mxu1  ;;  %v2762_v10 = vmul.f32 -1.442695, %v1089_v4  ;;  %v1046_v12 = vpop.f32.mrb[7].mxu0  ;;  %v1094_v15 = vrot.slane %v1084_v7, 2 }
 0x36f   :  { %v1097_v11 = vadd.f32 %v3471_v25, %v1093_v6  ;;  %v1087_v13 = vpop.f32.mrb[15].mxu1  ;;  %v2763_v5 = vmul.f32 -1.442695, %v1090_v16 }
 0x370   :  { %3027 = vpow2.f32 %v2762_v10  ;;  %v1098_v19 = vadd.f32 %v3475_v29, %v1094_v15 }
 0x371   :  { %v2764_v14 = vmul.f32 -1.442695, %v1097_v11 }
 0x372   :  { %v2765_v8 = vmul.f32 -1.442695, %v1098_v19 }
 0x373   :  { %3029 = vpow2.f32 %v2764_v14 }
 0x374   :  { %3031 = vtanh.f32 %v1090_v16 }
 0x375   :  { %3033 = vtanh.f32 %v1098_v19 }
 0x37a   :  { %v3028_v55 = vpop.eup %3027 }
 0x37b   :  { %v1102_v22 = vadd.f32 1.0, %v3028_v55 }
 0x37d   :  { %v3030_v23 = vpop.eup %3029  ;;  %3035 = vrcp.f32 %v1102_v22 }
 0x37e   :  { %v1124_v26 = vadd.f32 1.0, %v3030_v23  ;;  %v3032_v27 = vpop.eup %3031 }
 0x37f   :  { %v3034_v2 = vpop.eup %3033 }
 0x380   :  { %3037 = vrcp.f32 %v1124_v26 }
 0x381   :  { %3039 = vpow2.f32 %v2763_v5 }
 0x382   :  { %3041 = vpow2.f32 %v2765_v8 }
 0x387   :  { %v3036_v3 = vpop.eup %3035 }
 0x388   :  { %v1113_v4 = vmul.f32 %v3036_v3, %v3032_v27  ;;  %v1112_v12 = vmul.f32 0.0, %v3036_v3 }
 0x38a   :  { %v3038_v6 = vpop.eup %3037  ;;  %1115 = vrot.lane.b32.xlu0 %v1113_v4, %s3335_s8 }
 0x38b   :  { %v1135_v7 = vmul.f32 %v3038_v6, %v3034_v2  ;;  %v3040_v9 = vpop.eup %3039  ;;  %v1134_v55 = vmul.f32 0.0, %v3038_v6 }
 0x38c   :  { %v1109_v10 = vadd.f32 1.0, %v3040_v9  ;;  %v3042_v11 = vpop.eup %3041 }
 0x38d   :  { %v1131_v15 = vadd.f32 1.0, %v3042_v11 }
 0x38e   :  { %1137 = vrot.lane.b32.xlu0 %v1135_v7, %s3335_s8  ;;  %3043 = vrcp.f32 %v1109_v10 }
 0x398   :  { %v3044_v26 = vpop.eup %3043 }
 0x3fc   :  { %v1116_v13 = vpop.permute.xlu0 %1115 }
 0x3fd   :  { %v1118_v14 = vadd.f32 %v1116_v13, %v1112_v12 }
 0x3ff   :  { %3045 = vtanh.f32 %v1118_v14 }
 0x400   :  { %v1138_v22 = vpop.permute.xlu0 %1137  ;;  %3047 = vrcp.f32 %v1131_v15 }
 0x401   :  { %v1140_v23 = vadd.f32 %v1138_v22, %v1134_v55 }
 0x403   :  { %3049 = vtanh.f32 %v1140_v23  ;;  %v1161_v8 = vrot.slane %v1140_v23, 6 }
 0x409   :  { %v3046_v27 = vpop.eup %3045 }
 0x40a   :  { %v1120_v16 = vmul.f32 %v3046_v27, %v3044_v26  ;;  %v3048_v2 = vpop.eup %3047 }
 0x40c   :  { %1144 = vrot.lane.b32.xlu1 %v1120_v16, %s3335_s8 }
 0x40d   :  { %v3050_v19 = vpop.eup %3049 }
 0x40e   :  { %v1142_v4 = vmul.f32 %v3050_v19, %v3048_v2 }
 0x410   :  { %1157 = vrot.lane.b32.xlu1 %v1118_v14, %s3335_s8  ;;  %1150 = vst.msk [vmem:[#allocation2 + $0x8] sm:$0xc0] %vm1149_vm6, %v1142_v4  ;;  %v1152_v3 = vrot.slane %v1142_v4, 6 }
 0x47e   :  { %v1145_v6 = vpop.permute.xlu1 %1144 }
 0x47f   :  { %1148 = vst.msk [vmem:[#allocation2] sm:$0x3] %vm1147_vm7, %v1145_v6  ;;  %v1155_v7 = vsel %vm1154_vm8, %v1145_v6, %v1152_v3 }
 0x480   :  { %v1164_v5 = vpack.c.bf16 %v1155_v7, %v1155_v7 }
 0x482   :  { %v1158_v9 = vpop.permute.xlu1 %1157  ;;  %1230 = vmatmul.mubr.bf16.vlgmr.msra.gmra.mrb[8].mxu0 %v1164_v5  ;;  %1271 = vmatmul.mubr.bf16.vlgmr.msra.gmra.mrb[16].mxu1 %v1164_v5 }
 0x483   :  { %v3625_v10 = vsel %vm1154_vm8, %v1158_v9, %v1161_v8  ;;  %1403 = vmatpush1.bf16.msra.mxu0 %v3481_v31  ;;  %1444 = vmatpush1.bf16.msra.mxu1 %v3487_v33 }
 0x484   :  { %v1309_v11 = vrot.slane %v3625_v10, 6  ;;  %1404 = vmatprep.subr.bf16.mxu0 %v3489_v34  ;;  %1445 = vmatprep.subr.bf16.mxu1 %v3493_v35 }
 0x485   :  { %1434 = vmatprep.mubr.bf16.mxu0 %v3332_v0  ;;  %1475 = vmatprep.mubr.bf16.mxu1 %v3332_v0 }
 0x486   :  { %1310 = vrot.lane.b32.xlu0 %v1309_v11, %s3335_s8 }
 0x487   :  { %1405 = vmatpush1.bf16.msra.mxu0 %v3496_v36  ;;  %1446 = vmatpush1.bf16.msra.mxu1 %v3499_v37 }
 0x488   :  { %1406 = vmatprep.subr.bf16.mxu0 %v3501_v38  ;;  %1447 = vmatprep.subr.bf16.mxu1 %v3503_v39 }
 0x48b   :  { %1407 = vmatpush1.bf16.msra.mxu0 %v3508_v40  ;;  %1448 = vmatpush1.bf16.msra.mxu1 %v3511_v41 }
 0x48c   :  { %1408 = vmatprep.subr.bf16.mxu0 %v3513_v42  ;;  %1449 = vmatprep.subr.bf16.mxu1 %v3515_v43 }
 0x48f   :  { %1409 = vmatpush1.bf16.msra.mxu0 %v3520_v44  ;;  %1450 = vmatpush1.bf16.msra.mxu1 %v3523_v45 }
 0x490   :  { %1410 = vmatprep.subr.bf16.mxu0 %v3525_v46  ;;  %1451 = vmatprep.subr.bf16.mxu1 %v3527_v47 }
 0x493   :  { %1411 = vmatpush1.bf16.msra.mxu0 %v3532_v48  ;;  %1452 = vmatpush1.bf16.msra.mxu1 %v3535_v49 }
 0x494   :  { %1412 = vmatprep.subr.bf16.mxu0 %v3537_v50  ;;  %1453 = vmatprep.subr.bf16.mxu1 %v3539_v51 }
 0x497   :  { %1413 = vmatpush1.bf16.msra.mxu0 %v3544_v52  ;;  %1454 = vmatpush1.bf16.msra.mxu1 %v3547_v53 }
 0x498   :  { %1414 = vmatprep.subr.bf16.mxu0 %v3549_v54  ;;  %1455 = vmatprep.subr.bf16.mxu1 %v3551_v57 }
 0x49b   :  { %1415 = vmatpush1.bf16.msra.mxu0 %v3556_v58  ;;  %1456 = vmatpush1.bf16.msra.mxu1 %v3559_v59 }
 0x49c   :  { %1416 = vmatprep.subr.bf16.mxu0 %v3561_v60  ;;  %1457 = vmatprep.subr.bf16.mxu1 %v3563_v61 }
 0x49f   :  { %1417 = vmatpush1.bf16.msra.mxu0 %v3568_v62  ;;  %1458 = vmatpush1.bf16.msra.mxu1 %v3571_v63 }
 0x4a0   :  { %1605 = vmatprep.subr.bf16.mxu0 %v3479_v30  ;;  %1646 = vmatprep.subr.bf16.mxu1 %v3483_v32 }
 0x555   :  { %v1231_v12 = vpop.f32.mrb[8].mxu0  ;;  %v1272_v13 = vpop.f32.mrb[16].mxu1 }
 0x556   :  { %v1281_v14 = vrot.slane %v1231_v12, 6  ;;  %v1289_v15 = vrot.slane %v1272_v13, 4  ;;  %v1233_v55 = vpop.f32.mrb[9].mxu0  ;;  %v1274_v22 = vpop.f32.mrb[17].mxu1 }
 0x557   :  { %v1235_v23 = vpop.f32.mrb[10].mxu0  ;;  %v1276_v26 = vpop.f32.mrb[18].mxu1  ;;  %v1282_v6 = vrot.slane %v1233_v55, 6  ;;  %v1290_v7 = vrot.slane %v1274_v22, 4 }
 0x558   :  { %v1285_v27 = vadd.f32 %v3461_v17, %v1281_v14  ;;  %v1293_v16 = vadd.f32 %v3471_v25, %v1289_v15  ;;  %v1236_v2 = vpop.f32.mrb[11].mxu0  ;;  %v1277_v19 = vpop.f32.mrb[19].mxu1  ;;  %v1335_v26 = vrot.slane %v3625_v10, 4 }
 0x559   :  { %v1286_v5 = vadd.f32 %v3465_v20, %v1282_v6  ;;  %v1294_v8 = vadd.f32 %v3475_v29, %v1290_v7  ;;  %v1311_v6 = vpop.permute.xlu0 %1310 }
 0x55a   :  { %v2766_v4 = vmul.f32 -1.442695, %v1285_v27  ;;  %v2768_v3 = vmul.f32 -1.442695, %v1293_v16 }
 0x55b   :  { %v2767_v2 = vmul.f32 -1.442695, %v1286_v5  ;;  %v2769_v19 = vmul.f32 -1.442695, %v1294_v8 }
 0x55c   :  { %3051 = vpow2.f32 %v2766_v4 }
 0x55d   :  { %3053 = vpow2.f32 %v2768_v3 }
 0x55e   :  { %3055 = vtanh.f32 %v1286_v5 }
 0x55f   :  { %3057 = vtanh.f32 %v1294_v8 }
 0x566   :  { %v3052_v9 = vpop.eup %3051 }
 0x567   :  { %v3054_v11 = vpop.eup %3053  ;;  %v1298_v12 = vadd.f32 1.0, %v3052_v9 }
 0x568   :  { %v1325_v13 = vadd.f32 1.0, %v3054_v11  ;;  %v3056_v14 = vpop.eup %3055 }
 0x569   :  { %3059 = vrcp.f32 %v1298_v12  ;;  %v3058_v15 = vpop.eup %3057 }
 0x56a   :  { %3061 = vrcp.f32 %v1325_v13 }
 0x56b   :  { %3063 = vpow2.f32 %v2767_v2 }
 0x56c   :  { %3065 = vpow2.f32 %v2769_v19 }
 0x573   :  { %v3060_v23 = vpop.eup %3059 }
 0x574   :  { %v3062_v27 = vpop.eup %3061  ;;  %v1314_v55 = vmul.f32 %v3060_v23, %v3056_v14  ;;  %v1313_v11 = vmul.f32 %v3060_v23, %v1311_v6 }
 0x575   :  { %v1338_v22 = vmul.f32 %v3062_v27, %v3058_v15  ;;  %v1337_v16 = vmul.f32 %v3062_v27, %v1335_v26  ;;  %v3064_v4 = vpop.eup %3063 }
 0x576   :  { %1316 = vrot.lane.b32.xlu1 %v1314_v55, %s3335_s8  ;;  %v3066_v3 = vpop.eup %3065  ;;  %v1305_v7 = vadd.f32 1.0, %v3064_v4 }
 0x577   :  { %1340 = vrot.lane.b32.xlu0 %v1338_v22, %s3335_s8  ;;  %v1332_v9 = vadd.f32 1.0, %v3066_v3 }
 0x578   :  { %3067 = vrcp.f32 %v1305_v7 }
 0x579   :  { %3069 = vrcp.f32 %v1332_v9 }
 0x582   :  { %v3068_v5 = vpop.eup %3067 }
 0x583   :  { %v3070_v8 = vpop.eup %3069 }
 0x5e8   :  { %v1317_v12 = vpop.permute.xlu1 %1316 }
 0x5e9   :  { %v1341_v10 = vpop.permute.xlu0 %1340  ;;  %v1319_v13 = vadd.f32 %v1317_v12, %v1313_v11 }
 0x5ea   :  { %v1343_v14 = vadd.f32 %v1341_v10, %v1337_v16 }
 0x5eb   :  { %3071 = vtanh.f32 %v1319_v13  ;;  %1359 = vrot.lane.b32.xlu0 %v1319_v13, %s3335_s8 }
 0x5ec   :  { %3073 = vtanh.f32 %v1343_v14  ;;  %v1363_v23 = vrot.slane %v1343_v14, 2 }
 0x5f5   :  { %v3072_v15 = vpop.eup %3071 }
 0x5f6   :  { %v3074_v26 = vpop.eup %3073  ;;  %v1321_v27 = vmul.f32 %v3072_v15, %v3068_v5 }
 0x5f7   :  { %v1345_v55 = vmul.f32 %v3074_v26, %v3070_v8 }
 0x5f8   :  { %1347 = vrot.lane.b32.xlu1 %v1321_v27, %s3335_s8 }
 0x5f9   :  { %1353 = vst.msk [vmem:[#allocation2 + $0x8] sm:$0x30] %vm1352_vm9, %v1345_v55  ;;  %v1355_v19 = vrot.slane %v1345_v55, 2 }
 0x65d   :  { %v1360_v22 = vpop.permute.xlu0 %1359 }
 0x65e   :  { %v3674_v2 = vsel %vm1154_vm8, %v1360_v22, %v1363_v23 }
 0x65f   :  { %v1514_v16 = vrot.slane %v3674_v2, 6 }
 0x661   :  { %1515 = vrot.lane.b32.xlu1 %v1514_v16, %s3335_s8 }
 0x66a   :  { %v1348_v4 = vpop.permute.xlu1 %1347 }
 0x66b   :  { %1351 = vst.msk [vmem:[#allocation2] sm:$0xc] %vm1350_vm10, %v1348_v4  ;;  %v1357_v3 = vsel %vm1154_vm8, %v1348_v4, %v1355_v19 }
 0x66c   :  { %v1366_v6 = vpack.c.bf16 %v1357_v3, %v1357_v3 }
 0x66e   :  { %v1400_v7 = vrot.slane %v1366_v6, 1 }
 0x670   :  { %1435 = vmatmul.mubr.bf16.vlgmr.msra.gmra.mrb[12].mxu0 %v1400_v7  ;;  %1476 = vmatmul.mubr.bf16.vlgmr.msra.gmra.mrb[20].mxu1 %v1400_v7 }
 0x671   :  { %1606 = vmatpush1.bf16.msra.mxu0 %v3481_v31  ;;  %1647 = vmatpush1.bf16.msra.mxu1 %v3487_v33 }
 0x672   :  { %1607 = vmatprep.subr.bf16.mxu0 %v3489_v34  ;;  %1648 = vmatprep.subr.bf16.mxu1 %v3493_v35 }
 0x673   :  { %1637 = vmatprep.mubr.bf16.mxu0 %v3332_v0  ;;  %1678 = vmatprep.mubr.bf16.mxu1 %v3332_v0 }
 0x675   :  { %1608 = vmatpush1.bf16.msra.mxu0 %v3496_v36  ;;  %1649 = vmatpush1.bf16.msra.mxu1 %v3499_v37 }
 0x676   :  { %1609 = vmatprep.subr.bf16.mxu0 %v3501_v38  ;;  %1650 = vmatprep.subr.bf16.mxu1 %v3503_v39 }
 0x679   :  { %1610 = vmatpush1.bf16.msra.mxu0 %v3508_v40  ;;  %1651 = vmatpush1.bf16.msra.mxu1 %v3511_v41 }
 0x67a   :  { %1611 = vmatprep.subr.bf16.mxu0 %v3513_v42  ;;  %1652 = vmatprep.subr.bf16.mxu1 %v3515_v43 }
 0x67d   :  { %1612 = vmatpush1.bf16.msra.mxu0 %v3520_v44  ;;  %1653 = vmatpush1.bf16.msra.mxu1 %v3523_v45 }
 0x67e   :  { %1613 = vmatprep.subr.bf16.mxu0 %v3525_v46  ;;  %1654 = vmatprep.subr.bf16.mxu1 %v3527_v47 }
 0x681   :  { %1614 = vmatpush1.bf16.msra.mxu0 %v3532_v48  ;;  %1655 = vmatpush1.bf16.msra.mxu1 %v3535_v49 }
 0x682   :  { %1615 = vmatprep.subr.bf16.mxu0 %v3537_v50  ;;  %1656 = vmatprep.subr.bf16.mxu1 %v3539_v51 }
 0x685   :  { %1616 = vmatpush1.bf16.msra.mxu0 %v3544_v52  ;;  %1657 = vmatpush1.bf16.msra.mxu1 %v3547_v53 }
 0x686   :  { %1617 = vmatprep.subr.bf16.mxu0 %v3549_v54  ;;  %1658 = vmatprep.subr.bf16.mxu1 %v3551_v57 }
 0x689   :  { %1618 = vmatpush1.bf16.msra.mxu0 %v3556_v58  ;;  %1659 = vmatpush1.bf16.msra.mxu1 %v3559_v59 }
 0x68a   :  { %1619 = vmatprep.subr.bf16.mxu0 %v3561_v60  ;;  %1660 = vmatprep.subr.bf16.mxu1 %v3563_v61 }
 0x68d   :  { %1620 = vmatpush1.bf16.msra.mxu0 %v3568_v62  ;;  %1661 = vmatpush1.bf16.msra.mxu1 %v3571_v63 }
 0x68e   :  { %1804 = vmatprep.subr.bf16.mxu0 %v3479_v30  ;;  %1845 = vmatprep.subr.bf16.mxu1 %v3483_v32 }
 0x6d3   :  { %v1516_v7 = vpop.permute.xlu1 %1515 }
 0x743   :  { %v1436_v48 = vpop.f32.mrb[12].mxu0  ;;  %v1477_v50 = vpop.f32.mrb[20].mxu1 }
 0x744   :  { %v1486_v52 = vrot.slane %v1436_v48, 4  ;;  %v1494_v53 = vrot.slane %v1477_v50, 6  ;;  %v1438_v54 = vpop.f32.mrb[13].mxu0  ;;  %v1479_v58 = vpop.f32.mrb[21].mxu1 }
 0x745   :  { %v1440_v9 = vpop.f32.mrb[14].mxu0  ;;  %v1481_v59 = vpop.f32.mrb[22].mxu1  ;;  %v1487_v30 = vrot.slane %v1438_v54, 4  ;;  %v1495_v32 = vrot.slane %v1479_v58, 6 }
 0x746   :  { %v1490_v60 = vadd.f32 %v3461_v17, %v1486_v52  ;;  %v1498_v61 = vadd.f32 %v3471_v25, %v1494_v53  ;;  %v1441_v11 = vpop.f32.mrb[15].mxu0  ;;  %v1482_v62 = vpop.f32.mrb[23].mxu1 }
 0x747   :  { %v1491_v10 = vadd.f32 %v3465_v20, %v1487_v30  ;;  %v1499_v13 = vadd.f32 %v3475_v29, %v1495_v32 }
 0x748   :  { %v2770_v12 = vmul.f32 -1.442695, %v1490_v60  ;;  %v2772_v63 = vmul.f32 -1.442695, %v1498_v61 }
 0x749   :  { %v2771_v19 = vmul.f32 -1.442695, %v1491_v10  ;;  %v2773_v4 = vmul.f32 -1.442695, %v1499_v13 }
 0x74a   :  { %3075 = vpow2.f32 %v2770_v12 }
 0x74b   :  { %3077 = vpow2.f32 %v2772_v63 }
 0x74c   :  { %3079 = vtanh.f32 %v1491_v10 }
 0x74d   :  { %3081 = vtanh.f32 %v1499_v13 }
 0x754   :  { %v3076_v14 = vpop.eup %3075 }
 0x755   :  { %v3078_v5 = vpop.eup %3077  ;;  %v1503_v8 = vadd.f32 1.0, %v3076_v14 }
 0x756   :  { %v1530_v15 = vadd.f32 1.0, %v3078_v5  ;;  %v3080_v26 = vpop.eup %3079 }
 0x757   :  { %3083 = vrcp.f32 %v1503_v8  ;;  %v3082_v27 = vpop.eup %3081 }
 0x758   :  { %3085 = vrcp.f32 %v1530_v15 }
 0x759   :  { %3087 = vpow2.f32 %v2771_v19 }
 0x75a   :  { %3089 = vpow2.f32 %v2773_v4 }
 0x761   :  { %v3084_v55 = vpop.eup %3083 }
 0x762   :  { %v3086_v23 = vpop.eup %3085  ;;  %v1519_v22 = vmul.f32 %v3084_v55, %v3080_v26  ;;  %v1518_v52 = vmul.f32 %v3084_v55, %v1516_v7  ;;  %v3761_v7 = vld [vmem:[#allocation3 + $0xa8] sm:$0xff] }
 0x763   :  { %v1541_v16 = vmul.f32 %v3086_v23, %v3082_v27  ;;  %v3088_v3 = vpop.eup %3087  ;;  %v1540_v53 = vmul.f32 %v3086_v23, %v3674_v2 }
 0x764   :  { %1521 = vrot.lane.b32.xlu0 %v1519_v22, %s3335_s8  ;;  %v3090_v6 = vpop.eup %3089  ;;  %v1510_v48 = vadd.f32 1.0, %v3088_v3  ;;  %v3758_v3 = vld [vmem:[#allocation3 + $0x80] sm:$0xff] }
 0x765   :  { %1543 = vrot.lane.b32.xlu1 %v1541_v16, %s3335_s8  ;;  %v1537_v50 = vadd.f32 1.0, %v3090_v6 }
 0x766   :  { %3091 = vrcp.f32 %v1510_v48  ;;  %v3763_v48 = vld [vmem:[#allocation3 + $0xa0] sm:$0xff] }
 0x767   :  { %3093 = vrcp.f32 %v1537_v50  ;;  %v3765_v50 = vld [vmem:[#allocation3 + $0xb0] sm:$0xff] }
 0x770   :  { %v3092_v60 = vpop.eup %3091 }
 0x771   :  { %v3094_v61 = vpop.eup %3093 }
 0x7d6   :  { %v1522_v54 = vpop.permute.xlu0 %1521 }
 0x7d7   :  { %v1544_v58 = vpop.permute.xlu1 %1543  ;;  %v1524_v9 = vadd.f32 %v1522_v54, %v1518_v52 }
 0x7d8   :  { %v1546_v59 = vadd.f32 %v1544_v58, %v1540_v53  ;;  %v3769_v53 = vld [vmem:[#allocation3 + $0xc8] sm:$0xff]  ;;  %v3773_v58 = vld [vmem:[#allocation3 + $0xd0] sm:$0xff] }
 0x7d9   :  { %3095 = vtanh.f32 %v1524_v9  ;;  %1562 = vrot.lane.b32.xlu1 %v1524_v9, %s3335_s8 }
 0x7da   :  { %3097 = vtanh.f32 %v1546_v59  ;;  %v1566_v2 = vrot.slane %v1546_v59, 6  ;;  %v3776_v59 = vld [vmem:[#allocation3 + $0xc0] sm:$0xff] }
 0x7e3   :  { %v3096_v11 = vpop.eup %3095 }
 0x7e4   :  { %v3098_v62 = vpop.eup %3097  ;;  %v1526_v12 = vmul.f32 %v3096_v11, %v3092_v60 }
 0x7e5   :  { %v1548_v63 = vmul.f32 %v3098_v62, %v3094_v61 }
 0x7e6   :  { %1550 = vrot.lane.b32.xlu0 %v1526_v12, %s3335_s8 }
 0x7e7   :  { %1556 = vst.msk [vmem:[#allocation2 + $0x8] sm:$0xc] %vm1555_vm11, %v1548_v63  ;;  %v1558_v13 = vrot.slane %v1548_v63, 6 }
 0x84b   :  { %v1563_v30 = vpop.permute.xlu1 %1562 }
 0x84c   :  { %v3725_v32 = vsel %vm1154_vm8, %v1563_v30, %v1566_v2  ;;  %v3783_v2 = vld [vmem:[#allocation3 + $0xf8] sm:$0xff]  ;;  %v3785_v30 = vld [vmem:[#allocation3 + $0xe0] sm:$0xff] }
 0x84d   :  { %v1711_v10 = vrot.slane %v3725_v32, 6  ;;  %v1737_v27 = vrot.slane %v3725_v32, 4  ;;  %v3789_v32 = vld [vmem:[#allocation3 + $0xf0] sm:$0xff] }
 0x84f   :  { %1712 = vrot.lane.b32.xlu0 %v1711_v10, %s3335_s8 }
 0x858   :  { %v1551_v14 = vpop.permute.xlu0 %1550 }
 0x859   :  { %1554 = vst.msk [vmem:[#allocation2] sm:$0x30] %vm1553_vm12, %v1551_v14  ;;  %v1560_v5 = vsel %vm1154_vm8, %v1551_v14, %v1558_v13 }
 0x85a   :  { %v1569_v8 = vpack.c.bf16 %v1560_v5, %v1560_v5 }
 0x85c   :  { %v1603_v15 = vrot.slane %v1569_v8, 2 }
 0x85e   :  { %1638 = vmatmul.mubr.bf16.vlgmr.msra.gmra.mrb[16].mxu0 %v1603_v15  ;;  %1679 = vmatmul.mubr.bf16.vlgmr.msra.gmra.mrb[24].mxu1 %v1603_v15 }
 0x85f   :  { %1805 = vmatpush1.bf16.msra.mxu0 %v3481_v31  ;;  %1846 = vmatpush1.bf16.msra.mxu1 %v3487_v33 }
 0x860   :  { %1806 = vmatprep.subr.bf16.mxu0 %v3489_v34  ;;  %1847 = vmatprep.subr.bf16.mxu1 %v3493_v35 }
 0x861   :  { %1836 = vmatprep.mubr.bf16.mxu0 %v3332_v0  ;;  %1877 = vmatprep.mubr.bf16.mxu1 %v3332_v0 }
 0x863   :  { %1807 = vmatpush1.bf16.msra.mxu0 %v3496_v36  ;;  %1848 = vmatpush1.bf16.msra.mxu1 %v3499_v37 }
 0x864   :  { %1808 = vmatprep.subr.bf16.mxu0 %v3501_v38  ;;  %1849 = vmatprep.subr.bf16.mxu1 %v3503_v39 }
 0x867   :  { %1809 = vmatpush1.bf16.msra.mxu0 %v3508_v40  ;;  %1850 = vmatpush1.bf16.msra.mxu1 %v3511_v41 }
 0x868   :  { %1810 = vmatprep.subr.bf16.mxu0 %v3513_v42  ;;  %1851 = vmatprep.subr.bf16.mxu1 %v3515_v43 }
 0x86b   :  { %1811 = vmatpush1.bf16.msra.mxu0 %v3520_v44  ;;  %1852 = vmatpush1.bf16.msra.mxu1 %v3523_v45 }
 0x86c   :  { %1812 = vmatprep.subr.bf16.mxu0 %v3525_v46  ;;  %1853 = vmatprep.subr.bf16.mxu1 %v3527_v47 }
 0x86f   :  { %1854 = vmatpush1.bf16.msra.mxu1 %v3535_v49  ;;  %1813 = vmatpush1.bf16.msra.mxu0 %v3758_v3 }
 0x870   :  { %1855 = vmatprep.subr.bf16.mxu1 %v3539_v51  ;;  %1814 = vmatprep.subr.bf16.mxu0 %v3761_v7 }
 0x873   :  { %1856 = vmatpush1.bf16.msra.mxu1 %v3765_v50  ;;  %1815 = vmatpush1.bf16.msra.mxu0 %v3763_v48 }
 0x874   :  { %1857 = vmatprep.subr.bf16.mxu1 %v3551_v57  ;;  %1816 = vmatprep.subr.bf16.mxu0 %v3769_v53  ;;  %v3781_v57 = vld [vmem:[#allocation3 + $0xe8] sm:$0xff] }
 0x877   :  { %1858 = vmatpush1.bf16.msra.mxu1 %v3773_v58  ;;  %1817 = vmatpush1.bf16.msra.mxu0 %v3776_v59 }
 0x878   :  { %1818 = vmatprep.subr.bf16.mxu0 %v3781_v57  ;;  %1859 = vmatprep.subr.bf16.mxu1 %v3783_v2 }
 0x87b   :  { %1819 = vmatpush1.bf16.msra.mxu0 %v3785_v30  ;;  %1860 = vmatpush1.bf16.msra.mxu1 %v3789_v32 }
 0x8c1   :  { %v1713_v52 = vpop.permute.xlu0 %1712 }
 0x931   :  { %v1639_v31 = vpop.f32.mrb[16].mxu0  ;;  %v1680_v33 = vpop.f32.mrb[24].mxu1 }
 0x932   :  { %v1689_v34 = vrot.slane %v1639_v31, 2  ;;  %v1695_v35 = vadd.f32 %v3471_v25, %v1680_v33  ;;  %v1641_v36 = vpop.f32.mrb[17].mxu0  ;;  %v1682_v37 = vpop.f32.mrb[25].mxu1 }
 0x933   :  { %v1643_v38 = vpop.f32.mrb[18].mxu0  ;;  %v1684_v39 = vpop.f32.mrb[26].mxu1  ;;  %v1690_v45 = vrot.slane %v1641_v36, 2  ;;  %v1696_v46 = vadd.f32 %v3475_v29, %v1682_v37 }
 0x934   :  { %v1693_v40 = vadd.f32 %v3461_v17, %v1689_v34  ;;  %v2776_v41 = vmul.f32 -1.442695, %v1695_v35  ;;  %v1644_v42 = vpop.f32.mrb[19].mxu0  ;;  %v1685_v43 = vpop.f32.mrb[27].mxu1 }
 0x935   :  { %v1694_v49 = vadd.f32 %v3465_v20, %v1690_v45  ;;  %v2777_v20 = vmul.f32 -1.442695, %v1696_v46 }
 0x936   :  { %v2774_v44 = vmul.f32 -1.442695, %v1693_v40  ;;  %3099 = vpow2.f32 %v2776_v41 }
 0x937   :  { %v2775_v4 = vmul.f32 -1.442695, %v1694_v49 }
 0x938   :  { %3101 = vpow2.f32 %v2774_v44 }
 0x939   :  { %3103 = vtanh.f32 %v1696_v46 }
 0x940   :  { %v3100_v47 = vpop.eup %3099 }
 0x941   :  { %v1727_v51 = vadd.f32 1.0, %v3100_v47 }
 0x942   :  { %v3102_v25 = vpop.eup %3101 }
 0x943   :  { %v1700_v26 = vadd.f32 1.0, %v3102_v25  ;;  %3105 = vrcp.f32 %v1727_v51  ;;  %v3104_v17 = vpop.eup %3103 }
 0x944   :  { %3107 = vtanh.f32 %v1694_v49 }
 0x945   :  { %3109 = vrcp.f32 %v1700_v26 }
 0x946   :  { %3111 = vpow2.f32 %v2777_v20 }
 0x947   :  { %3113 = vpow2.f32 %v2775_v4 }
 0x94d   :  { %v3106_v55 = vpop.eup %3105 }
 0x94e   :  { %v3108_v23 = vpop.eup %3107  ;;  %v1740_v22 = vmul.f32 %v3106_v55, %v3104_v17  ;;  %v1739_v16 = vmul.f32 %v3106_v55, %v1737_v27 }
 0x94f   :  { %v3110_v19 = vpop.eup %3109 }
 0x950   :  { %1742 = vrot.lane.b32.xlu0 %v1740_v22, %s3335_s8  ;;  %v1716_v29 = vmul.f32 %v3110_v19, %v3108_v23  ;;  %v3112_v6 = vpop.eup %3111  ;;  %v1715_v62 = vmul.f32 %v3110_v19, %v1713_v52 }
 0x951   :  { %v3114_v54 = vpop.eup %3113  ;;  %v1734_v9 = vadd.f32 1.0, %v3112_v6 }
 0x952   :  { %1718 = vrot.lane.b32.xlu1 %v1716_v29, %s3335_s8  ;;  %v1707_v60 = vadd.f32 1.0, %v3114_v54 }
 0x953   :  { %3115 = vrcp.f32 %v1734_v9 }
 0x95d   :  { %v3116_v10 = vpop.eup %3115 }
 0x9c2   :  { %v1743_v61 = vpop.permute.xlu0 %1742 }
 0x9c3   :  { %v1745_v11 = vadd.f32 %v1743_v61, %v1739_v16  ;;  %v3813_v61 = vld [vmem:[#allocation3 + $0x8] sm:$0xff] }
 0x9c4   :  { %v1719_v12 = vpop.permute.xlu1 %1718  ;;  %1996 = vmatprep.subr.bf16.mxu0 %v3813_v61 }
 0x9c5   :  { %3117 = vtanh.f32 %v1745_v11  ;;  %v1721_v63 = vadd.f32 %v1719_v12, %v1715_v62  ;;  %v1765_v31 = vrot.slane %v1745_v11, 2  ;;  %v3815_v11 = vld [vmem:[#allocation3 + $0x18] sm:$0xff]  ;;  %v3817_v62 = vld [vmem:[#allocation3] sm:$0xff]  ;;  %v3821_v12 = vld [vmem:[#allocation3 + $0x10] sm:$0xff] }
 0x9c6   :  { %3119 = vrcp.f32 %v1707_v60  ;;  %2037 = vmatprep.subr.bf16.mxu1 %v3815_v11 }
 0x9c7   :  { %3121 = vtanh.f32 %v1721_v63  ;;  %1761 = vrot.lane.b32.xlu0 %v1721_v63, %s3335_s8  ;;  %v3823_v63 = vld [vmem:[#allocation3 + $0x28] sm:$0xff] }
 0x9cf   :  { %v3118_v13 = vpop.eup %3117 }
 0x9d0   :  { %v3120_v14 = vpop.eup %3119  ;;  %v1747_v5 = vmul.f32 %v3118_v13, %v3116_v10  ;;  %v3825_v10 = vld [vmem:[#allocation3 + $0x38] sm:$0xff]  ;;  %v3831_v13 = vld [vmem:[#allocation3 + $0x20] sm:$0xff] }
 0x9d1   :  { %v3122_v8 = vpop.eup %3121 }
 0x9d2   :  { %v1723_v15 = vmul.f32 %v3122_v8, %v3120_v14  ;;  %1755 = vst.msk [vmem:[#allocation2 + $0x8] sm:$0x3] %vm1754_vm13, %v1747_v5  ;;  %v1757_v36 = vrot.slane %v1747_v5, 2  ;;  %v3833_v14 = vld [vmem:[#allocation3 + $0x30] sm:$0xff]  ;;  %v3835_v5 = vld [vmem:[#allocation3 + $0x48] sm:$0xff]  ;;  %v3837_v8 = vld [vmem:[#allocation3 + $0x58] sm:$0xff] }
 0x9d4   :  { %1749 = vrot.lane.b32.xlu1 %v1723_v15, %s3335_s8  ;;  %v3843_v15 = vld [vmem:[#allocation3 + $0x40] sm:$0xff] }
 0xa39   :  { %v1762_v33 = vpop.permute.xlu0 %1761 }
 0xa3a   :  { %v3796_v34 = vsel %vm1154_vm8, %v1762_v33, %v1765_v31  ;;  %v3845_v31 = vld [vmem:[#allocation3 + $0x50] sm:$0xff]  ;;  %v3847_v33 = vld [vmem:[#allocation3 + $0x68] sm:$0xff] }
 0xa3b   :  { %v1910_v35 = vrot.slane %v3796_v34, 6 }
 0xa3d   :  { %1911 = vrot.lane.b32.xlu1 %v1910_v35, %s3335_s8  ;;  %v3849_v35 = vld [vmem:[#allocation3 + $0x78] sm:$0xff] }
 0xa46   :  { %v1750_v37 = vpop.permute.xlu1 %1749 }
 0xa47   :  { %1753 = vst.msk [vmem:[#allocation2] sm:$0xc0] %vm1752_vm14, %v1750_v37  ;;  %v1759_v38 = vsel %vm1154_vm8, %v1750_v37, %v1757_v36  ;;  %v3855_v36 = vld [vmem:[#allocation3 + $0x60] sm:$0xff]  ;;  %v3857_v37 = vld [vmem:[#allocation3 + $0x70] sm:$0xff] }
 0xa48   :  { %v1768_v39 = vpack.c.bf16 %v1759_v38, %v1759_v38 }
 0xa4a   :  { %v1802_v40 = vrot.slane %v1768_v39, 3 }
 0xa4c   :  { %1837 = vmatmul.mubr.bf16.vlgmr.msra.gmra.mrb[20].mxu0 %v1802_v40  ;;  %1878 = vmatmul.mubr.bf16.vlgmr.msra.gmra.mrb[28].mxu1 %v1802_v40  ;;  %v3861_v40 = vld [vmem:[#allocation3 + $0x88] sm:$0xff] }
 0xa4d   :  { %2028 = vmatprep.mubr.bf16.mxu0 %v3332_v0  ;;  %2069 = vmatprep.mubr.bf16.mxu1 %v3332_v0 }
 0xa4e   :  { %1997 = vmatpush1.bf16.msra.mxu0 %v3817_v62  ;;  %2038 = vmatpush1.bf16.msra.mxu1 %v3821_v12 }
 0xa4f   :  { %1998 = vmatprep.subr.bf16.mxu0 %v3823_v63  ;;  %2039 = vmatprep.subr.bf16.mxu1 %v3825_v10 }
 0xa52   :  { %1999 = vmatpush1.bf16.msra.mxu0 %v3831_v13  ;;  %2040 = vmatpush1.bf16.msra.mxu1 %v3833_v14 }
 0xa53   :  { %2000 = vmatprep.subr.bf16.mxu0 %v3835_v5  ;;  %2041 = vmatprep.subr.bf16.mxu1 %v3837_v8 }
 0xa56   :  { %2001 = vmatpush1.bf16.msra.mxu0 %v3843_v15  ;;  %2042 = vmatpush1.bf16.msra.mxu1 %v3845_v31 }
 0xa57   :  { %2002 = vmatprep.subr.bf16.mxu0 %v3847_v33  ;;  %2043 = vmatprep.subr.bf16.mxu1 %v3849_v35 }
 0xa5a   :  { %2003 = vmatpush1.bf16.msra.mxu0 %v3855_v36  ;;  %2044 = vmatpush1.bf16.msra.mxu1 %v3857_v37 }
 0xa5b   :  { %2004 = vmatprep.subr.bf16.mxu0 %v3861_v40 }
 0xa5e   :  { %2005 = vmatpush1.bf16.msra.mxu0 %v3758_v3 }
 0xa5f   :  { %2006 = vmatprep.subr.bf16.mxu0 %v3761_v7 }
 0xa62   :  { %2007 = vmatpush1.bf16.msra.mxu0 %v3763_v48 }
 0xa63   :  { %2008 = vmatprep.subr.bf16.mxu0 %v3769_v53 }
 0xa66   :  { %2009 = vmatpush1.bf16.msra.mxu0 %v3776_v59 }
 0xa67   :  { %2010 = vmatprep.subr.bf16.mxu0 %v3781_v57 }
 0xa6a   :  { %2011 = vmatpush1.bf16.msra.mxu0 %v3785_v30 }
 0xa6b   :  { %2199 = vmatprep.subr.bf16.mxu0 %v3813_v61 }
 0xb1f   :  { %v1838_v41 = vpop.f32.mrb[20].mxu0  ;;  %v1879_v42 = vpop.f32.mrb[28].mxu1 }
 0xb20   :  { %v1886_v43 = vadd.f32 %v3469_v24, %v1838_v41  ;;  %v1890_v44 = vrot.slane %v1879_v42, 2  ;;  %v1840_v45 = vpop.f32.mrb[21].mxu0  ;;  %v1881_v46 = vpop.f32.mrb[29].mxu1  ;;  %v3863_v41 = vld [vmem:[#allocation3 + $0x98] sm:$0xff]  ;;  %v3865_v42 = vld [vmem:[#allocation3 + $0x90] sm:$0xff] }
 0xb21   :  { %v1842_v47 = vpop.f32.mrb[22].mxu0  ;;  %v1883_v49 = vpop.f32.mrb[30].mxu1  ;;  %v1891_v55 = vrot.slane %v1881_v46, 2  ;;  %v1887_v23 = vadd.f32 %v3473_v28, %v1840_v45  ;;  %2045 = vmatprep.subr.bf16.mxu1 %v3863_v41  ;;  %v3875_v45 = vld [vmem:[#allocation3 + $0xd8] sm:$0xff] }
 0xb22   :  { %v2778_v51 = vmul.f32 -1.442695, %v1886_v43  ;;  %v1894_v25 = vadd.f32 %v3463_v18, %v1890_v44  ;;  %v1843_v26 = vpop.f32.mrb[23].mxu0  ;;  %v1884_v17 = vpop.f32.mrb[31].mxu1  ;;  %2046 = vmatpush1.bf16.msra.mxu1 %v3865_v42  ;;  %v3871_v43 = vld [vmem:[#allocation3 + $0xb8] sm:$0xff] }
 0xb23   :  { %v1895_v16 = vadd.f32 %v3467_v21, %v1891_v55  ;;  %v2779_v38 = vmul.f32 -1.442695, %v1887_v23  ;;  %2047 = vmatprep.subr.bf16.mxu1 %v3871_v43  ;;  %v1912_v47 = vpop.permute.xlu1 %1911 }
 0xb24   :  { %3123 = vpow2.f32 %v2778_v51  ;;  %v2780_v27 = vmul.f32 -1.442695, %v1894_v25 }
 0xb25   :  { %v2781_v39 = vmul.f32 -1.442695, %v1895_v16 }
 0xb26   :  { %3125 = vpow2.f32 %v2780_v27  ;;  %2048 = vmatpush1.bf16.msra.mxu1 %v3765_v50 }
 0xb27   :  { %3127 = vtanh.f32 %v1887_v23  ;;  %2049 = vmatprep.subr.bf16.mxu1 %v3875_v45 }
 0xb2a   :  { %2050 = vmatpush1.bf16.msra.mxu1 %v3773_v58 }
 0xb2b   :  { %2051 = vmatprep.subr.bf16.mxu1 %v3783_v2 }
 0xb2e   :  { %v3124_v22 = vpop.eup %3123  ;;  %2052 = vmatpush1.bf16.msra.mxu1 %v3789_v32 }
 0xb2f   :  { %v1899_v19 = vadd.f32 1.0, %v3124_v22  ;;  %2240 = vmatprep.subr.bf16.mxu1 %v3815_v11 }
 0xb30   :  { %v3126_v29 = vpop.eup %3125 }
 0xb31   :  { %3129 = vrcp.f32 %v1899_v19  ;;  %v1926_v20 = vadd.f32 1.0, %v3126_v29  ;;  %v3128_v4 = vpop.eup %3127 }
 0xb32   :  { %3131 = vtanh.f32 %v1895_v16 }
 0xb33   :  { %3133 = vrcp.f32 %v1926_v20 }
 0xb34   :  { %3135 = vpow2.f32 %v2779_v38 }
 0xb35   :  { %3137 = vpow2.f32 %v2781_v39 }
 0xb3b   :  { %v3130_v6 = vpop.eup %3129 }
 0xb3c   :  { %v3132_v52 = vpop.eup %3131  ;;  %v1915_v54 = vmul.f32 %v3130_v6, %v3128_v4  ;;  %v1914_v51 = vmul.f32 %v3130_v6, %v1912_v47 }
 0xb3d   :  { %v3808_v9 = vpop.eup %3133 }
 0xb3e   :  { %1917 = vrot.lane.b32.xlu0 %v1915_v54, %s3335_s8  ;;  %v1937_v60 = vmul.f32 %v3808_v9, %v3132_v52  ;;  %v3136_v44 = vpop.eup %3135  ;;  %v1936_v27 = vmul.f32 %v3808_v9, %v3796_v34 }
 0xb3f   :  { %v3138_v46 = vpop.eup %3137  ;;  %v1906_v49 = vadd.f32 1.0, %v3136_v44 }
 0xb40   :  { %1939 = vrot.lane.b32.xlu1 %v1937_v60, %s3335_s8  ;;  %v1933_v25 = vadd.f32 1.0, %v3138_v46 }
 0xb41   :  { %3139 = vrcp.f32 %v1906_v49 }
 0xb4b   :  { %v3140_v34 = vpop.eup %3139 }
 0xbb0   :  { %v1918_v26 = vpop.permute.xlu0 %1917 }
 0xbb1   :  { %v1920_v17 = vadd.f32 %v1918_v26, %v1914_v51 }
 0xbb2   :  { %v1940_v55 = vpop.permute.xlu1 %1939 }
 0xbb3   :  { %3141 = vtanh.f32 %v1920_v17  ;;  %v1942_v23 = vadd.f32 %v1940_v55, %v1936_v27  ;;  %1956 = vrot.lane.b32.xlu1 %v1920_v17, %s3335_s8 }
 0xbb4   :  { %3143 = vrcp.f32 %v1933_v25 }
 0xbb5   :  { %3145 = vtanh.f32 %v1942_v23  ;;  %v1960_v4 = vrot.slane %v1942_v23, 6 }
 0xbbd   :  { %v3142_v22 = vpop.eup %3141 }
 0xbbe   :  { %v3144_v16 = vpop.eup %3143  ;;  %v1922_v19 = vmul.f32 %v3142_v22, %v3140_v34 }
 0xbbf   :  { %v3146_v29 = vpop.eup %3145 }
 0xbc0   :  { %1946 = vrot.lane.b32.xlu0 %v1922_v19, %s3335_s8  ;;  %v1944_v20 = vmul.f32 %v3146_v29, %v3144_v16 }
 0xbc2   :  { %1950 = vst.msk [vmem:[#allocation2] sm:$0xc0] %vm1149_vm6, %v1944_v20  ;;  %v1952_v9 = vrot.slane %v1944_v20, 6 }
 0xc25   :  { %v1957_v6 = vpop.permute.xlu1 %1956 }
 0xc26   :  { %v3895_v52 = vsel %vm1154_vm8, %v1957_v6, %v1960_v4 }
 0xc27   :  { %v2108_v54 = vrot.slane %v3895_v52, 6 }
 0xc29   :  { %2109 = vrot.lane.b32.xlu0 %v2108_v54, %s3335_s8 }
 0xc32   :  { %v1947_v60 = vpop.permute.xlu0 %1946 }
 0xc33   :  { %1949 = vst.msk [vmem:[#allocation2 + $0x8] sm:$0x3] %vm1147_vm7, %v1947_v60  ;;  %v1954_v38 = vsel %vm1154_vm8, %v1947_v60, %v1952_v9 }
 0xc34   :  { %v1963_v39 = vpack.c.bf16 %v1954_v38, %v1954_v38 }
 0xc36   :  { %2029 = vmatmul.mubr.bf16.vlgmr.msra.gmra.mrb[24].mxu0 %v1963_v39  ;;  %2070 = vmatmul.mubr.bf16.vlgmr.msra.gmra.mrb[32].mxu1 %v1963_v39  ;;  %v2134_v39 = vrot.slane %v3895_v52, 4 }
 0xc37   :  { %2200 = vmatpush1.bf16.msra.mxu0 %v3817_v62  ;;  %2241 = vmatpush1.bf16.msra.mxu1 %v3821_v12 }
 0xc38   :  { %2201 = vmatprep.subr.bf16.mxu0 %v3823_v63  ;;  %2242 = vmatprep.subr.bf16.mxu1 %v3825_v10 }
 0xc39   :  { %2231 = vmatprep.mubr.bf16.mxu0 %v3332_v0  ;;  %2272 = vmatprep.mubr.bf16.mxu1 %v3332_v0 }
 0xc3b   :  { %2202 = vmatpush1.bf16.msra.mxu0 %v3831_v13  ;;  %2243 = vmatpush1.bf16.msra.mxu1 %v3833_v14 }
 0xc3c   :  { %2203 = vmatprep.subr.bf16.mxu0 %v3835_v5  ;;  %2244 = vmatprep.subr.bf16.mxu1 %v3837_v8 }
 0xc3f   :  { %2204 = vmatpush1.bf16.msra.mxu0 %v3843_v15  ;;  %2245 = vmatpush1.bf16.msra.mxu1 %v3845_v31 }
 0xc40   :  { %2205 = vmatprep.subr.bf16.mxu0 %v3847_v33  ;;  %2246 = vmatprep.subr.bf16.mxu1 %v3849_v35 }
 0xc43   :  { %2206 = vmatpush1.bf16.msra.mxu0 %v3855_v36  ;;  %2247 = vmatpush1.bf16.msra.mxu1 %v3857_v37 }
 0xc44   :  { %2207 = vmatprep.subr.bf16.mxu0 %v3861_v40  ;;  %2248 = vmatprep.subr.bf16.mxu1 %v3863_v41 }
 0xc47   :  { %2208 = vmatpush1.bf16.msra.mxu0 %v3758_v3  ;;  %2249 = vmatpush1.bf16.msra.mxu1 %v3865_v42 }
 0xc48   :  { %2209 = vmatprep.subr.bf16.mxu0 %v3761_v7  ;;  %2250 = vmatprep.subr.bf16.mxu1 %v3871_v43 }
 0xc4b   :  { %2210 = vmatpush1.bf16.msra.mxu0 %v3763_v48  ;;  %2251 = vmatpush1.bf16.msra.mxu1 %v3765_v50 }
 0xc4c   :  { %2211 = vmatprep.subr.bf16.mxu0 %v3769_v53  ;;  %2252 = vmatprep.subr.bf16.mxu1 %v3875_v45 }
 0xc4f   :  { %2212 = vmatpush1.bf16.msra.mxu0 %v3776_v59  ;;  %2253 = vmatpush1.bf16.msra.mxu1 %v3773_v58 }
 0xc50   :  { %2213 = vmatprep.subr.bf16.mxu0 %v3781_v57  ;;  %2254 = vmatprep.subr.bf16.mxu1 %v3783_v2 }
 0xc53   :  { %2214 = vmatpush1.bf16.msra.mxu0 %v3785_v30  ;;  %2255 = vmatpush1.bf16.msra.mxu1 %v3789_v32 }
 0xc54   :  { %2400 = vmatprep.subr.bf16.mxu0 %v3813_v61  ;;  %2441 = vmatprep.subr.bf16.mxu1 %v3815_v11 }
 0xd09   :  { %v2030_v44 = vpop.f32.mrb[24].mxu0  ;;  %v2071_v46 = vpop.f32.mrb[32].mxu1 }
 0xd0a   :  { %v2080_v47 = vrot.slane %v2030_v44, 6  ;;  %v2088_v49 = vrot.slane %v2071_v46, 4  ;;  %v2032_v51 = vpop.f32.mrb[25].mxu0  ;;  %v2073_v25 = vpop.f32.mrb[33].mxu1 }
 0xd0b   :  { %v2034_v26 = vpop.f32.mrb[26].mxu0  ;;  %v2075_v17 = vpop.f32.mrb[34].mxu1  ;;  %v2081_v61 = vrot.slane %v2032_v51, 6  ;;  %v2089_v11 = vrot.slane %v2073_v25, 4 }
 0xd0c   :  { %v2084_v27 = vadd.f32 %v3469_v24, %v2080_v47  ;;  %v2092_v55 = vadd.f32 %v3463_v18, %v2088_v49  ;;  %v2035_v23 = vpop.f32.mrb[27].mxu0  ;;  %v2076_v34 = vpop.f32.mrb[35].mxu1 }
 0xd0d   :  { %v2085_v19 = vadd.f32 %v3473_v28, %v2081_v61  ;;  %v2093_v29 = vadd.f32 %v3467_v21, %v2089_v11 }
 0xd0e   :  { %v2782_v22 = vmul.f32 -1.442695, %v2084_v27  ;;  %v2784_v16 = vmul.f32 -1.442695, %v2092_v55  ;;  %v2110_v27 = vpop.permute.xlu0 %2109 }
 0xd0f   :  { %v2783_v51 = vmul.f32 -1.442695, %v2085_v19  ;;  %v2785_v25 = vmul.f32 -1.442695, %v2093_v29 }
 0xd10   :  { %3147 = vpow2.f32 %v2782_v22 }
 0xd11   :  { %3149 = vpow2.f32 %v2784_v16 }
 0xd12   :  { %3151 = vtanh.f32 %v2085_v19 }
 0xd13   :  { %3153 = vtanh.f32 %v2093_v29 }
 0xd1a   :  { %v3148_v20 = vpop.eup %3147 }
 0xd1b   :  { %v3150_v4 = vpop.eup %3149  ;;  %v2097_v6 = vadd.f32 1.0, %v3148_v20 }
 0xd1c   :  { %v2124_v54 = vadd.f32 1.0, %v3150_v4  ;;  %v3152_v9 = vpop.eup %3151 }
 0xd1d   :  { %3155 = vrcp.f32 %v2097_v6  ;;  %v3154_v60 = vpop.eup %3153 }
 0xd1e   :  { %3157 = vrcp.f32 %v2124_v54 }
 0xd1f   :  { %3159 = vpow2.f32 %v2783_v51 }
 0xd20   :  { %3161 = vpow2.f32 %v2785_v25 }
 0xd27   :  { %v3156_v38 = vpop.eup %3155 }
 0xd28   :  { %v3158_v44 = vpop.eup %3157  ;;  %v2113_v46 = vmul.f32 %v3156_v38, %v3152_v9  ;;  %v2112_v34 = vmul.f32 %v3156_v38, %v2110_v27 }
 0xd29   :  { %v2137_v47 = vmul.f32 %v3158_v44, %v3154_v60  ;;  %v2136_v49 = vmul.f32 %v3158_v44, %v2134_v39  ;;  %v3160_v26 = vpop.eup %3159 }
 0xd2a   :  { %2115 = vrot.lane.b32.xlu1 %v2113_v46, %s3335_s8  ;;  %v3162_v17 = vpop.eup %3161  ;;  %v2104_v55 = vadd.f32 1.0, %v3160_v26 }
 0xd2b   :  { %2139 = vrot.lane.b32.xlu0 %v2137_v47, %s3335_s8  ;;  %v2131_v23 = vadd.f32 1.0, %v3162_v17 }
 0xd2c   :  { %3163 = vrcp.f32 %v2104_v55 }
 0xd2d   :  { %3165 = vrcp.f32 %v2131_v23 }
 0xd36   :  { %v3164_v11 = vpop.eup %3163 }
 0xd37   :  { %v3166_v19 = vpop.eup %3165 }
 0xd9c   :  { %v2116_v22 = vpop.permute.xlu1 %2115 }
 0xd9d   :  { %v2140_v52 = vpop.permute.xlu0 %2139  ;;  %v2118_v16 = vadd.f32 %v2116_v22, %v2112_v34 }
 0xd9e   :  { %v2142_v61 = vadd.f32 %v2140_v52, %v2136_v49 }
 0xd9f   :  { %3167 = vtanh.f32 %v2118_v16  ;;  %2156 = vrot.lane.b32.xlu0 %v2118_v16, %s3335_s8 }
 0xda0   :  { %3169 = vtanh.f32 %v2142_v61  ;;  %v2160_v54 = vrot.slane %v2142_v61, 2 }
 0xda9   :  { %v3168_v29 = vpop.eup %3167 }
 0xdaa   :  { %v3170_v20 = vpop.eup %3169  ;;  %v2120_v4 = vmul.f32 %v3168_v29, %v3164_v11 }
 0xdab   :  { %v2144_v6 = vmul.f32 %v3170_v20, %v3166_v19 }
 0xdac   :  { %2146 = vrot.lane.b32.xlu1 %v2120_v4, %s3335_s8 }
 0xdad   :  { %2150 = vst.msk [vmem:[#allocation2] sm:$0x30] %vm1352_vm9, %v2144_v6  ;;  %v2152_v39 = vrot.slane %v2144_v6, 2 }
 0xe11   :  { %v2157_v9 = vpop.permute.xlu0 %2156 }
 0xe12   :  { %v3946_v60 = vsel %vm1154_vm8, %v2157_v9, %v2160_v54 }
 0xe13   :  { %v2311_v38 = vrot.slane %v3946_v60, 6 }
 0xe15   :  { %2312 = vrot.lane.b32.xlu1 %v2311_v38, %s3335_s8 }
 0xe1e   :  { %v2147_v44 = vpop.permute.xlu1 %2146 }
 0xe1f   :  { %2149 = vst.msk [vmem:[#allocation2 + $0x8] sm:$0xc] %vm1350_vm10, %v2147_v44  ;;  %v2154_v46 = vsel %vm1154_vm8, %v2147_v44, %v2152_v39 }
 0xe20   :  { %v2163_v47 = vpack.c.bf16 %v2154_v46, %v2154_v46 }
 0xe22   :  { %v2197_v49 = vrot.slane %v2163_v47, 1 }
 0xe24   :  { %2232 = vmatmul.mubr.bf16.vlgmr.msra.gmra.mrb[28].mxu0 %v2197_v49  ;;  %2273 = vmatmul.mubr.bf16.vlgmr.msra.gmra.mrb[36].mxu1 %v2197_v49 }
 0xe25   :  { %2401 = vmatpush1.bf16.msra.mxu0 %v3817_v62  ;;  %2442 = vmatpush1.bf16.msra.mxu1 %v3821_v12 }
 0xe26   :  { %2402 = vmatprep.subr.bf16.mxu0 %v3823_v63  ;;  %2443 = vmatprep.subr.bf16.mxu1 %v3825_v10 }
 0xe27   :  { %2432 = vmatprep.mubr.bf16.mxu0 %v3332_v0  ;;  %2473 = vmatprep.mubr.bf16.mxu1 %v3332_v0 }
 0xe29   :  { %2403 = vmatpush1.bf16.msra.mxu0 %v3831_v13  ;;  %2444 = vmatpush1.bf16.msra.mxu1 %v3833_v14 }
 0xe2a   :  { %2404 = vmatprep.subr.bf16.mxu0 %v3835_v5  ;;  %2445 = vmatprep.subr.bf16.mxu1 %v3837_v8 }
 0xe2d   :  { %2405 = vmatpush1.bf16.msra.mxu0 %v3843_v15  ;;  %2446 = vmatpush1.bf16.msra.mxu1 %v3845_v31 }
 0xe2e   :  { %2406 = vmatprep.subr.bf16.mxu0 %v3847_v33  ;;  %2447 = vmatprep.subr.bf16.mxu1 %v3849_v35 }
 0xe31   :  { %2407 = vmatpush1.bf16.msra.mxu0 %v3855_v36  ;;  %2448 = vmatpush1.bf16.msra.mxu1 %v3857_v37 }
 0xe32   :  { %2408 = vmatprep.subr.bf16.mxu0 %v3861_v40  ;;  %2449 = vmatprep.subr.bf16.mxu1 %v3863_v41 }
 0xe35   :  { %2409 = vmatpush1.bf16.msra.mxu0 %v3758_v3  ;;  %2450 = vmatpush1.bf16.msra.mxu1 %v3865_v42 }
 0xe36   :  { %2410 = vmatprep.subr.bf16.mxu0 %v3761_v7  ;;  %2451 = vmatprep.subr.bf16.mxu1 %v3871_v43 }
 0xe39   :  { %2411 = vmatpush1.bf16.msra.mxu0 %v3763_v48  ;;  %2452 = vmatpush1.bf16.msra.mxu1 %v3765_v50 }
 0xe3a   :  { %2412 = vmatprep.subr.bf16.mxu0 %v3769_v53  ;;  %2453 = vmatprep.subr.bf16.mxu1 %v3875_v45 }
 0xe3d   :  { %2413 = vmatpush1.bf16.msra.mxu0 %v3776_v59  ;;  %2454 = vmatpush1.bf16.msra.mxu1 %v3773_v58 }
 0xe3e   :  { %2414 = vmatprep.subr.bf16.mxu0 %v3781_v57  ;;  %2455 = vmatprep.subr.bf16.mxu1 %v3783_v2 }
 0xe41   :  { %2415 = vmatpush1.bf16.msra.mxu0 %v3785_v30  ;;  %2456 = vmatpush1.bf16.msra.mxu1 %v3789_v32 }
 0xe87   :  { %v2313_v25 = vpop.permute.xlu1 %2312 }
 0xef7   :  { %v2233_v0 = vpop.f32.mrb[28].mxu0  ;;  %v2274_v3 = vpop.f32.mrb[36].mxu1 }
 0xef8   :  { %v2283_v7 = vrot.slane %v2233_v0, 4  ;;  %v2291_v48 = vrot.slane %v2274_v3, 6  ;;  %v2235_v50 = vpop.f32.mrb[29].mxu0  ;;  %v2276_v53 = vpop.f32.mrb[37].mxu1 }
 0xef9   :  { %v2237_v62 = vpop.f32.mrb[30].mxu0  ;;  %v2278_v12 = vpop.f32.mrb[38].mxu1  ;;  %v2284_v30 = vrot.slane %v2235_v50, 4  ;;  %v2292_v32 = vrot.slane %v2276_v53, 6 }
 0xefa   :  { %v2287_v59 = vadd.f32 %v3469_v24, %v2283_v7  ;;  %v2295_v58 = vadd.f32 %v3463_v18, %v2291_v48  ;;  %v2238_v63 = vpop.f32.mrb[31].mxu0  ;;  %v2279_v57 = vpop.f32.mrb[39].mxu1 }
 0xefb   :  { %v2288_v13 = vadd.f32 %v3473_v28, %v2284_v30  ;;  %v2296_v14 = vadd.f32 %v3467_v21, %v2292_v32 }
 0xefc   :  { %v2786_v10 = vmul.f32 -1.442695, %v2287_v59  ;;  %v2788_v2 = vmul.f32 -1.442695, %v2295_v58 }
 0xefd   :  { %v2787_v42 = vmul.f32 -1.442695, %v2288_v13  ;;  %v2789_v43 = vmul.f32 -1.442695, %v2296_v14 }
 0xefe   :  { %3171 = vpow2.f32 %v2786_v10 }
 0xeff   :  { %3173 = vpow2.f32 %v2788_v2 }
 0xf00   :  { %3175 = vtanh.f32 %v2288_v13 }
 0xf01   :  { %3177 = vtanh.f32 %v2296_v14 }
 0xf08   :  { %v3172_v5 = vpop.eup %3171 }
 0xf09   :  { %v3174_v8 = vpop.eup %3173  ;;  %v2300_v15 = vadd.f32 1.0, %v3172_v5 }
 0xf0a   :  { %v2327_v31 = vadd.f32 1.0, %v3174_v8  ;;  %v3176_v33 = vpop.eup %3175 }
 0xf0b   :  { %3179 = vrcp.f32 %v2300_v15  ;;  %v3178_v35 = vpop.eup %3177 }
 0xf0c   :  { %3181 = vrcp.f32 %v2327_v31 }
 0xf0d   :  { %3183 = vpow2.f32 %v2787_v42 }
 0xf0e   :  { %3185 = vpow2.f32 %v2789_v43 }
 0xf15   :  { %v3180_v36 = vpop.eup %3179 }
 0xf16   :  { %v3182_v37 = vpop.eup %3181  ;;  %v2316_v40 = vmul.f32 %v3180_v36, %v3176_v33  ;;  %v2315_v27 = vmul.f32 %v3180_v36, %v2313_v25 }
 0xf17   :  { %v2338_v41 = vmul.f32 %v3182_v37, %v3178_v35  ;;  %v3184_v45 = vpop.eup %3183  ;;  %v2337_v55 = vmul.f32 %v3182_v37, %v3946_v60 }
 0xf18   :  { %2318 = vrot.lane.b32.xlu0 %v2316_v40, %s3335_s8  ;;  %v3186_v51 = vpop.eup %3185  ;;  %v2307_v26 = vadd.f32 1.0, %v3184_v45 }
 0xf19   :  { %2340 = vrot.lane.b32.xlu1 %v2338_v41, %s3335_s8  ;;  %v2334_v17 = vadd.f32 1.0, %v3186_v51 }
 0xf1a   :  { %3187 = vrcp.f32 %v2307_v26 }
 0xf1b   :  { %3189 = vrcp.f32 %v2334_v17 }
 0xf24   :  { %v3188_v16 = vpop.eup %3187 }
 0xf25   :  { %v3190_v61 = vpop.eup %3189 }
 0xf8a   :  { %v2319_v23 = vpop.permute.xlu0 %2318 }
 0xf8b   :  { %v2341_v34 = vpop.permute.xlu1 %2340  ;;  %v2321_v22 = vadd.f32 %v2319_v23, %v2315_v27 }
 0xf8c   :  { %v2343_v52 = vadd.f32 %v2341_v34, %v2337_v55 }
 0xf8d   :  { %3191 = vtanh.f32 %v2321_v22  ;;  %2357 = vrot.lane.b32.xlu1 %v2321_v22, %s3335_s8 }
 0xf8e   :  { %3193 = vtanh.f32 %v2343_v52  ;;  %v2361_v4 = vrot.slane %v2343_v52, 6 }
 0xf97   :  { %v3192_v11 = vpop.eup %3191 }
 0xf98   :  { %v3194_v19 = vpop.eup %3193  ;;  %v2323_v29 = vmul.f32 %v3192_v11, %v3188_v16 }
 0xf99   :  { %v2345_v20 = vmul.f32 %v3194_v19, %v3190_v61 }
 0xf9a   :  { %2347 = vrot.lane.b32.xlu0 %v2323_v29, %s3335_s8 }
 0xf9b   :  { %2351 = vst.msk [vmem:[#allocation2] sm:$0xc] %vm1555_vm11, %v2345_v20  ;;  %v2353_v60 = vrot.slane %v2345_v20, 6 }
 0xfff   :  { %v2358_v6 = vpop.permute.xlu1 %2357 }
0x1000   :  { %v2363_v54 = vsel %vm1154_vm8, %v2358_v6, %v2361_v4 }
0x1001   :  { %v2506_v9 = vrot.slane %v2363_v54, 6  ;;  %v2532_v14 = vrot.slane %v2363_v54, 4 }
0x1003   :  { %2507 = vrot.lane.b32.xlu0 %v2506_v9, %s3335_s8 }
0x100c   :  { %v2348_v38 = vpop.permute.xlu0 %2347 }
0x100d   :  { %2350 = vst.msk [vmem:[#allocation2 + $0x8] sm:$0x30] %vm1553_vm12, %v2348_v38  ;;  %v2355_v39 = vsel %vm1154_vm8, %v2348_v38, %v2353_v60 }
0x100e   :  { %v2364_v44 = vpack.c.bf16 %v2355_v39, %v2355_v39 }
0x1010   :  { %v2398_v46 = vrot.slane %v2364_v44, 2 }
0x1012   :  { %2433 = vmatmul.mubr.bf16.vlgmr.msra.gmra.mrb[32].mxu0 %v2398_v46  ;;  %2474 = vmatmul.mubr.bf16.vlgmr.msra.gmra.mrb[40].mxu1 %v2398_v46 }
0x1075   :  { %v2508_v37 = vpop.permute.xlu0 %2507 }
0x10e5   :  { %v2434_v47 = vpop.f32.mrb[32].mxu0  ;;  %v2475_v49 = vpop.f32.mrb[40].mxu1 }
0x10e6   :  { %v2484_v0 = vrot.slane %v2434_v47, 2  ;;  %v2490_v3 = vadd.f32 %v3463_v18, %v2475_v49  ;;  %v2436_v7 = vpop.f32.mrb[33].mxu0  ;;  %v2477_v48 = vpop.f32.mrb[41].mxu1 }
0x10e7   :  { %v2438_v50 = vpop.f32.mrb[34].mxu0  ;;  %v2479_v53 = vpop.f32.mrb[42].mxu1  ;;  %v2485_v57 = vrot.slane %v2436_v7, 2  ;;  %v2491_v10 = vadd.f32 %v3467_v21, %v2477_v48 }
0x10e8   :  { %v2488_v62 = vadd.f32 %v3469_v24, %v2484_v0  ;;  %v2792_v12 = vmul.f32 -1.442695, %v2490_v3  ;;  %v2439_v59 = vpop.f32.mrb[35].mxu0  ;;  %v2480_v58 = vpop.f32.mrb[43].mxu1 }
0x10e9   :  { %v2489_v30 = vadd.f32 %v3473_v28, %v2485_v57  ;;  %v2793_v28 = vmul.f32 -1.442695, %v2491_v10 }
0x10ea   :  { %v2790_v63 = vmul.f32 -1.442695, %v2488_v62  ;;  %3195 = vpow2.f32 %v2792_v12 }
0x10eb   :  { %v2791_v35 = vmul.f32 -1.442695, %v2489_v30 }
0x10ec   :  { %3197 = vpow2.f32 %v2790_v63 }
0x10ed   :  { %3199 = vtanh.f32 %v2491_v10 }
0x10f4   :  { %v3196_v2 = vpop.eup %3195 }
0x10f5   :  { %v2522_v32 = vadd.f32 1.0, %v3196_v2 }
0x10f6   :  { %v3198_v18 = vpop.eup %3197 }
0x10f7   :  { %v2495_v13 = vadd.f32 1.0, %v3198_v18  ;;  %3201 = vrcp.f32 %v2522_v32  ;;  %v3200_v24 = vpop.eup %3199 }
0x10f8   :  { %3203 = vtanh.f32 %v2489_v30 }
0x10f9   :  { %3205 = vrcp.f32 %v2495_v13 }
0x10fa   :  { %3207 = vpow2.f32 %v2793_v28 }
0x10fb   :  { %3209 = vpow2.f32 %v2791_v35 }
0x1101   :  { %v3202_v5 = vpop.eup %3201 }
0x1102   :  { %v3204_v8 = vpop.eup %3203  ;;  %v2535_v15 = vmul.f32 %v3202_v5, %v3200_v24  ;;  %v2534_v31 = vmul.f32 %v3202_v5, %v2532_v14 }
0x1103   :  { %v3206_v33 = vpop.eup %3205 }
0x1104   :  { %2537 = vrot.lane.b32.xlu0 %v2535_v15, %s3335_s8  ;;  %v2511_v21 = vmul.f32 %v3206_v33, %v3204_v8  ;;  %v3208_v36 = vpop.eup %3207  ;;  %v2510_v51 = vmul.f32 %v3206_v33, %v2508_v37 }
0x1105   :  { %v3210_v40 = vpop.eup %3209  ;;  %v2529_v41 = vadd.f32 1.0, %v3208_v36 }
0x1106   :  { %2513 = vrot.lane.b32.xlu1 %v2511_v21, %s3335_s8  ;;  %v2502_v42 = vadd.f32 1.0, %v3210_v40 }
0x1107   :  { %3211 = vrcp.f32 %v2529_v41 }
0x1111   :  { %v3212_v17 = vpop.eup %3211 }
0x1176   :  { %v2538_v43 = vpop.permute.xlu0 %2537 }
0x1177   :  { %v2540_v45 = vadd.f32 %v2538_v43, %v2534_v31 }
0x1178   :  { %v2514_v25 = vpop.permute.xlu1 %2513 }
0x1179   :  { %3213 = vtanh.f32 %v2540_v45  ;;  %v2516_v26 = vadd.f32 %v2514_v25, %v2510_v51 }
0x117a   :  { %3215 = vrcp.f32 %v2502_v42 }
0x117b   :  { %3217 = vtanh.f32 %v2516_v26 }
0x1183   :  { %v3214_v27 = vpop.eup %3213 }
0x1184   :  { %v3216_v55 = vpop.eup %3215  ;;  %v2542_v23 = vmul.f32 %v3214_v27, %v3212_v17 }
0x1185   :  { %v3218_v34 = vpop.eup %3217 }
0x1186   :  { %2548 = vst.msk [vmem:[#allocation2] sm:$0x3] %vm1754_vm13, %v2542_v23  ;;  %v2518_v22 = vmul.f32 %v3218_v34, %v3216_v55 }
0x1188   :  { %2544 = vrot.lane.b32.xlu1 %v2518_v22, %s3335_s8 }
0x11fa   :  { %v2545_v52 = vpop.permute.xlu1 %2544 }
0x11fb   :  { %2547 = vst.msk [vmem:[#allocation2 + $0x8] sm:$0xc0] %vm1752_vm14, %v2545_v52 }
0x11fc   :  { %3321 = dma.done.wait [#allocation5 + $0x1], 1024 }
0x11fd   :  { %3322 = vsyncadd [#allocation5 + $0x1], 4294966272  ;;  %2832 = vmatprep.subr.bf16.mxu0 %v3333_v1  ;;  %vm3342_vm15 = vmmov 0   ;;  %v2555_v16 = vld [vmem:[#allocation4] sm:$0xff]  ;;  %v2556_v61 = vld [vmem:[#allocation4 + $0x8] sm:$0xff]  ;;  %vm2611_vm0 = vcmp.lt.s32.totalorder %v3429_v56, 9 }
0x11fe   :  { %2848 = vmatprep.mubr.msk.bf16.mxu0 %vm3342_vm15, %v3333_v1  ;;  %2833 = vmatpush3.bf16.msra.mxu0 %v2555_v16  ;;  %v2557_v11 = vld [vmem:[#allocation4 + $0x10] sm:$0xff]  ;;  %v2558_v19 = vld [vmem:[#allocation4 + $0x18] sm:$0xff]  ;;  %v2559_v29 = vld [vmem:[#allocation4 + $0x20] sm:$0xff] }
0x11ff   :  { %2834 = vmatprep.subr.bf16.mxu0 %v3333_v1  ;;  %v2560_v20 = vld [vmem:[#allocation4 + $0x28] sm:$0xff]  ;;  %v2561_v4 = vld [vmem:[#allocation4 + $0x30] sm:$0xff]  ;;  %v2562_v9 = vld [vmem:[#allocation4 + $0x38] sm:$0xff] }
0x1200   :  { %v2552_v6 = vld [vmem:[#allocation2] sm:$0xff] }
0x1201   :  { %v2794_v38 = vld [vmem:[%s4048_s6] ss:$0 sm:$0xff]  ;;  %s3343_s6 = smov [#allocation11]  }
0x1202   :  { %2835 = vmatpush3.bf16.msra.mxu0 %v2556_v61  ;;  %v2553_v54 = vld [vmem:[#allocation2 + $0x8] sm:$0xff]  ;;  %s2645_s8 = sshll.u32 %s3343_s6, 4  ;;  %s2646_s8 = int_to_ptr.vmem [resolvable:$true] %s2645_s8 }
0x1203   :  { %2836 = vmatprep.subr.bf16.mxu0 %v3333_v1  ;;  %v2554_v60 = vpack.c.bf16 %v2553_v54, %v2552_v6  ;;  %s3293_s11 = scalar_lea.vmem %s2646_s8, 256  ;;  %p3298_p11 = scmp.lt.s32.totalorder %s2646_s8, %s2646_s8 }
0x1204   :  { %p3294_p10 = scmp.ne.s32.totalorder %s2646_s8, %s3293_s11  ;;  %p3299_p12 = scmp.lt.s32.totalorder %s3293_s11, %s3293_s11 }
0x1206   :  { %2837 = vmatpush3.bf16.msra.mxu0 %v2557_v11  ;;  %p3300_p13 = por %p3299_p12, %p3298_p11 }
0x1207   :  { %2838 = vmatprep.subr.bf16.mxu0 %v3333_v1 }
0x1208   :  { %p3301_p0 = pnand %p3300_p13, %p3294_p10 }
0x120a   :  { %2839 = vmatpush3.bf16.msra.mxu0 %v2558_v19 }
0x120b   :  { %2840 = vmatprep.subr.bf16.mxu0 %v3333_v1 }
0x120e   :  { %2841 = vmatpush3.bf16.msra.mxu0 %v2559_v29 }
0x120f   :  { %2842 = vmatprep.subr.bf16.mxu0 %v3333_v1 }
0x1212   :  { %2843 = vmatpush3.bf16.msra.mxu0 %v2560_v20 }
0x1213   :  { %2844 = vmatprep.subr.bf16.mxu0 %v3333_v1 }
0x1216   :  { %2845 = vmatpush3.bf16.msra.mxu0 %v2561_v4 }
0x1217   :  { %2846 = vmatprep.subr.bf16.mxu0 %v3333_v1 }
0x121a   :  { %2847 = vmatpush3.bf16.msra.mxu0 %v2562_v9 }
0x121d   :  { %2849 = vmatmul.mubr.bf16.vlgmr.msra.gmra.mrb[36].mxu0 %v2554_v60 }
0x12f0   :  { %v2604_v39 = vpop.f32.mrb[36].mxu0 }
0x12f1   :  { %v2605_v44 = vadd.f32 %v2794_v38, %v2604_v39  ;;  %v2850_v46 = vpop.f32.mrb[37].mxu0 }
0x12f2   :  { %v2607_v47 = vpop.f32.mrb[38].mxu0 }
0x12f3   :  { %v2608_v49 = vadd.f32 %v2794_v38, %v2607_v47  ;;  %v2851_v0 = vpop.f32.mrb[39].mxu0  ;;  %v2612_v3 = vsel %vm2611_vm0, %v2605_v44, -1e+30 }
0x12f4   :  { %2614 = vmax.xlane.f32.xlu0 %v2612_v3 }
0x12f5   :  { %v2613_v1 = vsel %vm2611_vm0, %v2608_v49, -1e+30 }
0x12f8   :  { %2616 = vmax.xlane.f32.xlu0 %v2613_v1 }
0x1381   :  { %v2615_v7 = vpop.xlane.xlu0 %2614 }
0x1382   :  { %v2618_v48 = vsub.f32 %v2605_v44, %v2615_v7 }
0x1384   :  { %v2620_v50 = vmul.f32 1.442695, %v2618_v48 }
0x1385   :  { %v2617_v53 = vpop.xlane.xlu0 %2616 }
0x1386   :  { %3219 = vpow2.f32 %v2620_v50  ;;  %v2619_v62 = vsub.f32 %v2608_v49, %v2617_v53 }
0x1388   :  { %v2622_v12 = vmul.f32 1.442695, %v2619_v62 }
0x138a   :  { %3221 = vpow2.f32 %v2622_v12 }
0x1390   :  { %v3220_v59 = vpop.eup %3219 }
0x1391   :  { %v2624_v58 = vsel %vm2611_vm0, %v3220_v59, 0.0 }
0x1392   :  { %2626 = vadd.xlane.f32.xlu1 %v2624_v58 }
0x1394   :  { %v3222_v63 = vpop.eup %3221 }
0x1395   :  { %v2625_v57 = vsel %vm2611_vm0, %v3222_v63, 0.0 }
0x1396   :  { %2628 = vadd.xlane.f32.xlu1 %v2625_v57 }
0x141f   :  { %v2627_v10 = vpop.xlane.xlu1 %2626 }
0x1420   :  { %3223 = vlog2.f32 %v2627_v10 }
0x1423   :  { %v2629_v2 = vpop.xlane.xlu1 %2628 }
0x1424   :  { %3225 = vlog2.f32 %v2629_v2 }
0x142a   :  { %v3224_v30 = vpop.eup %3223 }
0x142b   :  { %v2631_v32 = vmul.f32 0.6931472, %v3224_v30 }
0x142d   :  { %v2634_v18 = vadd.f32 %v2631_v32, %v2615_v7 }
0x142e   :  { %v3226_v13 = vpop.eup %3225 }
0x142f   :  { %v2636_v24 = vsub.f32 %v2605_v44, %v2634_v18  ;;  %v2633_v14 = vmul.f32 0.6931472, %v3226_v13 }
0x1431   :  { %2638 = vst [vmem:[#allocation11] sm:$0xff] %v2636_v24  ;;  %v2635_v5 = vadd.f32 %v2633_v14, %v2617_v53 }
0x1433   :  { %v2637_v8 = vsub.f32 %v2608_v49, %v2635_v5 }
0x1435   :  { %2639 = vst [vmem:[#allocation11 + $0x8] sm:$0xff] %v2637_v8 }
0x1436   :  { %3304 = shalt.err (!%p3301_p0)
}
0x1437   :  { %s3305_s14 = scalar_lea.hbm %s4049_s7, 256 }
0x1438   :  { %p3306_p1 = scmp.ne.s32.totalorder %s4049_s7, %s3305_s14  ;;  %p3309_p2 = scmp.lt.u32.totalorder %s3305_s14, %s4049_s7 }
0x143a   :  { %p3311_p3 = pnand %p3309_p2, %p3306_p1 }
0x143c   :  { %3314 = shalt.err (!%p3311_p3)
}
0x143d   :  { %s3344_s19 = smov 8  }
0x143e   :  { %2651 = dma.vmem_to_hbm [thread:$0]  %s2646_s8, 256, %s4049_s7, [#allocation8], %s3336_s2, %s3336_s2, %s3344_s19  }
0x143f   :  { %3323 = dma.done.wait [#allocation8], 256  }
0x1440   :  { %3324 = vsyncadd [#allocation8], 4294967040 }
0x1441   :  { %2655 = vsyncpa [#allocation7], 1 }
0x1442   :  { %2656 = vsyncpa [#allocation10], 1 }
0x1443   :  { %2657 = vsyncpa [#allocation8], 1 }
0x1444   :  { %2658 = vsyncmov [#allocation5] }
0x1447   :  { %s2659_s0 = vpop.sfrf %2658 }
0x1448   :  { %p2795_p4 = scmp.ne.s32.totalorder %s2659_s0, 0 }
0x144a   :  { %2663 = shalt.err (%p2795_p4)  }
0x144b   :  { %2665 = vsyncmov [#allocation5 + $0x1] }
0x144e   :  { %s2666_s4 = vpop.sfrf %2665 }
0x144f   :  { %p2796_p5 = scmp.ne.s32.totalorder %s2666_s4, 0 }
0x1451   :  { %2670 = shalt.err (%p2796_p5)  }

</bundles_post_ra>
